<compile_context>
chip_gen: v7x
topology: tpu7x:2x2x1
jax: 0.10.0
libtpu: 0.0.40
codegen_flags: <defaults>
</compile_context>

<pallas_src>
import math
import functools

import numpy as np
import jax
import jax.numpy as jnp
from jax.experimental import pallas as pl
from jax.experimental.pallas import tpu as pltpu


def _round_up(x, m):
    return ((x + m - 1) // m) * m


def _vmem_limit_bytes():
    """~75% of physical VMEM (64 MiB/TC on v7x, 128 MiB on v5e/v6e)."""
    phys = 64 * 1024 * 1024          # conservative fallback (v7x per-core size)
    try:
        phys = int(pltpu.get_tpu_info().vmem_capacity_bytes)
    except Exception:
        pass
    return (3 * phys) // 4


def _vmem_estimate(tq, nkv, cp, cip):
    """Rough per-step VMEM footprint (double-buffered blocks + scratch + live)."""
    f32, bf16 = 4, 2
    blocks = (2 * tq * cp * f32            # x block (double-buffered)
              + 2 * cp * tq * f32          # out block
              + 2 * cip * nkv * bf16       # phi
              + 2 * nkv * cip * bf16       # g
              + 4 * cp * cip * bf16        # theta_w + w_w
              + 2 * (3 * tq + 2 * nkv + cip + cp) * f32)   # prior factors, biases
    scratch = tq * nkv * f32               # positional prior (single buffered)
    live = (3 * tq * nkv * f32             # f / logits / softmax intermediates
            + 2 * tq * cip * f32           # theta / y
            + 2 * tq * cp * f32)           # w_y / transposed result
    return blocks + scratch + live


def _tiling(nq, nkv, cp, cip):
    """Largest 128-multiple q-tile that fits the hardware VMEM budget."""
    limit = _vmem_limit_bytes()
    tq = 128
    for cand in (512, 384, 256, 128):
        if _vmem_estimate(cand, nkv, cp, cip) <= limit:
            tq = cand
            break
    if nq < tq:                      # do not tile finer than the problem
        tq = max(128, _round_up(nq, 128))
    nq_pad = _round_up(nq, tq)       # pad + slice instead of the TQ=Nq fallback
    return tq, nq_pad, limit


@functools.lru_cache(maxsize=None)
def _prior_factors(h, w, nq_pad):
    """Tiny host factors of the positional Gaussian prior.

    Reference per query row j and key m = i*down_col + k:
        ele   = -((i - cx_j)^2 + (k - cy_j)^2) / (2*sigma^2)
        prior = (ele - min_m ele) / (max_m ele - min_m ele) - 1
    (cx_j, cy_j) is always an on-grid point, so max_m ele = 0 and
    min_m ele = -max_d2_j / (2*sigma^2) with
        max_d2_j = max(cx_j, dr-1-cx_j)^2 + max(cy_j, dc-1-cy_j)^2,
    hence  prior = -((i - cx_j)^2 + (k - cy_j)^2) / max_d2_j   (sigma cancels).
    The kernel rebuilds the prior from these O(Nq + Nkv) factors; the (Nq, Nkv)
    host array and its HBM stream are gone entirely."""
    dr, dc = h // 2, w // 2
    nq = h * w
    j = np.arange(nq)
    cx = np.floor(j / 4.0 / dc)
    cy = np.floor(j / 4.0) % dc
    max_d2 = (np.maximum(cx, (dr - 1) - cx) ** 2
              + np.maximum(cy, (dc - 1) - cy) ** 2)
    ncj = -1.0 / np.where(max_d2 > 0.0, max_d2, 1.0)   # guard degenerate 1x1 grid

    def col(a):                                        # (nq_pad, 1) f32 column
        a = np.pad(a.astype(np.float32), (0, nq_pad - nq))
        return jnp.asarray(a.reshape(nq_pad, 1))

    m = np.arange(dr * dc)
    mx = jnp.asarray((m // dc).astype(np.float32).reshape(1, dr * dc))
    my = jnp.asarray((m % dc).astype(np.float32).reshape(1, dr * dc))
    return col(cx), col(cy), col(ncj), mx, my


def _nonlocal_kernel(x_ref, phi_ref, g_ref, cx_ref, cy_ref, ncj_ref,
                     mx_ref, my_ref, thw_ref, thb_ref, ww_ref, wb_ref,
                     out_ref, prior_ref):
    """One (q-tile, batch) grid step.  grid = (n_q_tiles, B), batch innermost.

    x_ref     : (1, TQ, Cp)   f32   query tokens, channels-last, zero-padded C
    phi_ref   : (1, Cip, Nkv) bf16  pooled phi projection
    g_ref     : (1, Nkv, Cip) bf16  pooled g projection, pre-normalized to [0,1]
    cx/cy     : (TQ, 1)       f32   prior centre coordinates per query row
    ncj       : (TQ, 1)       f32   -1 / max squared distance (prior row scale)
    mx/my     : (1, Nkv)      f32   key grid coordinates
    thw/thb   : (Cp,Cip)bf16 / (1,Cip)f32  theta 1x1 conv
    ww/wb     : (Cip,Cp)bf16 / (1,Cp)f32   W 1x1 conv with BatchNorm folded in
    out_ref   : (1, Cp, TQ)   f32   channels-first output tile
    prior_ref : (TQ, Nkv)     f32   VMEM scratch, persists across the batch axis
    """
    # Positional prior is input independent: build it once per q-tile (at batch
    # index 0) and reuse it for every batch element of the inner grid axis.
    @pl.when(pl.program_id(1) == 0)
    def _():
        dx = mx_ref[...] - cx_ref[...]                 # (TQ, Nkv) via broadcast
        dy = my_ref[...] - cy_ref[...]
        prior_ref[...] = (dx * dx + dy * dy) * ncj_ref[...]   # temp_norm in [-1, 0]

    x = x_ref[0]                                       # (TQ, Cp) f32

    # theta projection (1x1 conv == per-token matmul); bf16 operands, f32 acc
    theta = jnp.dot(x.astype(jnp.bfloat16), thw_ref[...],
                    preferred_element_type=jnp.float32) + thb_ref[...]

    # attention logits
    f = jnp.dot(theta.astype(jnp.bfloat16), phi_ref[0],
                preferred_element_type=jnp.float32)    # (TQ, Nkv) f32

    # Per-row min-max normalization of f to [-1, 0]: only (TQ, 1) exact
    # reciprocals hit the EUP; the broadcasts over Nkv are VPU mul/add.  The
    # "-1" is folded into the per-row offset column.
    f_min = jnp.min(f, axis=-1, keepdims=True)
    f_max = jnp.max(f, axis=-1, keepdims=True)
    den = f_max - f_min
    inv_den = 1.0 / jnp.where(den > 0.0, den, 1.0)     # (TQ, 1), exact
    off = -f_min * inv_den - 1.0                       # (TQ, 1)

    # logits = (f - f_min)/den - 1 + prior  in [-2, 0]  ->  exp() needs no
    # max-subtraction (softmax is shift invariant anyway).
    # TODO(synk): on v6e/v7x this element-wise chain could run in bf16 for ~2x
    # VPU/EUP throughput; kept f32 to stay exact on v5e and vs the reference.
    p = jnp.exp(f * inv_den + off + prior_ref[...])
    inv_sum = 1.0 / jnp.sum(p, axis=-1, keepdims=True)  # (TQ, 1), exact
    f_div_c = p * inv_sum

    # aggregate pre-normalized values
    y = jnp.dot(f_div_c.astype(jnp.bfloat16), g_ref[0],
                preferred_element_type=jnp.float32)     # (TQ, Cip)

    # W projection with BatchNorm folded in (inference semantics) + residual;
    # stored channels-first so the wrapper needs no full-tensor transpose.
    w_y = jnp.dot(y.astype(jnp.bfloat16), ww_ref[...],
                  preferred_element_type=jnp.float32) + wb_ref[...]
    out_ref[0] = (w_y + x).T                            # (Cp, TQ)


def _nonlocal_forward(x, params, cx, cy, ncj, mx, my):
    B, C, H, W = x.shape
    Ci = params["theta_w"].shape[1]
    Nq = H * W
    dH, dW = H // 2, W // 2          # sub_sample=True -> 2x2 max pool
    Nkv = dH * dW

    # TODO(synk): on v7x with real C/Ci >= 128, pad contractions to 256 (2x256
    # MXU); for the tiny demo channels, 128 is already mostly padding.
    Cp = _round_up(C, 128)
    Cip = _round_up(Ci, 128)
    TQ, Nq_pad, vmem_limit = _tiling(Nq, Nkv, Cp, Cip)
    n_qt = Nq_pad // TQ

    # ---- phi / g 1x1 conv + 2x2 max pool (XLA glue, fused inside this jit) ----
    # TODO(synk): the phi/g projections + pool stay as XLA ops, not an
    # in-kernel prologue.
    def conv1x1(inp, w, b):          # w: (Ci, C), b: (Ci,)
        return jnp.einsum('bchw,oc->bohw', inp, w) + b[None, :, None, None]

    def pool2x2(t):                  # (B, Ci, H, W) -> (B, Ci, H//2, W//2)
        return jnp.max(t[:, :, :2 * dH, :2 * dW].reshape(B, Ci, dH, 2, dW, 2),
                       axis=(3, 5))

    phi_x = pool2x2(conv1x1(x, params["phi_w"], params["phi_b"])).reshape(B, Ci, Nkv)
    g_x = pool2x2(conv1x1(x, params["g_w"], params["g_b"])).reshape(B, Ci, Nkv)
    g_x = g_x.transpose(0, 2, 1)                           # (B, Nkv, Ci)

    # per-channel min-max normalization of g over key positions -> [0, 1]
    g_min = jnp.min(g_x, axis=1, keepdims=True)
    g_max = jnp.max(g_x, axis=1, keepdims=True)
    g_den = jnp.where(g_max - g_min > 0.0, g_max - g_min, 1.0)
    g_n = (g_x - g_min) / g_den

    # fold BatchNorm (inference affine) into the W projection.
    # TODO(synk): PyTorch train-mode batch statistics are not modelled; with
    # gamma=beta=0 (as in the module's __init__) the result is identical.
    scale = params["bn_gamma"] * jax.lax.rsqrt(params["bn_var"] + 1e-5)   # (C,)
    w_w_f = params["w_w"] * scale[None, :]                                # (Ci, C)
    w_b_f = (params["w_b"] - params["bn_mean"]) * scale + params["bn_beta"]

    # ---- pad to lane-dense widths, cast MXU-only operands to bf16 ----
    x_flat = x.reshape(B, C, Nq).transpose(0, 2, 1)        # (B, Nq, C) f32
    x_p = jnp.pad(x_flat, ((0, 0), (0, Nq_pad - Nq), (0, Cp - C)))
    phi_p = jnp.pad(phi_x, ((0, 0), (0, Cip - Ci), (0, 0))).astype(jnp.bfloat16)
    g_p = jnp.pad(g_n, ((0, 0), (0, 0), (0, Cip - Ci))).astype(jnp.bfloat16)
    th_w = jnp.pad(params["theta_w"],
                   ((0, Cp - C), (0, Cip - Ci))).astype(jnp.bfloat16)
    th_b = jnp.pad(params["theta_b"], ((0, Cip - Ci),)).reshape(1, Cip)
    w_w = jnp.pad(w_w_f, ((0, Cip - Ci), (0, Cp - C))).astype(jnp.bfloat16)
    w_b = jnp.pad(w_b_f, ((0, Cp - C),)).reshape(1, Cp)

    # Grid: q-tiles outer ("parallel"), batch inner ("arbitrary" so the prior
    # scratch built at b==0 is reused for b>0 in-order).  Nkv is kept unpadded
    # (full-extent block dims), so no key-masking is required.
    # NOTE: the weight / phi / g specs could use pipeline_mode=pl.Buffered(1)
    # to save VMEM on v7x at large real C/Ci; default buffering kept here.
    grid_spec = pltpu.PrefetchScalarGridSpec(
        num_scalar_prefetch=0,
        grid=(n_qt, B),
        in_specs=[
            pl.BlockSpec((1, TQ, Cp),   lambda q, b: (b, q, 0)),   # x tokens
            pl.BlockSpec((1, Cip, Nkv), lambda q, b: (b, 0, 0)),   # phi (bf16)
            pl.BlockSpec((1, Nkv, Cip), lambda q, b: (b, 0, 0)),   # g, normed (bf16)
            pl.BlockSpec((TQ, 1),       lambda q, b: (q, 0)),      # prior cx
            pl.BlockSpec((TQ, 1),       lambda q, b: (q, 0)),      # prior cy
            pl.BlockSpec((TQ, 1),       lambda q, b: (q, 0)),      # prior -1/max_d2
            pl.BlockSpec((1, Nkv),      lambda q, b: (0, 0)),      # prior mx
            pl.BlockSpec((1, Nkv),      lambda q, b: (0, 0)),      # prior my
            pl.BlockSpec((Cp, Cip),     lambda q, b: (0, 0)),      # theta_w (const)
            pl.BlockSpec((1, Cip),      lambda q, b: (0, 0)),      # theta_b (const)
            pl.BlockSpec((Cip, Cp),     lambda q, b: (0, 0)),      # w_w, BN folded
            pl.BlockSpec((1, Cp),       lambda q, b: (0, 0)),      # w_b, BN folded
        ],
        out_specs=pl.BlockSpec((1, Cp, TQ), lambda q, b: (b, 0, q)),
        scratch_shapes=[pltpu.VMEM((TQ, Nkv), jnp.float32)],
    )

    out_p = pl.pallas_call(
        _nonlocal_kernel,
        out_shape=jax.ShapeDtypeStruct((B, Cp, Nq_pad), jnp.float32),
        grid_spec=grid_spec,
        compiler_params=pltpu.CompilerParams(
            dimension_semantics=("parallel", "arbitrary"),
            vmem_limit_bytes=vmem_limit),
    )(x_p, phi_p, g_p, cx, cy, ncj, mx, my, th_w, th_b, w_w, w_b)

    # channels-first kernel output: only slice off the padding and reshape
    # (no full-tensor XLA transpose pass).
    return out_p[:, :C, :Nq].reshape(B, C, H, W)


_nonlocal_forward_jit = jax.jit(_nonlocal_forward)


def nonlocal_block_2d(x, params):
    """x: (B, C, H, W) float32 (NCHW, same layout as the PyTorch module)."""
    B, C, H, W = x.shape
    Ci = params["theta_w"].shape[1]
    _, nq_pad, _ = _tiling(H * W, (H // 2) * (W // 2),
                           _round_up(C, 128), _round_up(Ci, 128))
    cx, cy, ncj, mx, my = _prior_factors(H, W, nq_pad)   # cached per (H, W)
    return _nonlocal_forward_jit(x, params, cx, cy, ncj, mx, my)


def init_params(key, C, Ci):
    """Parameter init mirroring the module's __init__ shapes.  Conv weights ~
    PyTorch default uniform(+/- 1/sqrt(fan_in)); BN gamma/beta zero-initialized
    exactly as nn.init.constant_ in the module."""
    ks = jax.random.split(key, 8)
    bnd_in = 1.0 / math.sqrt(C)      # fan_in of C->Ci 1x1 convs
    bnd_ci = 1.0 / math.sqrt(Ci)     # fan_in of Ci->C 1x1 conv (W)

    def u(k, shape, bound):
        return jax.random.uniform(k, shape, jnp.float32, -bound, bound)

    return {
        "g_w": u(ks[0], (Ci, C), bnd_in), "g_b": u(ks[1], (Ci,), bnd_in),
        "phi_w": u(ks[2], (Ci, C), bnd_in), "phi_b": u(ks[3], (Ci,), bnd_in),
        "theta_w": u(ks[4], (C, Ci), bnd_in),   # stored transposed (C, Ci)
        "theta_b": u(ks[5], (Ci,), bnd_in),
        "w_w": u(ks[6], (Ci, C), bnd_ci),       # stored transposed (Ci, C)
        "w_b": u(ks[7], (C,), bnd_ci),
        "bn_gamma": jnp.zeros((C,), jnp.float32),  # nn.init.constant_(W[1].weight, 0)
        "bn_beta": jnp.zeros((C,), jnp.float32),   # nn.init.constant_(W[1].bias, 0)
        "bn_mean": jnp.zeros((C,), jnp.float32),
        "bn_var": jnp.ones((C,), jnp.float32),
    }


# --------------------------- pure-JAX reference ----------------------------

def _build_temp_normalized_ref(n_q, down_row, down_col):
    """Direct (empirical min/max) build of the positional prior; mirrors the
    per-row numpy loop in the PyTorch forward().  Used only by the reference,
    so it independently validates the kernel's closed-form factorization."""
    sigma = max(1, int(min(down_row, down_col) / 10))
    j = np.arange(n_q)
    coor_x = np.floor(j / 4.0 / down_col)
    coor_y = np.floor(j / 4.0) % down_col
    mi = np.arange(down_row).reshape(down_row, 1)
    mk = np.arange(down_col).reshape(1, down_col)
    dx = mi[None, :, :] - coor_x[:, None, None]
    dy = mk[None, :, :] - coor_y[:, None, None]
    ele = -(dx * dx + dy * dy) / (2.0 * math.pow(sigma, 2))
    t = ele.reshape(n_q, down_row * down_col)
    t_min = t.min(axis=1, keepdims=True)
    t_max = t.max(axis=1, keepdims=True)
    den = np.where(t_max - t_min > 0.0, t_max - t_min, 1.0)
    return ((t - t_min) / den - 1.0).astype(np.float32)


def _reference_forward(x, params):
    """Pure-JAX f32 re-implementation of the PyTorch forward (eval-mode BN)."""
    B, C, H, W = x.shape
    Ci = params["theta_w"].shape[1]
    dH, dW = H // 2, W // 2
    Nq, Nkv = H * W, dH * dW

    def conv1x1(inp, w, b):
        return jnp.einsum('bchw,oc->bohw', inp, w) + b[None, :, None, None]

    def pool2x2(t):
        return jnp.max(t[:, :, :2 * dH, :2 * dW].reshape(B, Ci, dH, 2, dW, 2),
                       axis=(3, 5))

    g_x = pool2x2(conv1x1(x, params["g_w"], params["g_b"]))
    g_x = g_x.reshape(B, Ci, Nkv).transpose(0, 2, 1)            # (B, Nkv, Ci)
    phi_x = pool2x2(conv1x1(x, params["phi_w"], params["phi_b"])).reshape(B, Ci, Nkv)
    theta = (jnp.einsum('bchw,co->bohw', x, params["theta_w"])
             + params["theta_b"][None, :, None, None]).reshape(B, Ci, Nq)
    theta = theta.transpose(0, 2, 1)                            # (B, Nq, Ci)

    f = jnp.einsum('bqc,bck->bqk', theta, phi_x)                # (B, Nq, Nkv)
    f_min = f.min(axis=-1, keepdims=True)
    f_max = f.max(axis=-1, keepdims=True)
    f = (f - f_min) / jnp.where(f_max - f_min > 0, f_max - f_min, 1.0) - 1.0
    temp = jnp.asarray(_build_temp_normalized_ref(Nq, dH, dW))[None]
    w_att = jax.nn.softmax(f + temp, axis=-1)

    g_min = g_x.min(axis=1, keepdims=True)
    g_max = g_x.max(axis=1, keepdims=True)
    g_n = (g_x - g_min) / jnp.where(g_max - g_min > 0, g_max - g_min, 1.0)

    y = jnp.einsum('bqk,bkc->bqc', w_att, g_n)                  # (B, Nq, Ci)
    y = y.transpose(0, 2, 1).reshape(B, Ci, H, W)
    w_y = (jnp.einsum('bihw,ic->bchw', y, params["w_w"])
           + params["w_b"][None, :, None, None])
    scale = params["bn_gamma"] * jax.lax.rsqrt(params["bn_var"] + 1e-5)
    w_y = ((w_y - params["bn_mean"][None, :, None, None])
           * scale[None, :, None, None]
           + params["bn_beta"][None, :, None, None])
    return w_y + x


if __name__ == "__main__":
    B, C, H, W = 2, 4, 16, 16
    Ci = max(1, C // 2)

    key = jax.random.PRNGKey(0)
    kx, kp = jax.random.split(key)
    x = jax.random.normal(kx, (B, C, H, W), jnp.float32)
    params = init_params(kp, C, Ci)

    # 1) Module exactly as initialized: BN gamma = beta = 0 -> W(y) = 0, so the
    #    block is the identity mapping (strict check).
    z = jax.block_until_ready(nonlocal_block_2d(x, params))
    assert z.shape == x.shape and z.dtype == x.dtype
    assert bool(jnp.all(jnp.isfinite(z))), "non-finite values in output"
    assert bool(jnp.allclose(z, x, atol=1e-5)), "output mismatch vs expected identity"

    # 2) Non-trivial BN affine: exercise the full attention path against a
    #    pure-JAX f32 reference (kernel uses bf16 MXU operands -> loose tol).
    params2 = dict(params)
    params2["bn_gamma"] = jnp.full((C,), 0.7, jnp.float32)
    params2["bn_beta"] = jnp.full((C,), 0.1, jnp.float32)
    params2["bn_mean"] = jnp.full((C,), 0.05, jnp.float32)
    params2["bn_var"] = jnp.full((C,), 1.3, jnp.float32)
    z2 = jax.block_until_ready(nonlocal_block_2d(x, params2))
    ref2 = _reference_forward(x, params2)
    assert bool(jnp.all(jnp.isfinite(z2))), "non-finite values in output (test 2)"
    assert bool(jnp.allclose(z2, ref2, atol=1e-1)), "mismatch vs reference forward"

    print("KERNEL_OK")
</pallas_src>

<mosaic_0001>
module attributes {stable_mosaic.version = 11 : i64} {
  func.func @_nonlocal_kernel(%arg0: i32, %arg1: i32, %arg2: memref<1x256x128xf32, #tpu.memory_space<vmem>>, %arg3: memref<1x128x64xbf16, #tpu.memory_space<vmem>>, %arg4: memref<1x64x128xbf16, #tpu.memory_space<vmem>>, %arg5: memref<256x1xf32, #tpu.memory_space<vmem>>, %arg6: memref<256x1xf32, #tpu.memory_space<vmem>>, %arg7: memref<256x1xf32, #tpu.memory_space<vmem>>, %arg8: memref<1x64xf32, #tpu.memory_space<vmem>>, %arg9: memref<1x64xf32, #tpu.memory_space<vmem>>, %arg10: memref<128x128xbf16, #tpu.memory_space<vmem>>, %arg11: memref<1x128xf32, #tpu.memory_space<vmem>>, %arg12: memref<128x128xbf16, #tpu.memory_space<vmem>>, %arg13: memref<1x128xf32, #tpu.memory_space<vmem>>, %arg14: memref<1x128x256xf32, #tpu.memory_space<vmem>>, %arg15: memref<256x64xf32, #tpu.memory_space<vmem>>) attributes {dimension_semantics = [#tpu.dimension_semantics<parallel>, #tpu.dimension_semantics<arbitrary>], iteration_bounds = array<i64: 1, 2>, scalar_prefetch = 0 : i64, scratch_operands = 1 : i64, tpu.core_type = #tpu.core_type<tc>, window_params = [{transform_indices = @transform_0, window_bounds = array<i64: 1, 256, 128>}, {transform_indices = @transform_1, window_bounds = array<i64: 1, 128, 64>}, {transform_indices = @transform_2, window_bounds = array<i64: 1, 64, 128>}, {transform_indices = @transform_3, window_bounds = array<i64: 256, 1>}, {transform_indices = @transform_4, window_bounds = array<i64: 256, 1>}, {transform_indices = @transform_5, window_bounds = array<i64: 256, 1>}, {pipeline_mode = #tpu.pipeline_mode<synchronous>, transform_indices = @transform_6, window_bounds = array<i64: 1, 64>}, {pipeline_mode = #tpu.pipeline_mode<synchronous>, transform_indices = @transform_7, window_bounds = array<i64: 1, 64>}, {pipeline_mode = #tpu.pipeline_mode<synchronous>, transform_indices = @transform_8, window_bounds = array<i64: 128, 128>}, {pipeline_mode = #tpu.pipeline_mode<synchronous>, transform_indices = @transform_9, window_bounds = array<i64: 1, 128>}, {pipeline_mode = #tpu.pipeline_mode<synchronous>, transform_indices = @transform_10, window_bounds = array<i64: 128, 128>}, {pipeline_mode = #tpu.pipeline_mode<synchronous>, transform_indices = @transform_11, window_bounds = array<i64: 1, 128>}, {transform_indices = @transform_12, window_bounds = array<i64: 1, 128, 256>}]} {
    %c0_i32 = arith.constant 0 : i32
    %0 = arith.cmpi eq, %arg1, %c0_i32 : i32
    %1 = arith.extui %0 : i1 to i32
    %c0_i32_0 = arith.constant 0 : i32
    %2 = arith.cmpi ne, %1, %c0_i32_0 : i32
    scf.if %2 {
      %c0_34 = arith.constant 0 : index
      %c0_35 = arith.constant 0 : index
      %59 = vector.load %arg8[%c0_34, %c0_35] : memref<1x64xf32, #tpu.memory_space<vmem>>, vector<1x64xf32>
      %c0_36 = arith.constant 0 : index
      %c0_37 = arith.constant 0 : index
      %60 = vector.load %arg5[%c0_36, %c0_37] : memref<256x1xf32, #tpu.memory_space<vmem>>, vector<256x1xf32>
      %61 = vector.broadcast %59 : vector<1x64xf32> to vector<256x64xf32>
      %62 = vector.broadcast %60 : vector<256x1xf32> to vector<256x64xf32>
      %63 = arith.subf %61, %62 : vector<256x64xf32>
      %c0_38 = arith.constant 0 : index
      %c0_39 = arith.constant 0 : index
      %64 = vector.load %arg9[%c0_38, %c0_39] : memref<1x64xf32, #tpu.memory_space<vmem>>, vector<1x64xf32>
      %c0_40 = arith.constant 0 : index
      %c0_41 = arith.constant 0 : index
      %65 = vector.load %arg6[%c0_40, %c0_41] : memref<256x1xf32, #tpu.memory_space<vmem>>, vector<256x1xf32>
      %66 = vector.broadcast %64 : vector<1x64xf32> to vector<256x64xf32>
      %67 = vector.broadcast %65 : vector<256x1xf32> to vector<256x64xf32>
      %68 = arith.subf %66, %67 : vector<256x64xf32>
      %69 = arith.mulf %63, %63 : vector<256x64xf32>
      %70 = arith.mulf %68, %68 : vector<256x64xf32>
      %71 = arith.addf %69, %70 : vector<256x64xf32>
      %c0_42 = arith.constant 0 : index
      %c0_43 = arith.constant 0 : index
      %72 = vector.load %arg7[%c0_42, %c0_43] : memref<256x1xf32, #tpu.memory_space<vmem>>, vector<256x1xf32>
      %73 = vector.broadcast %72 : vector<256x1xf32> to vector<256x64xf32>
      %74 = arith.mulf %71, %73 : vector<256x64xf32>
      %c0_44 = arith.constant 0 : index
      %c0_45 = arith.constant 0 : index
      %75 = vector.load %arg15[%c0_44, %c0_45] : memref<256x64xf32, #tpu.memory_space<vmem>>, vector<256x64xf32>
      tpu.vector_store %arg15[%c0_44, %c0_45], %74 {strides = array<i32>} : memref<256x64xf32, #tpu.memory_space<vmem>>, vector<256x64xf32>,
    } else {
    }
    %c0 = arith.constant 0 : index
    %c0_1 = arith.constant 0 : index
    %c0_2 = arith.constant 0 : index
    %3 = vector.load %arg2[%c0, %c0_1, %c0_2] : memref<1x256x128xf32, #tpu.memory_space<vmem>>, vector<1x256x128xf32>
    %4 = vector.shape_cast %3 : vector<1x256x128xf32> to vector<256x128xf32>
    %5 = arith.truncf %4 : vector<256x128xf32> to vector<256x128xbf16>
    %c0_3 = arith.constant 0 : index
    %c0_4 = arith.constant 0 : index
    %6 = vector.load %arg10[%c0_3, %c0_4] : memref<128x128xbf16, #tpu.memory_space<vmem>>, vector<128x128xbf16>
    %cst = arith.constant dense<0.000000e+00> : vector<256x128xf32>
    %7 = tpu.matmul %5, %6, %cst {dimension_numbers = #tpu.dot_dimension_numbers<[1], [0], [0], [1], [0, 0, 1, 1], [], []>} : vector<256x128xbf16>, vector<128x128xbf16>, vector<256x128xf32> -> vector<256x128xf32>
    %c0_5 = arith.constant 0 : index
    %c0_6 = arith.constant 0 : index
    %8 = vector.load %arg11[%c0_5, %c0_6] : memref<1x128xf32, #tpu.memory_space<vmem>>, vector<1x128xf32>
    %9 = vector.broadcast %8 : vector<1x128xf32> to vector<256x128xf32>
    %10 = arith.addf %7, %9 : vector<256x128xf32>
    %11 = arith.truncf %10 : vector<256x128xf32> to vector<256x128xbf16>
    %c0_7 = arith.constant 0 : index
    %c0_8 = arith.constant 0 : index
    %c0_9 = arith.constant 0 : index
    %12 = vector.load %arg3[%c0_7, %c0_8, %c0_9] : memref<1x128x64xbf16, #tpu.memory_space<vmem>>, vector<1x128x64xbf16>
    %13 = vector.shape_cast %12 : vector<1x128x64xbf16> to vector<128x64xbf16>
    %cst_10 = arith.constant dense<0.000000e+00> : vector<256x64xf32>
    %14 = tpu.matmul %11, %13, %cst_10 {dimension_numbers = #tpu.dot_dimension_numbers<[1], [0], [0], [1], [0, 0, 1, 1], [], []>} : vector<256x128xbf16>, vector<128x64xbf16>, vector<256x64xf32> -> vector<256x64xf32>
    %cst_11 = arith.constant dense<0x7F800000> : vector<256xf32>
    %15 = vector.multi_reduction <minimumf>, %14, %cst_11 [1] : vector<256x64xf32> to vector<256xf32>
    %16 = vector.shape_cast %15 : vector<256xf32> to vector<256x1xf32>
    %cst_12 = arith.constant dense<0xFF800000> : vector<256xf32>
    %17 = vector.multi_reduction <maximumf>, %14, %cst_12 [1] : vector<256x64xf32> to vector<256xf32>
    %18 = vector.shape_cast %17 : vector<256xf32> to vector<256x1xf32>
    %19 = arith.subf %18, %16 : vector<256x1xf32>
    %cst_13 = arith.constant 0.000000e+00 : f32
    %20 = vector.broadcast %cst_13 : f32 to vector<256x1xf32>
    %21 = arith.cmpf ogt, %19, %20 : vector<256x1xf32>
    %cst_14 = arith.constant 1.000000e+00 : f32
    %22 = vector.broadcast %cst_14 : f32 to vector<256x1xf32>
    %23 = arith.select %21, %19, %22 : vector<256x1xi1>, vector<256x1xf32>
    %cst_15 = arith.constant 1.000000e+00 : f32
    %24 = vector.broadcast %cst_15 : f32 to vector<256x1xf32>
    %25 = arith.divf %24, %23 : vector<256x1xf32>
    %cst_16 = arith.constant 0.000000e+00 : f32
    %26 = vector.broadcast %cst_16 : f32 to vector<256x1xf32>
    %27 = arith.subf %26, %16 : vector<256x1xf32>
    %28 = arith.mulf %27, %25 : vector<256x1xf32>
    %cst_17 = arith.constant 1.000000e+00 : f32
    %29 = vector.broadcast %cst_17 : f32 to vector<256x1xf32>
    %30 = arith.subf %28, %29 : vector<256x1xf32>
    %31 = vector.broadcast %25 : vector<256x1xf32> to vector<256x64xf32>
    %32 = arith.mulf %14, %31 : vector<256x64xf32>
    %33 = vector.broadcast %30 : vector<256x1xf32> to vector<256x64xf32>
    %34 = arith.addf %32, %33 : vector<256x64xf32>
    %c0_18 = arith.constant 0 : index
    %c0_19 = arith.constant 0 : index
    %35 = vector.load %arg15[%c0_18, %c0_19] : memref<256x64xf32, #tpu.memory_space<vmem>>, vector<256x64xf32>
    %36 = arith.addf %34, %35 : vector<256x64xf32>
    %37 = math.exp %36 : vector<256x64xf32>
    %cst_20 = arith.constant dense<0.000000e+00> : vector<256xf32>
    %38 = vector.multi_reduction <add>, %37, %cst_20 [1] : vector<256x64xf32> to vector<256xf32>
    %39 = vector.shape_cast %38 : vector<256xf32> to vector<256x1xf32>
    %cst_21 = arith.constant 1.000000e+00 : f32
    %40 = vector.broadcast %cst_21 : f32 to vector<256x1xf32>
    %41 = arith.divf %40, %39 : vector<256x1xf32>
    %42 = vector.broadcast %41 : vector<256x1xf32> to vector<256x64xf32>
    %43 = arith.mulf %37, %42 : vector<256x64xf32>
    %44 = arith.truncf %43 : vector<256x64xf32> to vector<256x64xbf16>
    %c0_22 = arith.constant 0 : index
    %c0_23 = arith.constant 0 : index
    %c0_24 = arith.constant 0 : index
    %45 = vector.load %arg4[%c0_22, %c0_23, %c0_24] : memref<1x64x128xbf16, #tpu.memory_space<vmem>>, vector<1x64x128xbf16>
    %46 = vector.shape_cast %45 : vector<1x64x128xbf16> to vector<64x128xbf16>
    %cst_25 = arith.constant dense<0.000000e+00> : vector<256x128xf32>
    %47 = tpu.matmul %44, %46, %cst_25 {dimension_numbers = #tpu.dot_dimension_numbers<[1], [0], [0], [1], [0, 0, 1, 1], [], []>} : vector<256x64xbf16>, vector<64x128xbf16>, vector<256x128xf32> -> vector<256x128xf32>
    %48 = arith.truncf %47 : vector<256x128xf32> to vector<256x128xbf16>
    %c0_26 = arith.constant 0 : index
    %c0_27 = arith.constant 0 : index
    %49 = vector.load %arg12[%c0_26, %c0_27] : memref<128x128xbf16, #tpu.memory_space<vmem>>, vector<128x128xbf16>
    %cst_28 = arith.constant dense<0.000000e+00> : vector<256x128xf32>
    %50 = tpu.matmul %48, %49, %cst_28 {dimension_numbers = #tpu.dot_dimension_numbers<[1], [0], [0], [1], [0, 0, 1, 1], [], []>} : vector<256x128xbf16>, vector<128x128xbf16>, vector<256x128xf32> -> vector<256x128xf32>
    %c0_29 = arith.constant 0 : index
    %c0_30 = arith.constant 0 : index
    %51 = vector.load %arg13[%c0_29, %c0_30] : memref<1x128xf32, #tpu.memory_space<vmem>>, vector<1x128xf32>
    %52 = vector.broadcast %51 : vector<1x128xf32> to vector<256x128xf32>
    %53 = arith.addf %50, %52 : vector<256x128xf32>
    %54 = arith.addf %53, %4 : vector<256x128xf32>
    %55 = tpu.transpose %54, [1, 0] : vector<256x128xf32> -> vector<128x256xf32>
    %c0_31 = arith.constant 0 : index
    %c0_32 = arith.constant 0 : index
    %c0_33 = arith.constant 0 : index
    %56 = vector.load %arg14[%c0_31, %c0_32, %c0_33] : memref<1x128x256xf32, #tpu.memory_space<vmem>>, vector<1x128x256xf32>
    %57 = vector.shape_cast %56 : vector<1x128x256xf32> to vector<128x256xf32>
    %58 = vector.shape_cast %55 : vector<128x256xf32> to vector<1x128x256xf32>
    tpu.vector_store %arg14[%c0_31, %c0_32, %c0_33], %58 {strides = array<i32>} : memref<1x128x256xf32, #tpu.memory_space<vmem>>, vector<1x128x256xf32>,
    return
  }
  func.func @transform_0(%arg0: i32, %arg1: i32) -> (i32, i32, i32) {
    %c0_i32 = arith.constant 0 : i32
    %c0_i32_0 = arith.constant 0 : i32
    return %arg1, %arg0, %c0_i32 : i32, i32, i32
  }
  func.func @transform_1(%arg0: i32, %arg1: i32) -> (i32, i32, i32) {
    %c0_i32 = arith.constant 0 : i32
    %c0_i32_0 = arith.constant 0 : i32
    %c0_i32_1 = arith.constant 0 : i32
    return %arg1, %c0_i32, %c0_i32_0 : i32, i32, i32
  }
  func.func @transform_2(%arg0: i32, %arg1: i32) -> (i32, i32, i32) {
    %c0_i32 = arith.constant 0 : i32
    %c0_i32_0 = arith.constant 0 : i32
    %c0_i32_1 = arith.constant 0 : i32
    return %arg1, %c0_i32, %c0_i32_0 : i32, i32, i32
  }
  func.func @transform_3(%arg0: i32, %arg1: i32) -> (i32, i32) {
    %c0_i32 = arith.constant 0 : i32
    %c0_i32_0 = arith.constant 0 : i32
    return %arg0, %c0_i32 : i32, i32
  }
  func.func @transform_4(%arg0: i32, %arg1: i32) -> (i32, i32) {
    %c0_i32 = arith.constant 0 : i32
    %c0_i32_0 = arith.constant 0 : i32
    return %arg0, %c0_i32 : i32, i32
  }
  func.func @transform_5(%arg0: i32, %arg1: i32) -> (i32, i32) {
    %c0_i32 = arith.constant 0 : i32
    %c0_i32_0 = arith.constant 0 : i32
    return %arg0, %c0_i32 : i32, i32
  }
  func.func @transform_6(%arg0: i32, %arg1: i32) -> (i32, i32) {
    %c0_i32 = arith.constant 0 : i32
    %c0_i32_0 = arith.constant 0 : i32
    %c0_i32_1 = arith.constant 0 : i32
    return %c0_i32, %c0_i32_0 : i32, i32
  }
  func.func @transform_7(%arg0: i32, %arg1: i32) -> (i32, i32) {
    %c0_i32 = arith.constant 0 : i32
    %c0_i32_0 = arith.constant 0 : i32
    %c0_i32_1 = arith.constant 0 : i32
    return %c0_i32, %c0_i32_0 : i32, i32
  }
  func.func @transform_8(%arg0: i32, %arg1: i32) -> (i32, i32) {
    %c0_i32 = arith.constant 0 : i32
    %c0_i32_0 = arith.constant 0 : i32
    %c0_i32_1 = arith.constant 0 : i32
    return %c0_i32, %c0_i32_0 : i32, i32
  }
  func.func @transform_9(%arg0: i32, %arg1: i32) -> (i32, i32) {
    %c0_i32 = arith.constant 0 : i32
    %c0_i32_0 = arith.constant 0 : i32
    %c0_i32_1 = arith.constant 0 : i32
    return %c0_i32, %c0_i32_0 : i32, i32
  }
  func.func @transform_10(%arg0: i32, %arg1: i32) -> (i32, i32) {
    %c0_i32 = arith.constant 0 : i32
    %c0_i32_0 = arith.constant 0 : i32
    %c0_i32_1 = arith.constant 0 : i32
    return %c0_i32, %c0_i32_0 : i32, i32
  }
  func.func @transform_11(%arg0: i32, %arg1: i32) -> (i32, i32) {
    %c0_i32 = arith.constant 0 : i32
    %c0_i32_0 = arith.constant 0 : i32
    %c0_i32_1 = arith.constant 0 : i32
    return %c0_i32, %c0_i32_0 : i32, i32
  }
  func.func @transform_12(%arg0: i32, %arg1: i32) -> (i32, i32, i32) {
    %c0_i32 = arith.constant 0 : i32
    %c0_i32_0 = arith.constant 0 : i32
    return %arg1, %c0_i32, %arg0 : i32, i32, i32
  }
}

</mosaic_0001>

<bundles_post_ra>
// kernel: _nonlocal_forward.1
= control target key start
LH: loop header
LB: loop body
LE: loop exit
PB: predicated region body
PF: predicated region fallthrough
CT: control target
= control target key end

     0   :  { %s4270_s21 = smov 0   ;;  %s4272_s22 = smov 0   ;;  %s5621_s0 = inlined_call_operand.vmem [shape: f32[2,256,128], index: 0, kind: input, shape index: {}]   ;;  %s5622_s1 = inlined_call_operand.vmem [shape: bf16[2,128,64], index: 1, kind: input, shape index: {}]   ;;  %s5623_s2 = inlined_call_operand.vmem [shape: bf16[2,64,128], index: 2, kind: input, shape index: {}]   ;;  %s5624_s3 = inlined_call_operand.vmem [shape: f32[256,1], index: 3, kind: input, shape index: {}]   ;;  %s5625_s4 = inlined_call_operand.vmem [shape: f32[256,1], index: 4, kind: input, shape index: {}]   ;;  %s5626_s5 = inlined_call_operand.vmem [shape: f32[256,1], index: 5, kind: input, shape index: {}]   ;;  %s5627_s6 = inlined_call_operand.vmem [shape: f32[1,64], index: 6, kind: input, shape index: {}]   ;;  %s5628_s7 = inlined_call_operand.vmem [shape: f32[1,64], index: 7, kind: input, shape index: {}]   ;;  %s5629_s8 = inlined_call_operand.vmem [shape: bf16[128,128], index: 8, kind: input, shape index: {}]   ;;  %s5630_s9 = inlined_call_operand.vmem [shape: f32[1,128], index: 9, kind: input, shape index: {}]   ;;  %s5631_s10 = inlined_call_operand.vmem [shape: bf16[128,128], index: 10, kind: input, shape index: {}]   ;;  %s5632_s11 = inlined_call_operand.vmem [shape: f32[1,128], index: 11, kind: input, shape index: {}]   ;;  %s5633_s12 = inlined_call_operand.vmem [shape: f32[2,128,256], index: 12, kind: output, shape index: {}]  }
   0x1   :  { %s4274_s23 = smov 0  }
   0x2 LB: > { %5635 = sst [smem:[#allocation3_spill]] %s4198_s22  ;;  %s31_s24 = sadd.s32 1, %s4198_s22  ;;  %s4202_s23 = sphi %s4274_s23, %s22_s23   ;;  %s4198_s22 = sphi %s4272_s22, %s5672_s22   ;;  %s4194_s21 = sphi %s4270_s21, %s5671_s21  }
   0x3   : > { %p3529_p0 = scmp.ge.s32.totalorder %s4202_s23, 1  ;;  %p32_p1 = scmp.ge.s32.totalorder %s31_s24, 2 }
   0x4   : > { %p436_p2 = scmp.lt.s32.totalorder %s4202_s23, 3 }
   0x5   : > { %s5674_s24 = smov (%p32_p1, %s31_s24), 0 }
   0x6   : > { %5636 = sst [smem:[#allocation4_spill]] %s5674_s24  ;;  %p437_p3 = pnand %p3529_p0, %p436_p2 }
   0x7   : > { %p512_p4 = scmp.lt.s32.totalorder (!%p437_p3), %s4194_s21, 1  ;;  %p3538_p5 = scmp.ne.s32.totalorder (!%p437_p3), %s4194_s21, 0 }
   0x8   : > { %440 = sbr.rel (%p437_p3) target bundleno = 1856 (0x740), region = 68 }
   0xf   : > { %s513_s25 = scalar_select %p512_p4, %s4194_s21, 1 }
  0x10   : > { %563 = sbr.rel (%p3538_p5) target bundleno = 344 (0x158), region = 72 }
  0x11   : > { %s3621_s26 = sshll.u32 %s513_s25, 8  ;;  %s3622_s27 = sshll.u32 %s513_s25, 6 }
  0x12   : > { %s4291_s30 = scalar_lea.vmem %s5621_s0, %s3621_s26  ;;  %s4296_s15 = scalar_lea.vmem %s5622_s1, %s3622_s27 }
  0x13   : > { %s3623_s16 = sshll.u32 %s513_s25, 5  ;;  %s4301_s19 = scalar_lea.vmem %s5633_s12, %s3621_s26 }
  0x14   : > { %s4306_s22 = scalar_lea.vmem %s5623_s2, %s3623_s16 }
  0x17   : > { %v567_v0 = vld [vmem:[%s5624_s3 + $0x10] sm:$0xff]  ;;  %v565_v1 = vld [vmem:[%s5624_s3] sm:$0xff]  ;;  %v4204_v2 = vmov 0   ;;  %v568_v3 = vld [vmem:[%s5624_s3 + $0x18] sm:$0xff]  ;;  %vm1346_vm0 = vcmask 523264  }
  0x18   : > { %3927 = vset.pattern.permute.xlu1 %v4204_v2  ;;  %3926 = vset.pattern.permute.xlu0 %v4204_v2  ;;  %v566_v4 = vld [vmem:[%s5624_s3 + $0x8] sm:$0xff]  ;;  %v569_v6 = vld [vmem:[%s5624_s3 + $0x20] sm:$0xff]  ;;  %v572_v7 = vld [vmem:[%s5624_s3 + $0x38] sm:$0xff] }
  0x19   : > { %615 = vperm.xlu1 %3927, %v567_v0   ;;  %605 = vperm.xlu0 %3926, %v565_v1   ;;  %v570_v5 = vld [vmem:[%s5624_s3 + $0x28] sm:$0xff]  ;;  %v571_v8 = vld [vmem:[%s5624_s3 + $0x30] sm:$0xff]  ;;  %v573_v10 = vld [vmem:[%s5624_s3 + $0x40] sm:$0xff] }
  0x1a   : > { %v574_v9 = vld [vmem:[%s5624_s3 + $0x48] sm:$0xff]  ;;  %v576_v11 = vld [vmem:[%s5624_s3 + $0x58] sm:$0xff]  ;;  %v575_v12 = vld [vmem:[%s5624_s3 + $0x50] sm:$0xff] }
  0x1b   : > { %v578_v13 = vld [vmem:[%s5624_s3 + $0x68] sm:$0xff]  ;;  %v577_v14 = vld [vmem:[%s5624_s3 + $0x60] sm:$0xff]  ;;  %v580_v15 = vld [vmem:[%s5624_s3 + $0x78] sm:$0xff] }
  0x1c   : > { %v579_v16 = vld [vmem:[%s5624_s3 + $0x70] sm:$0xff]  ;;  %v582_v17 = vld [vmem:[%s5624_s3 + $0x88] sm:$0xff]  ;;  %v581_v18 = vld [vmem:[%s5624_s3 + $0x80] sm:$0xff] }
  0x1d   : > { %620 = vperm.xlu1 %3927, %v568_v3   ;;  %610 = vperm.xlu0 %3926, %v566_v4   ;;  %v584_v19 = vld [vmem:[%s5624_s3 + $0x98] sm:$0xff]  ;;  %v583_v20 = vld [vmem:[%s5624_s3 + $0x90] sm:$0xff]  ;;  %v586_v21 = vld [vmem:[%s5624_s3 + $0xa8] sm:$0xff] }
  0x1e   : > { %v585_v22 = vld [vmem:[%s5624_s3 + $0xa0] sm:$0xff]  ;;  %v588_v23 = vld [vmem:[%s5624_s3 + $0xb8] sm:$0xff]  ;;  %v587_v24 = vld [vmem:[%s5624_s3 + $0xb0] sm:$0xff] }
  0x1f   : > { %v590_v25 = vld [vmem:[%s5624_s3 + $0xc8] sm:$0xff]  ;;  %v589_v26 = vld [vmem:[%s5624_s3 + $0xc0] sm:$0xff]  ;;  %v592_v27 = vld [vmem:[%s5624_s3 + $0xd8] sm:$0xff] }
  0x20   : > { %v591_v28 = vld [vmem:[%s5624_s3 + $0xd0] sm:$0xff]  ;;  %v594_v29 = vld [vmem:[%s5624_s3 + $0xe8] sm:$0xff]  ;;  %v593_v30 = vld [vmem:[%s5624_s3 + $0xe0] sm:$0xff] }
  0x21   : > { %630 = vperm.xlu1 %3927, %v570_v5   ;;  %625 = vperm.xlu0 %3926, %v569_v6   ;;  %v596_v31 = vld [vmem:[%s5624_s3 + $0xf8] sm:$0xff]  ;;  %v595_v32 = vld [vmem:[%s5624_s3 + $0xf0] sm:$0xff]  ;;  %v797_v33 = vld [vmem:[%s5625_s4 + $0x8] sm:$0xff] }
  0x22   : > { %v796_v34 = vld [vmem:[%s5625_s4] sm:$0xff]  ;;  %v799_v35 = vld [vmem:[%s5625_s4 + $0x18] sm:$0xff]  ;;  %v798_v36 = vld [vmem:[%s5625_s4 + $0x10] sm:$0xff] }
  0x23   : > { %v801_v37 = vld [vmem:[%s5625_s4 + $0x28] sm:$0xff]  ;;  %v800_v38 = vld [vmem:[%s5625_s4 + $0x20] sm:$0xff]  ;;  %v803_v39 = vld [vmem:[%s5625_s4 + $0x38] sm:$0xff] }
  0x24   : > { %v802_v40 = vld [vmem:[%s5625_s4 + $0x30] sm:$0xff]  ;;  %v805_v41 = vld [vmem:[%s5625_s4 + $0x48] sm:$0xff]  ;;  %v804_v42 = vld [vmem:[%s5625_s4 + $0x40] sm:$0xff] }
  0x25   : > { %640 = vperm.xlu1 %3927, %v572_v7   ;;  %635 = vperm.xlu0 %3926, %v571_v8   ;;  %v807_v43 = vld [vmem:[%s5625_s4 + $0x58] sm:$0xff]  ;;  %v806_v44 = vld [vmem:[%s5625_s4 + $0x50] sm:$0xff]  ;;  %v809_v45 = vld [vmem:[%s5625_s4 + $0x68] sm:$0xff] }
  0x26   : > { %v808_v46 = vld [vmem:[%s5625_s4 + $0x60] sm:$0xff]  ;;  %v811_v47 = vld [vmem:[%s5625_s4 + $0x78] sm:$0xff]  ;;  %v810_v48 = vld [vmem:[%s5625_s4 + $0x70] sm:$0xff] }
  0x27   : > { %v813_v49 = vld [vmem:[%s5625_s4 + $0x88] sm:$0xff]  ;;  %v812_v50 = vld [vmem:[%s5625_s4 + $0x80] sm:$0xff]  ;;  %v815_v51 = vld [vmem:[%s5625_s4 + $0x98] sm:$0xff] }
  0x28   : > { %v814_v52 = vld [vmem:[%s5625_s4 + $0x90] sm:$0xff]  ;;  %v817_v53 = vld [vmem:[%s5625_s4 + $0xa8] sm:$0xff]  ;;  %v816_v54 = vld [vmem:[%s5625_s4 + $0xa0] sm:$0xff] }
  0x29   : > { %650 = vperm.xlu1 %3927, %v574_v9   ;;  %645 = vperm.xlu0 %3926, %v573_v10   ;;  %v819_v55 = vld [vmem:[%s5625_s4 + $0xb8] sm:$0xff]  ;;  %v818_v56 = vld [vmem:[%s5625_s4 + $0xb0] sm:$0xff]  ;;  %v821_v57 = vld [vmem:[%s5625_s4 + $0xc8] sm:$0xff] }
  0x2a   : > { %v820_v58 = vld [vmem:[%s5625_s4 + $0xc0] sm:$0xff]  ;;  %v823_v59 = vld [vmem:[%s5625_s4 + $0xd8] sm:$0xff]  ;;  %v822_v60 = vld [vmem:[%s5625_s4 + $0xd0] sm:$0xff] }
  0x2b   : > { %v825_v61 = vld [vmem:[%s5625_s4 + $0xe8] sm:$0xff]  ;;  %v824_v62 = vld [vmem:[%s5625_s4 + $0xe0] sm:$0xff]  ;;  %v827_v63 = vld [vmem:[%s5625_s4 + $0xf8] sm:$0xff] }
  0x2c   : > { %v826_v0 = vld [vmem:[%s5625_s4 + $0xf0] sm:$0xff]  ;;  %v1123_v1 = vld [vmem:[%s5626_s5 + $0x8] sm:$0xff]  ;;  %v1122_v2 = vld [vmem:[%s5626_s5] sm:$0xff] }
  0x2d   : > { %660 = vperm.xlu1 %3927, %v576_v11   ;;  %655 = vperm.xlu0 %3926, %v575_v12   ;;  %v1125_v5 = vld [vmem:[%s5626_s5 + $0x18] sm:$0xff]  ;;  %v1124_v6 = vld [vmem:[%s5626_s5 + $0x10] sm:$0xff]  ;;  %v1127_v9 = vld [vmem:[%s5626_s5 + $0x28] sm:$0xff] }
  0x2e   : > { %v1126_v10 = vld [vmem:[%s5626_s5 + $0x20] sm:$0xff] }
  0x31   : > { %670 = vperm.xlu1 %3927, %v578_v13   ;;  %665 = vperm.xlu0 %3926, %v577_v14   ;;  %v1129_v13 = vld [vmem:[%s5626_s5 + $0x38] sm:$0xff]  ;;  %v1128_v14 = vld [vmem:[%s5626_s5 + $0x30] sm:$0xff] }
  0x35   : > { %680 = vperm.xlu1 %3927, %v580_v15   ;;  %675 = vperm.xlu0 %3926, %v579_v16  }
  0x39   : > { %690 = vperm.xlu1 %3927, %v582_v17   ;;  %685 = vperm.xlu0 %3926, %v581_v18   ;;  %v1131_v17 = vld [vmem:[%s5626_s5 + $0x48] sm:$0xff]  ;;  %v1130_v18 = vld [vmem:[%s5626_s5 + $0x40] sm:$0xff] }
  0x3d   : > { %700 = vperm.xlu1 %3927, %v584_v19   ;;  %695 = vperm.xlu0 %3926, %v583_v20  }
  0x41   : > { %710 = vperm.xlu1 %3927, %v586_v21   ;;  %705 = vperm.xlu0 %3926, %v585_v22   ;;  %v1133_v21 = vld [vmem:[%s5626_s5 + $0x58] sm:$0xff]  ;;  %v1132_v22 = vld [vmem:[%s5626_s5 + $0x50] sm:$0xff] }
  0x45   : > { %720 = vperm.xlu1 %3927, %v588_v23   ;;  %715 = vperm.xlu0 %3926, %v587_v24  }
  0x49   : > { %730 = vperm.xlu1 %3927, %v590_v25   ;;  %725 = vperm.xlu0 %3926, %v589_v26   ;;  %v1135_v25 = vld [vmem:[%s5626_s5 + $0x68] sm:$0xff]  ;;  %v1134_v26 = vld [vmem:[%s5626_s5 + $0x60] sm:$0xff] }
  0x4d   : > { %740 = vperm.xlu1 %3927, %v592_v27   ;;  %735 = vperm.xlu0 %3926, %v591_v28  }
  0x51   : > { %750 = vperm.xlu1 %3927, %v594_v29   ;;  %745 = vperm.xlu0 %3926, %v593_v30   ;;  %v1137_v29 = vld [vmem:[%s5626_s5 + $0x78] sm:$0xff]  ;;  %v1136_v30 = vld [vmem:[%s5626_s5 + $0x70] sm:$0xff] }
  0x55   : > { %760 = vperm.xlu1 %3927, %v596_v31   ;;  %755 = vperm.xlu0 %3926, %v595_v32  }
  0x59   : > { %841 = vperm.xlu1 %3927, %v797_v33   ;;  %836 = vperm.xlu0 %3926, %v796_v34   ;;  %v1139_v33 = vld [vmem:[%s5626_s5 + $0x88] sm:$0xff]  ;;  %v1138_v34 = vld [vmem:[%s5626_s5 + $0x80] sm:$0xff] }
  0x5d   : > { %851 = vperm.xlu1 %3927, %v799_v35   ;;  %846 = vperm.xlu0 %3926, %v798_v36  }
  0x61   : > { %861 = vperm.xlu1 %3927, %v801_v37   ;;  %856 = vperm.xlu0 %3926, %v800_v38   ;;  %v1141_v37 = vld [vmem:[%s5626_s5 + $0x98] sm:$0xff]  ;;  %v1140_v38 = vld [vmem:[%s5626_s5 + $0x90] sm:$0xff] }
  0x65   : > { %871 = vperm.xlu1 %3927, %v803_v39   ;;  %866 = vperm.xlu0 %3926, %v802_v40  }
  0x69   : > { %881 = vperm.xlu1 %3927, %v805_v41   ;;  %876 = vperm.xlu0 %3926, %v804_v42   ;;  %v1143_v41 = vld [vmem:[%s5626_s5 + $0xa8] sm:$0xff]  ;;  %v1142_v42 = vld [vmem:[%s5626_s5 + $0xa0] sm:$0xff] }
  0x6d   : > { %891 = vperm.xlu1 %3927, %v807_v43   ;;  %886 = vperm.xlu0 %3926, %v806_v44  }
  0x71   : > { %901 = vperm.xlu1 %3927, %v809_v45   ;;  %896 = vperm.xlu0 %3926, %v808_v46   ;;  %v1145_v45 = vld [vmem:[%s5626_s5 + $0xb8] sm:$0xff]  ;;  %v1144_v46 = vld [vmem:[%s5626_s5 + $0xb0] sm:$0xff] }
  0x75   : > { %911 = vperm.xlu1 %3927, %v811_v47   ;;  %906 = vperm.xlu0 %3926, %v810_v48  }
  0x79   : > { %921 = vperm.xlu1 %3927, %v813_v49   ;;  %916 = vperm.xlu0 %3926, %v812_v50   ;;  %v1147_v49 = vld [vmem:[%s5626_s5 + $0xc8] sm:$0xff]  ;;  %v1146_v50 = vld [vmem:[%s5626_s5 + $0xc0] sm:$0xff] }
  0x7d   : > { %931 = vperm.xlu1 %3927, %v815_v51   ;;  %926 = vperm.xlu0 %3926, %v814_v52  }
  0x81   : > { %941 = vperm.xlu1 %3927, %v817_v53   ;;  %936 = vperm.xlu0 %3926, %v816_v54   ;;  %v1149_v53 = vld [vmem:[%s5626_s5 + $0xd8] sm:$0xff]  ;;  %v1148_v54 = vld [vmem:[%s5626_s5 + $0xd0] sm:$0xff] }
  0x85   : > { %951 = vperm.xlu1 %3927, %v819_v55   ;;  %946 = vperm.xlu0 %3926, %v818_v56  }
  0x89   : > { %961 = vperm.xlu1 %3927, %v821_v57   ;;  %956 = vperm.xlu0 %3926, %v820_v58   ;;  %v1151_v57 = vld [vmem:[%s5626_s5 + $0xe8] sm:$0xff]  ;;  %v1150_v58 = vld [vmem:[%s5626_s5 + $0xe0] sm:$0xff] }
  0x8d   : > { %971 = vperm.xlu1 %3927, %v823_v59   ;;  %966 = vperm.xlu0 %3926, %v822_v60  }
  0x91   : > { %981 = vperm.xlu1 %3927, %v825_v61   ;;  %976 = vperm.xlu0 %3926, %v824_v62   ;;  %v1153_v61 = vld [vmem:[%s5626_s5 + $0xf8] sm:$0xff]  ;;  %v1152_v62 = vld [vmem:[%s5626_s5 + $0xf0] sm:$0xff] }
  0x95   : > { %991 = vperm.xlu1 %3927, %v827_v63   ;;  %986 = vperm.xlu0 %3926, %v826_v0  }
  0x98   : > { %v4506_v3 = vpop.permute.xlu1 %615  ;;  %v4508_v4 = vpop.permute.xlu0 %605 }
  0x99   : > { %1161 = vperm.xlu1 %3927, %v1123_v1   ;;  %1156 = vperm.xlu0 %3926, %v1122_v2  }
  0x9c   : > { %v4516_v7 = vpop.permute.xlu1 %620  ;;  %v4518_v8 = vpop.permute.xlu0 %610 }
  0x9d   : > { %1171 = vperm.xlu1 %3927, %v1125_v5   ;;  %1166 = vperm.xlu0 %3926, %v1124_v6  }
  0xa0   : > { %v4526_v11 = vpop.permute.xlu1 %630  ;;  %v4528_v12 = vpop.permute.xlu0 %625 }
  0xa1   : > { %1181 = vperm.xlu1 %3927, %v1127_v9   ;;  %1176 = vperm.xlu0 %3926, %v1126_v10  }
  0xa4   : > { %v4536_v15 = vpop.permute.xlu1 %640  ;;  %v4538_v16 = vpop.permute.xlu0 %635 }
  0xa5   : > { %1191 = vperm.xlu1 %3927, %v1129_v13   ;;  %1186 = vperm.xlu0 %3926, %v1128_v14  }
  0xa8   : > { %v4546_v19 = vpop.permute.xlu1 %650  ;;  %v4548_v20 = vpop.permute.xlu0 %645 }
  0xa9   : > { %1201 = vperm.xlu1 %3927, %v1131_v17   ;;  %1196 = vperm.xlu0 %3926, %v1130_v18  }
  0xac   : > { %v4556_v23 = vpop.permute.xlu1 %660  ;;  %v4558_v24 = vpop.permute.xlu0 %655 }
  0xad   : > { %1211 = vperm.xlu1 %3927, %v1133_v21   ;;  %1206 = vperm.xlu0 %3926, %v1132_v22  }
  0xb0   : > { %v4566_v27 = vpop.permute.xlu1 %670  ;;  %v4568_v28 = vpop.permute.xlu0 %665 }
  0xb1   : > { %1221 = vperm.xlu1 %3927, %v1135_v25   ;;  %1216 = vperm.xlu0 %3926, %v1134_v26  }
  0xb4   : > { %v4576_v31 = vpop.permute.xlu1 %680  ;;  %v4578_v32 = vpop.permute.xlu0 %675 }
  0xb5   : > { %1231 = vperm.xlu1 %3927, %v1137_v29   ;;  %1226 = vperm.xlu0 %3926, %v1136_v30  }
  0xb8   : > { %v4586_v35 = vpop.permute.xlu1 %690  ;;  %v4588_v36 = vpop.permute.xlu0 %685 }
  0xb9   : > { %1241 = vperm.xlu1 %3927, %v1139_v33   ;;  %1236 = vperm.xlu0 %3926, %v1138_v34  }
  0xbc   : > { %v4596_v39 = vpop.permute.xlu1 %700  ;;  %v4598_v40 = vpop.permute.xlu0 %695 }
  0xbd   : > { %1251 = vperm.xlu1 %3927, %v1141_v37   ;;  %1246 = vperm.xlu0 %3926, %v1140_v38  }
  0xc0   : > { %v4606_v43 = vpop.permute.xlu1 %710  ;;  %v4608_v44 = vpop.permute.xlu0 %705 }
  0xc1   : > { %1261 = vperm.xlu1 %3927, %v1143_v41   ;;  %1256 = vperm.xlu0 %3926, %v1142_v42  }
  0xc4   : > { %v4616_v47 = vpop.permute.xlu1 %720  ;;  %v4618_v48 = vpop.permute.xlu0 %715 }
  0xc5   : > { %5637 = vst [vmem:[#allocation5_spill] sm:$0xff] %v4618_v48  ;;  %1271 = vperm.xlu1 %3927, %v1145_v45   ;;  %1266 = vperm.xlu0 %3926, %v1144_v46  }
  0xc8   : > { %v4626_v51 = vpop.permute.xlu1 %730  ;;  %v4628_v52 = vpop.permute.xlu0 %725 }
  0xc9   : > { %5638 = vst [vmem:[#allocation6_spill] sm:$0xff] %v4626_v51  ;;  %5639 = vst [vmem:[#allocation7_spill] sm:$0xff] %v4628_v52  ;;  %1281 = vperm.xlu1 %3927, %v1147_v49   ;;  %1276 = vperm.xlu0 %3926, %v1146_v50  }
  0xcc   : > { %v4636_v55 = vpop.permute.xlu1 %740  ;;  %v4638_v56 = vpop.permute.xlu0 %735 }
  0xcd   : > { %5640 = vst [vmem:[#allocation8_spill] sm:$0xff] %v4636_v55  ;;  %5641 = vst [vmem:[#allocation9_spill] sm:$0xff] %v4638_v56  ;;  %1291 = vperm.xlu1 %3927, %v1149_v53   ;;  %1286 = vperm.xlu0 %3926, %v1148_v54   ;;  %v4699_v53 = vld [vmem:[%s5628_s7] ss:$0 sm:$0xff] }
  0xd0   : > { %v4646_v59 = vpop.permute.xlu1 %750  ;;  %v4648_v60 = vpop.permute.xlu0 %745 }
  0xd1   : > { %5642 = vst [vmem:[#allocation10_spill] sm:$0xff] %v4646_v59  ;;  %5643 = vst [vmem:[#allocation11_spill] sm:$0xff] %v4648_v60  ;;  %1301 = vperm.xlu1 %3927, %v1151_v57   ;;  %1296 = vperm.xlu0 %3926, %v1150_v58   ;;  %v4708_v58 = vld [vmem:[%s5627_s6] ss:$0 sm:$0xff] }
  0xd2   : > { %v763_v60 = vsub.f32 %v4708_v58, %v4508_v4  ;;  %v764_v59 = vsub.f32 %v4708_v58, %v4518_v8 }
  0xd4   : > { %v4656_v63 = vpop.permute.xlu1 %760  ;;  %v4658_v0 = vpop.permute.xlu0 %755  ;;  %v1026_v4 = vmul.f32 %v763_v60, %v763_v60  ;;  %v1027_v52 = vmul.f32 %v764_v59, %v764_v59 }
  0xd5   : > { %5644 = vst [vmem:[#allocation12_spill] sm:$0xff] %v4656_v63  ;;  %5645 = vst [vmem:[#allocation13_spill] sm:$0xff] %v4658_v0  ;;  %1311 = vperm.xlu1 %3927, %v1153_v61   ;;  %1306 = vperm.xlu0 %3926, %v1152_v62  }
  0xd8   : > { %v842_v1 = vpop.permute.xlu1 %841  ;;  %v837_v2 = vpop.permute.xlu0 %836 }
  0xd9   : > { %v995_v61 = vsub.f32 %v4699_v53, %v842_v1  ;;  %v994_v62 = vsub.f32 %v4699_v53, %v837_v2  ;;  %v765_v1 = vsub.f32 %v4708_v58, %v4506_v3  ;;  %v766_v2 = vsub.f32 %v4708_v58, %v4516_v7 }
  0xda   : > { %v768_v7 = vsub.f32 %v4708_v58, %v4526_v11 }
  0xdb   : > { %v1029_v3 = vmul.f32 %v766_v2, %v766_v2 }
  0xdc   : > { %v852_v5 = vpop.permute.xlu1 %851  ;;  %v847_v6 = vpop.permute.xlu0 %846  ;;  %v1031_v11 = vmul.f32 %v768_v7, %v768_v7 }
  0xdd   : > { %v997_v56 = vsub.f32 %v4699_v53, %v852_v5  ;;  %v996_v55 = vsub.f32 %v4699_v53, %v847_v6 }
  0xdf   : > { %v1061_v51 = vmul.f32 %v997_v56, %v997_v56  ;;  %v1060_v8 = vmul.f32 %v996_v55, %v996_v55 }
  0xe0   : > { %v862_v9 = vpop.permute.xlu1 %861  ;;  %v857_v10 = vpop.permute.xlu0 %856 }
  0xe1   : > { %v999_v5 = vsub.f32 %v4699_v53, %v862_v9  ;;  %v998_v6 = vsub.f32 %v4699_v53, %v857_v10  ;;  %v1093_v55 = vadd.f32 %v1061_v51, %v1029_v3  ;;  %v769_v51 = vsub.f32 %v4708_v58, %v4538_v16 }
  0xe2   : > { %v771_v16 = vsub.f32 %v4708_v58, %v4548_v20 }
  0xe3   : > { %v1063_v48 = vmul.f32 %v999_v5, %v999_v5  ;;  %v1062_v9 = vmul.f32 %v998_v6, %v998_v6  ;;  %v1032_v6 = vmul.f32 %v769_v51, %v769_v51 }
  0xe4   : > { %v872_v13 = vpop.permute.xlu1 %871  ;;  %v867_v14 = vpop.permute.xlu0 %866 }
  0xe5   : > { %v1001_v10 = vsub.f32 %v4699_v53, %v872_v13 }
  0xe7   : > { %v1065_v2 = vmul.f32 %v1001_v10, %v1001_v10 }
  0xe8   : > { %v4660_v17 = vpop.permute.xlu1 %881  ;;  %v4662_v18 = vpop.permute.xlu0 %876 }
  0xe9   : > { %v1003_v13 = vsub.f32 %v4699_v53, %v4660_v17 }
  0xec   : > { %v4664_v21 = vpop.permute.xlu1 %891  ;;  %v4666_v22 = vpop.permute.xlu0 %886 }
  0xed   : > { %v1005_v7 = vsub.f32 %v4699_v53, %v4664_v21 }
  0xf0   : > { %v4668_v25 = vpop.permute.xlu1 %901  ;;  %v4670_v26 = vpop.permute.xlu0 %896 }
  0xf4   : > { %v4672_v29 = vpop.permute.xlu1 %911  ;;  %v4674_v30 = vpop.permute.xlu0 %906 }
  0xf8   : > { %v4676_v33 = vpop.permute.xlu1 %921  ;;  %v4678_v34 = vpop.permute.xlu0 %916 }
  0xfc   : > { %v4680_v37 = vpop.permute.xlu1 %931  ;;  %v4682_v38 = vpop.permute.xlu0 %926 }
 0x100   : > { %v4684_v41 = vpop.permute.xlu1 %941  ;;  %v4686_v42 = vpop.permute.xlu0 %936 }
 0x104   : > { %v4688_v45 = vpop.permute.xlu1 %951  ;;  %v4690_v46 = vpop.permute.xlu0 %946 }
 0x108   : > { %v4692_v49 = vpop.permute.xlu1 %961  ;;  %v4694_v50 = vpop.permute.xlu0 %956 }
 0x109   : > { %5646 = vst [vmem:[#allocation14_spill] sm:$0xff] %v4692_v49  ;;  %5647 = vst [vmem:[#allocation15_spill] sm:$0xff] %v4694_v50  ;;  %v1028_v50 = vmul.f32 %v765_v1, %v765_v1 }
 0x10b   : > { %v1092_v49 = vadd.f32 %v1060_v8, %v1028_v50 }
 0x10c   : > { %v4701_v54 = vpop.permute.xlu1 %971  ;;  %v4703_v57 = vpop.permute.xlu0 %966 }
 0x10d   : > { %5648 = vst [vmem:[#allocation16_spill] sm:$0xff] %v4701_v54  ;;  %5649 = vst [vmem:[#allocation17_spill] sm:$0xff] %v4703_v57  ;;  %v1059_v57 = vmul.f32 %v995_v61, %v995_v61  ;;  %v1058_v54 = vmul.f32 %v994_v62, %v994_v62 }
 0x10f   : > { %v1091_v61 = vadd.f32 %v1059_v57, %v1027_v52  ;;  %v1090_v62 = vadd.f32 %v1058_v54, %v1026_v4  ;;  %v1000_v52 = vsub.f32 %v4699_v53, %v867_v14  ;;  %v1002_v14 = vsub.f32 %v4699_v53, %v4662_v18 }
 0x110   : > { %v4712_v0 = vpop.permute.xlu1 %981  ;;  %v4714_v63 = vpop.permute.xlu0 %976 }
 0x111   : > { %5650 = vst [vmem:[#allocation18_spill] sm:$0xff] %v4712_v0  ;;  %5651 = vst [vmem:[#allocation19_spill] sm:$0xff] %v4714_v63  ;;  %v1064_v4 = vmul.f32 %v1000_v52, %v1000_v52  ;;  %v1066_v3 = vmul.f32 %v1002_v14, %v1002_v14 }
 0x113   : > { %v1096_v20 = vadd.f32 %v1064_v4, %v1032_v6 }
 0x114   : > { %v4726_v0 = vpop.permute.xlu1 %991  ;;  %v4728_v63 = vpop.permute.xlu0 %986 }
 0x115   : > { %5652 = vst [vmem:[#allocation20_spill] sm:$0xff] %v4726_v0  ;;  %5653 = vst [vmem:[#allocation21_spill] sm:$0xff] %v4728_v63  ;;  %v767_v0 = vsub.f32 %v4708_v58, %v4528_v12 }
 0x117   : > { %v1030_v54 = vmul.f32 %v767_v0, %v767_v0  ;;  %v1095_v0 = vadd.f32 %v1063_v48, %v1031_v11  ;;  %v1004_v48 = vsub.f32 %v4699_v53, %v4666_v22 }
 0x118   : > { %v1162_v63 = vpop.permute.xlu1 %1161  ;;  %v1157_v60 = vpop.permute.xlu0 %1156 }
 0x119   : > { %v1315_v59 = vmul.f32 %v1162_v63, %v1091_v61  ;;  %v1314_v56 = vmul.f32 %v1157_v60, %v1090_v62  ;;  %v770_v63 = vsub.f32 %v4708_v58, %v4536_v15  ;;  %v1094_v8 = vadd.f32 %v1062_v9, %v1030_v54 }
 0x11a   : > { %v772_v15 = vsub.f32 %v4708_v58, %v4546_v19  ;;  %v1067_v62 = vmul.f32 %v1003_v13, %v1003_v13  ;;  %v1069_v54 = vmul.f32 %v1005_v7, %v1005_v7  ;;  %v775_v13 = vsub.f32 %v4708_v58, %v4568_v28 }
 0x11b   : > { %1348 = vst.msk [vmem:[#allocation2 + $0x8] sm:$0xff] %vm1346_vm0, %v1315_v59  ;;  %1347 = vst.msk [vmem:[#allocation2] sm:$0xff] %vm1346_vm0, %v1314_v56  ;;  %v1033_v17 = vmul.f32 %v770_v63, %v770_v63  ;;  %v1034_v59 = vmul.f32 %v771_v16, %v771_v16  ;;  %v774_v56 = vsub.f32 %v4708_v58, %v4556_v23 }
 0x11c   : > { %v1172_v57 = vpop.permute.xlu1 %1171  ;;  %v1167_v12 = vpop.permute.xlu0 %1166  ;;  %v1035_v60 = vmul.f32 %v772_v15, %v772_v15  ;;  %v1006_v63 = vsub.f32 %v4699_v53, %v4670_v26  ;;  %v1008_v26 = vsub.f32 %v4699_v53, %v4674_v30  ;;  %v777_v28 = vsub.f32 %v4708_v58, %v4578_v32 }
 0x11d   : > { %v1317_v50 = vmul.f32 %v1172_v57, %v1093_v55  ;;  %v1316_v1 = vmul.f32 %v1167_v12, %v1092_v49  ;;  %v1097_v19 = vadd.f32 %v1065_v2, %v1033_v17  ;;  %v773_v55 = vsub.f32 %v4708_v58, %v4558_v24 }
 0x11e   : > { %v1099_v11 = vadd.f32 %v1067_v62, %v1035_v60  ;;  %v1098_v22 = vadd.f32 %v1066_v3, %v1034_v59  ;;  %v1068_v57 = vmul.f32 %v1004_v48, %v1004_v48  ;;  %v1007_v12 = vsub.f32 %v4699_v53, %v4668_v25 }
 0x11f   : > { %1350 = vst.msk [vmem:[#allocation2 + $0x18] sm:$0xff] %vm1346_vm0, %v1317_v50  ;;  %1349 = vst.msk [vmem:[#allocation2 + $0x10] sm:$0xff] %vm1346_vm0, %v1316_v1  ;;  %v1037_v23 = vmul.f32 %v774_v56, %v774_v56  ;;  %v1036_v24 = vmul.f32 %v773_v55, %v773_v55  ;;  %v776_v1 = vsub.f32 %v4708_v58, %v4566_v27 }
 0x120   : > { %v1182_v49 = vpop.permute.xlu1 %1181  ;;  %v1177_v5 = vpop.permute.xlu0 %1176  ;;  %v1009_v25 = vsub.f32 %v4699_v53, %v4672_v29  ;;  %v1071_v4 = vmul.f32 %v1007_v12, %v1007_v12  ;;  %v778_v27 = vsub.f32 %v4708_v58, %v4576_v31  ;;  %v1010_v62 = vsub.f32 %v4699_v53, %v4678_v34 }
 0x121   : > { %v1319_v61 = vmul.f32 %v1182_v49, %v1095_v0  ;;  %v1318_v18 = vmul.f32 %v1177_v5, %v1094_v8  ;;  %v1070_v0 = vmul.f32 %v1006_v63, %v1006_v63  ;;  %v1101_v8 = vadd.f32 %v1069_v54, %v1037_v23 }
 0x122   : > { %v1100_v15 = vadd.f32 %v1068_v57, %v1036_v24  ;;  %v1039_v29 = vmul.f32 %v776_v1, %v776_v1  ;;  %v1038_v5 = vmul.f32 %v775_v13, %v775_v13  ;;  %v1073_v6 = vmul.f32 %v1009_v25, %v1009_v25 }
 0x123   : > { %1352 = vst.msk [vmem:[#allocation2 + $0x28] sm:$0xff] %vm1346_vm0, %v1319_v61  ;;  %1351 = vst.msk [vmem:[#allocation2 + $0x20] sm:$0xff] %vm1346_vm0, %v1318_v18  ;;  %v1072_v61 = vmul.f32 %v1008_v26, %v1008_v26  ;;  %v1011_v18 = vsub.f32 %v4699_v53, %v4676_v33  ;;  %v1041_v3 = vmul.f32 %v778_v27, %v778_v27  ;;  %v5654_v27 = vld [vmem:[#allocation5_spill] sm:$0xff] }
 0x124   : > { %v1192_v9 = vpop.permute.xlu1 %1191  ;;  %v1187_v10 = vpop.permute.xlu0 %1186  ;;  %v1103_v31 = vadd.f32 %v1071_v4, %v1039_v29  ;;  %v1102_v32 = vadd.f32 %v1070_v0, %v1038_v5  ;;  %v1040_v7 = vmul.f32 %v777_v28, %v777_v28  ;;  %v780_v48 = vsub.f32 %v4708_v58, %v4586_v35 }
 0x125   : > { %v1321_v21 = vmul.f32 %v1192_v9, %v1097_v19  ;;  %v1320_v52 = vmul.f32 %v1187_v10, %v1096_v20  ;;  %v779_v19 = vsub.f32 %v4708_v58, %v4588_v36  ;;  %v1105_v56 = vadd.f32 %v1073_v6, %v1041_v3  ;;  %v5655_v6 = vld [vmem:[#allocation14_spill] sm:$0xff] }
 0x126   : > { %v1104_v34 = vadd.f32 %v1072_v61, %v1040_v7  ;;  %v1075_v55 = vmul.f32 %v1011_v18, %v1011_v18  ;;  %v1074_v9 = vmul.f32 %v1010_v62, %v1010_v62  ;;  %v1013_v10 = vsub.f32 %v4699_v53, %v4680_v37  ;;  %v5656_v18 = vld [vmem:[#allocation15_spill] sm:$0xff]  ;;  %v5657_v7 = vld [vmem:[#allocation6_spill] sm:$0xff] }
 0x127   : > { %1354 = vst.msk [vmem:[#allocation2 + $0x38] sm:$0xff] %vm1346_vm0, %v1321_v21  ;;  %1353 = vst.msk [vmem:[#allocation2 + $0x30] sm:$0xff] %vm1346_vm0, %v1320_v52  ;;  %v1012_v21 = vsub.f32 %v4699_v53, %v4682_v38  ;;  %v1043_v35 = vmul.f32 %v780_v48, %v780_v48  ;;  %v1042_v36 = vmul.f32 %v779_v19, %v779_v19  ;;  %v5658_v19 = vld [vmem:[#allocation7_spill] sm:$0xff] }
 0x128   : > { %v1202_v51 = vpop.permute.xlu1 %1201  ;;  %v1197_v50 = vpop.permute.xlu0 %1196  ;;  %v781_v54 = vsub.f32 %v4708_v58, %v4598_v40  ;;  %v1015_v37 = vsub.f32 %v4699_v53, %v4684_v41  ;;  %v1014_v38 = vsub.f32 %v4699_v53, %v4686_v42  ;;  %v1077_v63 = vmul.f32 %v1013_v10, %v1013_v10 }
 0x129   : > { %v1323_v14 = vmul.f32 %v1202_v51, %v1099_v11  ;;  %v1322_v2 = vmul.f32 %v1197_v50, %v1098_v22  ;;  %v782_v22 = vsub.f32 %v4708_v58, %v4596_v39  ;;  %v1076_v23 = vmul.f32 %v1012_v21, %v1012_v21 }
 0x12a   : > { %v1107_v24 = vadd.f32 %v1075_v55, %v1043_v35  ;;  %v1106_v51 = vadd.f32 %v1074_v9, %v1042_v36  ;;  %v784_v39 = vsub.f32 %v4708_v58, %v4606_v43  ;;  %v783_v40 = vsub.f32 %v4708_v58, %v4608_v44  ;;  %v5661_v36 = vld [vmem:[#allocation8_spill] sm:$0xff] }
 0x12b   : > { %1356 = vst.msk [vmem:[#allocation2 + $0x48] sm:$0xff] %vm1346_vm0, %v1323_v14  ;;  %1355 = vst.msk [vmem:[#allocation2 + $0x40] sm:$0xff] %vm1346_vm0, %v1322_v2  ;;  %v1045_v41 = vmul.f32 %v782_v22, %v782_v22  ;;  %v1044_v13 = vmul.f32 %v781_v54, %v781_v54  ;;  %v1079_v2 = vmul.f32 %v1015_v37, %v1015_v37 }
 0x12c   : > { %v1212_v16 = vpop.permute.xlu1 %1211  ;;  %v1207_v49 = vpop.permute.xlu0 %1206  ;;  %v1078_v25 = vmul.f32 %v1014_v38, %v1014_v38  ;;  %v1017_v26 = vsub.f32 %v4699_v53, %v4688_v45  ;;  %v1016_v4 = vsub.f32 %v4699_v53, %v4690_v46  ;;  %v1047_v0 = vmul.f32 %v784_v39, %v784_v39 }
 0x12d   : > { %v1325_v17 = vmul.f32 %v1212_v16, %v1101_v8  ;;  %v1324_v30 = vmul.f32 %v1207_v49, %v1100_v15  ;;  %v1109_v43 = vadd.f32 %v1077_v63, %v1045_v41  ;;  %v1108_v44 = vadd.f32 %v1076_v23, %v1044_v13 }
 0x12e   : > { %v1046_v8 = vmul.f32 %v783_v40, %v783_v40  ;;  %v786_v15 = vsub.f32 %v4708_v58, %v4616_v47  ;;  %v785_v28 = vsub.f32 %v4708_v58, %v5654_v27  ;;  %v1111_v5 = vadd.f32 %v1079_v2, %v1047_v0  ;;  %v5664_v40 = vld [vmem:[#allocation19_spill] sm:$0xff] }
 0x12f   : > { %1358 = vst.msk [vmem:[#allocation2 + $0x58] sm:$0xff] %vm1346_vm0, %v1325_v17  ;;  %1357 = vst.msk [vmem:[#allocation2 + $0x50] sm:$0xff] %vm1346_vm0, %v1324_v30  ;;  %v1081_v17 = vmul.f32 %v1017_v26, %v1017_v26  ;;  %v1080_v30 = vmul.f32 %v1016_v4, %v1016_v4  ;;  %v1019_v61 = vsub.f32 %v4699_v53, %v5655_v6  ;;  %v5669_v6 = vld [vmem:[#allocation12_spill] sm:$0xff] }
 0x130   : > { %v1222_v20 = vpop.permute.xlu1 %1221  ;;  %v1217_v60 = vpop.permute.xlu0 %1216  ;;  %v1110_v46 = vadd.f32 %v1078_v25, %v1046_v8  ;;  %v1018_v62 = vsub.f32 %v4699_v53, %v5656_v18  ;;  %v1049_v47 = vmul.f32 %v786_v15, %v786_v15  ;;  %v788_v48 = vsub.f32 %v4708_v58, %v5657_v7  ;;  %v5666_v25 = vld [vmem:[#allocation11_spill] sm:$0xff]  ;;  %v5670_v18 = vld [vmem:[#allocation13_spill] sm:$0xff] }
 0x131   : > { %v1327_v33 = vmul.f32 %v1222_v20, %v1103_v31  ;;  %v1326_v59 = vmul.f32 %v1217_v60, %v1102_v32  ;;  %v1048_v31 = vmul.f32 %v785_v28, %v785_v28  ;;  %v787_v20 = vsub.f32 %v4708_v58, %v5658_v19 }
 0x132   : > { %v1083_v9 = vmul.f32 %v1019_v61, %v1019_v61  ;;  %v1082_v10 = vmul.f32 %v1018_v62, %v1018_v62  ;;  %v1113_v21 = vadd.f32 %v1081_v17, %v1049_v47  ;;  %v791_v26 = vsub.f32 %v4708_v58, %v5666_v25 }
 0x133   : > { %1360 = vst.msk [vmem:[#allocation2 + $0x68] sm:$0xff] %vm1346_vm0, %v1327_v33  ;;  %1359 = vst.msk [vmem:[#allocation2 + $0x60] sm:$0xff] %vm1346_vm0, %v1326_v59  ;;  %v5659_v59 = vld [vmem:[#allocation16_spill] sm:$0xff]  ;;  %v1112_v35 = vadd.f32 %v1080_v30, %v1048_v31  ;;  %v1050_v37 = vmul.f32 %v787_v20, %v787_v20  ;;  %v794_v61 = vsub.f32 %v4708_v58, %v5669_v6 }
 0x134   : > { %v1232_v52 = vpop.permute.xlu1 %1231  ;;  %v1227_v11 = vpop.permute.xlu0 %1226  ;;  %v793_v62 = vsub.f32 %v4708_v58, %v5670_v18 }
 0x135   : > { %v1329_v57 = vmul.f32 %v1232_v52, %v1105_v56  ;;  %v1328_v12 = vmul.f32 %v1227_v11, %v1104_v34  ;;  %v1021_v56 = vsub.f32 %v4699_v53, %v5659_v59  ;;  %v5660_v34 = vld [vmem:[#allocation17_spill] sm:$0xff]  ;;  %v790_v52 = vsub.f32 %v4708_v58, %v5661_v36 }
 0x136   : > { %v1020_v55 = vsub.f32 %v4699_v53, %v5660_v34  ;;  %v5662_v11 = vld [vmem:[#allocation9_spill] sm:$0xff]  ;;  %v1114_v41 = vadd.f32 %v1082_v10, %v1050_v37  ;;  %v1057_v20 = vmul.f32 %v794_v61, %v794_v61 }
 0x137   : > { %1362 = vst.msk [vmem:[#allocation2 + $0x78] sm:$0xff] %vm1346_vm0, %v1329_v57  ;;  %1361 = vst.msk [vmem:[#allocation2 + $0x70] sm:$0xff] %vm1346_vm0, %v1328_v12  ;;  %v789_v22 = vsub.f32 %v4708_v58, %v5662_v11  ;;  %v1051_v12 = vmul.f32 %v788_v48, %v788_v48  ;;  %v1085_v23 = vmul.f32 %v1021_v56, %v1021_v56 }
 0x138   : > { %v1242_v50 = vpop.permute.xlu1 %1241  ;;  %v1237_v1 = vpop.permute.xlu0 %1236  ;;  %v1053_v13 = vmul.f32 %v790_v52, %v790_v52 }
 0x139   : > { %v1331_v14 = vmul.f32 %v1242_v50, %v1107_v24  ;;  %v1330_v42 = vmul.f32 %v1237_v1, %v1106_v51  ;;  %v1084_v24 = vmul.f32 %v1020_v55, %v1020_v55  ;;  %v5663_v51 = vld [vmem:[#allocation18_spill] sm:$0xff]  ;;  %v1022_v50 = vsub.f32 %v4699_v53, %v5664_v40 }
 0x13a   : > { %v1023_v39 = vsub.f32 %v4699_v53, %v5663_v51  ;;  %v1115_v1 = vadd.f32 %v1083_v9, %v1051_v12  ;;  %v1117_v8 = vadd.f32 %v1085_v23, %v1053_v13 }
 0x13b   : > { %1364 = vst.msk [vmem:[#allocation2 + $0x88] sm:$0xff] %vm1346_vm0, %v1331_v14  ;;  %1363 = vst.msk [vmem:[#allocation2 + $0x80] sm:$0xff] %vm1346_vm0, %v1330_v42  ;;  %v1052_v14 = vmul.f32 %v789_v22, %v789_v22  ;;  %v5665_v42 = vld [vmem:[#allocation10_spill] sm:$0xff]  ;;  %v1086_v28 = vmul.f32 %v1022_v50, %v1022_v50 }
 0x13c   : > { %v1252_v16 = vpop.permute.xlu1 %1251  ;;  %v1247_v49 = vpop.permute.xlu0 %1246  ;;  %v792_v2 = vsub.f32 %v4708_v58, %v5665_v42  ;;  %v1087_v27 = vmul.f32 %v1023_v39, %v1023_v39 }
 0x13d   : > { %v1333_v45 = vmul.f32 %v1252_v16, %v1109_v43  ;;  %v1332_v29 = vmul.f32 %v1247_v49, %v1108_v44  ;;  %v1116_v15 = vadd.f32 %v1084_v24, %v1052_v14  ;;  %v5667_v16 = vld [vmem:[#allocation20_spill] sm:$0xff] }
 0x13e   : > { %v1025_v49 = vsub.f32 %v4699_v53, %v5667_v16 }
 0x13f   : > { %1366 = vst.msk [vmem:[#allocation2 + $0x98] sm:$0xff] %vm1346_vm0, %v1333_v45  ;;  %1365 = vst.msk [vmem:[#allocation2 + $0x90] sm:$0xff] %vm1346_vm0, %v1332_v29  ;;  %v5668_v45 = vld [vmem:[#allocation21_spill] sm:$0xff] }
 0x140   : > { %v1262_v32 = vpop.permute.xlu1 %1261  ;;  %v1257_v3 = vpop.permute.xlu0 %1256  ;;  %v1024_v29 = vsub.f32 %v4699_v53, %v5668_v45 }
 0x141   : > { %v1335_v60 = vmul.f32 %v1262_v32, %v1111_v5  ;;  %v1334_v33 = vmul.f32 %v1257_v3, %v1110_v46  ;;  %v1055_v5 = vmul.f32 %v792_v2, %v792_v2  ;;  %v1054_v46 = vmul.f32 %v791_v26, %v791_v26 }
 0x142   : > { %v1089_v32 = vmul.f32 %v1025_v49, %v1025_v49  ;;  %v1088_v3 = vmul.f32 %v1024_v29, %v1024_v29 }
 0x143   : > { %1368 = vst.msk [vmem:[#allocation2 + $0xa8] sm:$0xff] %vm1346_vm0, %v1335_v60  ;;  %1367 = vst.msk [vmem:[#allocation2 + $0xa0] sm:$0xff] %vm1346_vm0, %v1334_v33  ;;  %v1119_v53 = vadd.f32 %v1087_v27, %v1055_v5  ;;  %v1118_v7 = vadd.f32 %v1086_v28, %v1054_v46  ;;  %v1056_v60 = vmul.f32 %v793_v62, %v793_v62 }
 0x144   : > { %v1272_v54 = vpop.permute.xlu1 %1271  ;;  %v1267_v57 = vpop.permute.xlu0 %1266  ;;  %v1121_v58 = vadd.f32 %v1089_v32, %v1057_v20 }
 0x145   : > { %v1337_v38 = vmul.f32 %v1272_v54, %v1113_v21  ;;  %v1336_v63 = vmul.f32 %v1267_v57, %v1112_v35  ;;  %v1120_v56 = vadd.f32 %v1088_v3, %v1056_v60 }
 0x147   : > { %1370 = vst.msk [vmem:[#allocation2 + $0xb8] sm:$0xff] %vm1346_vm0, %v1337_v38  ;;  %1369 = vst.msk [vmem:[#allocation2 + $0xb0] sm:$0xff] %vm1346_vm0, %v1336_v63 }
 0x148   : > { %v1282_v4 = vpop.permute.xlu1 %1281  ;;  %v1277_v43 = vpop.permute.xlu0 %1276 }
 0x149   : > { %v1339_v44 = vmul.f32 %v1282_v4, %v1115_v1  ;;  %v1338_v0 = vmul.f32 %v1277_v43, %v1114_v41 }
 0x14b   : > { %1372 = vst.msk [vmem:[#allocation2 + $0xc8] sm:$0xff] %vm1346_vm0, %v1339_v44  ;;  %1371 = vst.msk [vmem:[#allocation2 + $0xc0] sm:$0xff] %vm1346_vm0, %v1338_v0 }
 0x14c   : > { %v1292_v17 = vpop.permute.xlu1 %1291  ;;  %v1287_v30 = vpop.permute.xlu0 %1286 }
 0x14d   : > { %v1341_v47 = vmul.f32 %v1292_v17, %v1117_v8  ;;  %v1340_v31 = vmul.f32 %v1287_v30, %v1116_v15 }
 0x14f   : > { %1374 = vst.msk [vmem:[#allocation2 + $0xd8] sm:$0xff] %vm1346_vm0, %v1341_v47  ;;  %1373 = vst.msk [vmem:[#allocation2 + $0xd0] sm:$0xff] %vm1346_vm0, %v1340_v31 }
 0x150   : > { %v1302_v48 = vpop.permute.xlu1 %1301  ;;  %v1297_v19 = vpop.permute.xlu0 %1296 }
 0x151   : > { %v1343_v33 = vmul.f32 %v1302_v48, %v1119_v53  ;;  %v1342_v59 = vmul.f32 %v1297_v19, %v1118_v7 }
 0x153   : > { %1376 = vst.msk [vmem:[#allocation2 + $0xe8] sm:$0xff] %vm1346_vm0, %v1343_v33  ;;  %1375 = vst.msk [vmem:[#allocation2 + $0xe0] sm:$0xff] %vm1346_vm0, %v1342_v59 }
 0x154   : > { %v1312_v34 = vpop.permute.xlu1 %1311  ;;  %v1307_v55 = vpop.permute.xlu0 %1306 }
 0x155   : > { %v1345_v9 = vmul.f32 %v1312_v34, %v1121_v58  ;;  %v1344_v10 = vmul.f32 %v1307_v55, %v1120_v56 }
 0x157   : > { %1378 = vst.msk [vmem:[#allocation2 + $0xf8] sm:$0xff] %vm1346_vm0, %v1345_v9  ;;  %1377 = vst.msk [vmem:[#allocation2 + $0xf0] sm:$0xff] %vm1346_vm0, %v1344_v10 }
 0x158 PF: > { %v3928_v21 = vld [vmem:[%s5629_s8] sm:$0xff]   ;;  %v3929_v35 = vld [vmem:[%s5629_s8 + $0x8] sm:$0xff]   ;;  %v3930_v36 = vld [vmem:[%s5629_s8 + $0x10] sm:$0xff]   ;;  %vm1900_vm1 = vcmask 523264  }
 0x159   : > { %3717 = vmatprep.subr.bf16.mxu0 %v3928_v21  ;;  %v3931_v52 = vld [vmem:[%s5629_s8 + $0x18] sm:$0xff]   ;;  %v1379_v11 = vld [vmem:[%s4291_s30] sm:$0xff]  ;;  %v1380_v22 = vld [vmem:[%s4291_s30 + $0x8] sm:$0xff] }
 0x15a   : > { %3718 = vmatpush3.bf16.msra.mxu0 %v3928_v21  ;;  %v1411_v54 = vpack.c.bf16 %v1380_v22, %v1379_v11  ;;  %v3932_v57 = vld [vmem:[%s5629_s8 + $0x20] sm:$0xff]   ;;  %v3933_v12 = vld [vmem:[%s5629_s8 + $0x28] sm:$0xff]   ;;  %v3934_v37 = vld [vmem:[%s5629_s8 + $0x30] sm:$0xff]  }
 0x15b   : > { %3719 = vmatprep.subr.bf16.mxu0 %v3929_v35  ;;  %v3936_v38 = vld [vmem:[%s4296_s15] sm:$0xff]   ;;  %v3937_v63 = vld [vmem:[%s4296_s15 + $0x8] sm:$0xff]   ;;  %v3938_v23 = vld [vmem:[%s4296_s15 + $0x10] sm:$0xff]  }
 0x15c   : > { %3733 = vmatprep.mubr.bf16.mxu0 %v1411_v54  ;;  %3765 = vmatprep.subr.bf16.mxu1 %v3936_v38  ;;  %v3935_v24 = vld [vmem:[%s5629_s8 + $0x38] sm:$0xff]   ;;  %v1381_v51 = vld [vmem:[%s4291_s30 + $0x10] sm:$0xff]  ;;  %v1383_v50 = vld [vmem:[%s4291_s30 + $0x20] sm:$0xff] }
 0x15d   : > { %3766 = vmatpush3.bf16.msra.mxu1 %v3936_v38  ;;  %v1382_v39 = vld [vmem:[%s4291_s30 + $0x18] sm:$0xff]  ;;  %v1384_v1 = vld [vmem:[%s4291_s30 + $0x28] sm:$0xff]  ;;  %v3940_v41 = vld [vmem:[%s4296_s15 + $0x20] sm:$0xff]  }
 0x15e   : > { %3720 = vmatpush3.bf16.msra.mxu0 %v3929_v35  ;;  %3767 = vmatprep.subr.bf16.mxu1 %v3937_v63  ;;  %v3939_v40 = vld [vmem:[%s4296_s15 + $0x18] sm:$0xff]   ;;  %v1412_v13 = vpack.c.bf16 %v1382_v39, %v1381_v51  ;;  %v1413_v14 = vpack.c.bf16 %v1384_v1, %v1383_v50  ;;  %v1385_v42 = vld [vmem:[%s4291_s30 + $0x30] sm:$0xff]  ;;  %v3941_v25 = vld [vmem:[%s4296_s15 + $0x28] sm:$0xff]  }
 0x15f   : > { %3721 = vmatprep.subr.bf16.mxu0 %v3930_v36  ;;  %v1386_v2 = vld [vmem:[%s4291_s30 + $0x38] sm:$0xff]  ;;  %v1387_v26 = vld [vmem:[%s4291_s30 + $0x40] sm:$0xff]  ;;  %v1388_v4 = vld [vmem:[%s4291_s30 + $0x48] sm:$0xff] }
 0x160   : > { %v1414_v43 = vpack.c.bf16 %v1386_v2, %v1385_v42  ;;  %v1415_v44 = vpack.c.bf16 %v1388_v4, %v1387_v26  ;;  %v1389_v0 = vld [vmem:[%s4291_s30 + $0x50] sm:$0xff]  ;;  %v1390_v8 = vld [vmem:[%s4291_s30 + $0x58] sm:$0xff]  ;;  %v1391_v15 = vld [vmem:[%s4291_s30 + $0x60] sm:$0xff] }
 0x161   : > { %3768 = vmatpush3.bf16.msra.mxu1 %v3937_v63  ;;  %v1392_v27 = vld [vmem:[%s4291_s30 + $0x68] sm:$0xff]  ;;  %v1416_v28 = vpack.c.bf16 %v1390_v8, %v1389_v0  ;;  %v1393_v49 = vld [vmem:[%s4291_s30 + $0x70] sm:$0xff]  ;;  %v1394_v45 = vld [vmem:[%s4291_s30 + $0x78] sm:$0xff] }
 0x162   : > { %3722 = vmatpush3.bf16.msra.mxu0 %v3930_v36  ;;  %3769 = vmatprep.subr.bf16.mxu1 %v3938_v23  ;;  %v1417_v16 = vpack.c.bf16 %v1392_v27, %v1391_v15  ;;  %v1395_v29 = vld [vmem:[%s4291_s30 + $0x80] sm:$0xff]  ;;  %v1396_v5 = vld [vmem:[%s4291_s30 + $0x88] sm:$0xff]  ;;  %v1418_v46 = vpack.c.bf16 %v1394_v45, %v1393_v49  ;;  %v1397_v30 = vld [vmem:[%s4291_s30 + $0x90] sm:$0xff] }
 0x163   : > { %3723 = vmatprep.subr.bf16.mxu0 %v3931_v52  ;;  %v1419_v17 = vpack.c.bf16 %v1396_v5, %v1395_v29  ;;  %v1398_v6 = vld [vmem:[%s4291_s30 + $0x98] sm:$0xff]  ;;  %v1399_v61 = vld [vmem:[%s4291_s30 + $0xa0] sm:$0xff]  ;;  %v1400_v18 = vld [vmem:[%s4291_s30 + $0xa8] sm:$0xff] }
 0x164   : > { %v1420_v62 = vpack.c.bf16 %v1398_v6, %v1397_v30  ;;  %v1421_v47 = vpack.c.bf16 %v1400_v18, %v1399_v61  ;;  %v1401_v31 = vld [vmem:[%s4291_s30 + $0xb0] sm:$0xff]  ;;  %v1402_v32 = vld [vmem:[%s4291_s30 + $0xb8] sm:$0xff]  ;;  %v1403_v3 = vld [vmem:[%s4291_s30 + $0xc0] sm:$0xff] }
 0x165   : > { %3770 = vmatpush3.bf16.msra.mxu1 %v3938_v23  ;;  %v1404_v53 = vld [vmem:[%s4291_s30 + $0xc8] sm:$0xff]  ;;  %v1422_v7 = vpack.c.bf16 %v1402_v32, %v1401_v31  ;;  %v1405_v19 = vld [vmem:[%s4291_s30 + $0xd0] sm:$0xff]  ;;  %v1406_v20 = vld [vmem:[%s4291_s30 + $0xd8] sm:$0xff] }
 0x166   : > { %3724 = vmatpush3.bf16.msra.mxu0 %v3931_v52  ;;  %3771 = vmatprep.subr.bf16.mxu1 %v3939_v40  ;;  %v1423_v48 = vpack.c.bf16 %v1404_v53, %v1403_v3  ;;  %v1407_v60 = vld [vmem:[%s4291_s30 + $0xe0] sm:$0xff]  ;;  %v1408_v33 = vld [vmem:[%s4291_s30 + $0xe8] sm:$0xff]  ;;  %v1424_v59 = vpack.c.bf16 %v1406_v20, %v1405_v19  ;;  %v1409_v56 = vld [vmem:[%s4291_s30 + $0xf0] sm:$0xff] }
 0x167   : > { %3725 = vmatprep.subr.bf16.mxu0 %v3932_v57  ;;  %v1425_v58 = vpack.c.bf16 %v1408_v33, %v1407_v60  ;;  %v1410_v34 = vld [vmem:[%s4291_s30 + $0xf8] sm:$0xff]  ;;  %v3942_v9 = vld [vmem:[%s4296_s15 + $0x30] sm:$0xff]   ;;  %v4937_v35 = vld [vmem:[%s5630_s9] ss:$0 sm:$0xff] }
 0x168   : > { %v1426_v55 = vpack.c.bf16 %v1410_v34, %v1409_v56  ;;  %v3943_v10 = vld [vmem:[%s4296_s15 + $0x38] sm:$0xff]  }
 0x169   : > { %3772 = vmatpush3.bf16.msra.mxu1 %v3939_v40 }
 0x16a   : > { %3726 = vmatpush3.bf16.msra.mxu0 %v3932_v57  ;;  %3773 = vmatprep.subr.bf16.mxu1 %v3940_v41 }
 0x16b   : > { %3727 = vmatprep.subr.bf16.mxu0 %v3933_v12 }
 0x16d   : > { %3774 = vmatpush3.bf16.msra.mxu1 %v3940_v41 }
 0x16e   : > { %3728 = vmatpush3.bf16.msra.mxu0 %v3933_v12  ;;  %3775 = vmatprep.subr.bf16.mxu1 %v3941_v25 }
 0x16f   : > { %3729 = vmatprep.subr.bf16.mxu0 %v3934_v37 }
 0x171   : > { %3776 = vmatpush3.bf16.msra.mxu1 %v3941_v25 }
 0x172   : > { %3730 = vmatpush3.bf16.msra.mxu0 %v3934_v37  ;;  %3777 = vmatprep.subr.bf16.mxu1 %v3942_v9 }
 0x173   : > { %3731 = vmatprep.subr.bf16.mxu0 %v3935_v24 }
 0x175   : > { %3778 = vmatpush3.bf16.msra.mxu1 %v3942_v9 }
 0x176   : > { %3732 = vmatpush3.bf16.msra.mxu0 %v3935_v24  ;;  %3779 = vmatprep.subr.bf16.mxu1 %v3943_v10 }
 0x179   : > { %3734 = vmatmul.mubr.bf16.vlgmr.msra.gmra.mrb[0].mxu0 %v1412_v13  ;;  %3780 = vmatpush3.bf16.msra.mxu1 %v3943_v10 }
 0x17a   : > { %3737 = vmatprep.mubr.bf16.mxu0 %v1413_v14 }
 0x181   : > { %3738 = vmatmul.mubr.bf16.gmra.mrb[4].mxu0 %v1414_v43 }
 0x182   : > { %3741 = vmatprep.mubr.bf16.mxu0 %v1415_v44 }
 0x189   : > { %3742 = vmatmul.mubr.bf16.gmra.mrb[8].mxu0 %v1416_v28 }
 0x18a   : > { %3745 = vmatprep.mubr.bf16.mxu0 %v1417_v16 }
 0x191   : > { %3746 = vmatmul.mubr.bf16.gmra.mrb[12].mxu0 %v1418_v46 }
 0x192   : > { %3749 = vmatprep.mubr.bf16.mxu0 %v1419_v17 }
 0x199   : > { %3750 = vmatmul.mubr.bf16.gmra.mrb[16].mxu0 %v1420_v62 }
 0x19a   : > { %3753 = vmatprep.mubr.bf16.mxu0 %v1421_v47 }
 0x1a1   : > { %3754 = vmatmul.mubr.bf16.gmra.mrb[20].mxu0 %v1422_v7 }
 0x1a2   : > { %3757 = vmatprep.mubr.bf16.mxu0 %v1423_v48 }
 0x1a9   : > { %3758 = vmatmul.mubr.bf16.gmra.mrb[24].mxu0 %v1424_v59 }
 0x1aa   : > { %3761 = vmatprep.mubr.bf16.mxu0 %v1425_v58 }
 0x1b1   : > { %3762 = vmatmul.mubr.bf16.gmra.mrb[28].mxu0 %v1426_v55 }
 0x24c   : > { %v3735_v21 = vpop.f32.mrb[0].mxu0 }
 0x24d   : > { %v1532_v36 = vpop.f32.mrb[1].mxu0  ;;  %v1541_v11 = vadd.f32 %v3735_v21, %v4937_v35 }
 0x24e   : > { %v3736_v52 = vpop.f32.mrb[2].mxu0  ;;  %v1533_v57 = vadd.f32 %v4937_v35, %v1532_v36 }
 0x24f   : > { %v1544_v22 = vadd.f32 %v3736_v52, %v4937_v35  ;;  %v1535_v54 = vpop.f32.mrb[3].mxu0 }
 0x250   : > { %v1536_v12 = vadd.f32 %v4937_v35, %v1535_v54 }
 0x251   : > { %v1660_v37 = vpack.c.bf16 %v1544_v22, %v1541_v11 }
 0x252   : > { %v1659_v38 = vpack.c.bf16 %v1536_v12, %v1533_v57 }
 0x254   : > { %v3739_v63 = vpop.f32.mrb[4].mxu0  ;;  %3781 = vmatprep.mubr.bf16.mxu1 %v1659_v38 }
 0x255   : > { %v1557_v23 = vadd.f32 %v3739_v63, %v4937_v35  ;;  %v1548_v24 = vpop.f32.mrb[5].mxu0  ;;  %3782 = vmatmul.mubr.bf16.vlgmr.msra.gmra.mrb[0].mxu1 %v1660_v37 }
 0x256   : > { %v1549_v51 = vadd.f32 %v4937_v35, %v1548_v24  ;;  %v3740_v39 = vpop.f32.mrb[6].mxu0 }
 0x257   : > { %v1560_v40 = vadd.f32 %v3740_v39, %v4937_v35  ;;  %v1551_v50 = vpop.f32.mrb[7].mxu0 }
 0x258   : > { %v1552_v1 = vadd.f32 %v4937_v35, %v1551_v50 }
 0x259   : > { %v1662_v41 = vpack.c.bf16 %v1560_v40, %v1557_v23 }
 0x25a   : > { %v1661_v13 = vpack.c.bf16 %v1552_v1, %v1549_v51 }
 0x25c   : > { %3785 = vmatprep.mubr.bf16.mxu1 %v1661_v13  ;;  %v3743_v14 = vpop.f32.mrb[8].mxu0 }
 0x25d   : > { %3786 = vmatmul.mubr.bf16.gmra.mrb[4].mxu1 %v1662_v41  ;;  %v1573_v42 = vadd.f32 %v3743_v14, %v4937_v35  ;;  %v1564_v2 = vpop.f32.mrb[9].mxu0 }
 0x25e   : > { %v1565_v25 = vadd.f32 %v4937_v35, %v1564_v2  ;;  %v3744_v26 = vpop.f32.mrb[10].mxu0 }
 0x25f   : > { %v1576_v4 = vadd.f32 %v3744_v26, %v4937_v35  ;;  %v1567_v43 = vpop.f32.mrb[11].mxu0 }
 0x260   : > { %v1568_v44 = vadd.f32 %v4937_v35, %v1567_v43 }
 0x261   : > { %v1664_v0 = vpack.c.bf16 %v1576_v4, %v1573_v42 }
 0x262   : > { %v1663_v8 = vpack.c.bf16 %v1568_v44, %v1565_v25 }
 0x264   : > { %3789 = vmatprep.mubr.bf16.mxu1 %v1663_v8  ;;  %v3747_v15 = vpop.f32.mrb[12].mxu0 }
 0x265   : > { %3790 = vmatmul.mubr.bf16.gmra.mrb[8].mxu1 %v1664_v0  ;;  %v1589_v27 = vadd.f32 %v3747_v15, %v4937_v35  ;;  %v1580_v28 = vpop.f32.mrb[13].mxu0 }
 0x266   : > { %v1581_v16 = vadd.f32 %v4937_v35, %v1580_v28  ;;  %v3748_v49 = vpop.f32.mrb[14].mxu0 }
 0x267   : > { %v1592_v45 = vadd.f32 %v3748_v49, %v4937_v35  ;;  %v1583_v29 = vpop.f32.mrb[15].mxu0 }
 0x268   : > { %v1584_v5 = vadd.f32 %v4937_v35, %v1583_v29 }
 0x269   : > { %v1666_v46 = vpack.c.bf16 %v1592_v45, %v1589_v27 }
 0x26a   : > { %v1665_v17 = vpack.c.bf16 %v1584_v5, %v1581_v16 }
 0x26c   : > { %3793 = vmatprep.mubr.bf16.mxu1 %v1665_v17  ;;  %v3751_v30 = vpop.f32.mrb[16].mxu0 }
 0x26d   : > { %3794 = vmatmul.mubr.bf16.gmra.mrb[12].mxu1 %v1666_v46  ;;  %v1605_v6 = vadd.f32 %v3751_v30, %v4937_v35  ;;  %v1596_v61 = vpop.f32.mrb[17].mxu0 }
 0x26e   : > { %v1597_v18 = vadd.f32 %v4937_v35, %v1596_v61  ;;  %v3752_v62 = vpop.f32.mrb[18].mxu0 }
 0x26f   : > { %v1608_v47 = vadd.f32 %v3752_v62, %v4937_v35  ;;  %v1599_v31 = vpop.f32.mrb[19].mxu0 }
 0x270   : > { %v1600_v32 = vadd.f32 %v4937_v35, %v1599_v31 }
 0x271   : > { %v1668_v3 = vpack.c.bf16 %v1608_v47, %v1605_v6 }
 0x272   : > { %v1667_v53 = vpack.c.bf16 %v1600_v32, %v1597_v18 }
 0x274   : > { %3797 = vmatprep.mubr.bf16.mxu1 %v1667_v53  ;;  %v3755_v7 = vpop.f32.mrb[20].mxu0 }
 0x275   : > { %3798 = vmatmul.mubr.bf16.gmra.mrb[16].mxu1 %v1668_v3  ;;  %v1621_v48 = vadd.f32 %v3755_v7, %v4937_v35  ;;  %v1612_v19 = vpop.f32.mrb[21].mxu0 }
 0x276   : > { %v1613_v20 = vadd.f32 %v4937_v35, %v1612_v19  ;;  %v3756_v60 = vpop.f32.mrb[22].mxu0 }
 0x277   : > { %v1624_v33 = vadd.f32 %v3756_v60, %v4937_v35  ;;  %v1615_v59 = vpop.f32.mrb[23].mxu0 }
 0x278   : > { %v1616_v58 = vadd.f32 %v4937_v35, %v1615_v59 }
 0x279   : > { %v1670_v56 = vpack.c.bf16 %v1624_v33, %v1621_v48 }
 0x27a   : > { %v1669_v34 = vpack.c.bf16 %v1616_v58, %v1613_v20 }
 0x27c   : > { %3801 = vmatprep.mubr.bf16.mxu1 %v1669_v34  ;;  %v3759_v55 = vpop.f32.mrb[24].mxu0 }
 0x27d   : > { %3802 = vmatmul.mubr.bf16.gmra.mrb[20].mxu1 %v1670_v56  ;;  %v1637_v9 = vadd.f32 %v3759_v55, %v4937_v35  ;;  %v1628_v10 = vpop.f32.mrb[25].mxu0 }
 0x27e   : > { %v1629_v21 = vadd.f32 %v4937_v35, %v1628_v10  ;;  %v3760_v36 = vpop.f32.mrb[26].mxu0 }
 0x27f   : > { %v1640_v52 = vadd.f32 %v3760_v36, %v4937_v35  ;;  %v1631_v11 = vpop.f32.mrb[27].mxu0 }
 0x280   : > { %v1632_v22 = vadd.f32 %v4937_v35, %v1631_v11 }
 0x281   : > { %v1672_v54 = vpack.c.bf16 %v1640_v52, %v1637_v9 }
 0x282   : > { %v1671_v57 = vpack.c.bf16 %v1632_v22, %v1629_v21 }
 0x284   : > { %3805 = vmatprep.mubr.bf16.mxu1 %v1671_v57  ;;  %v3763_v12 = vpop.f32.mrb[28].mxu0 }
 0x285   : > { %3806 = vmatmul.mubr.bf16.gmra.mrb[24].mxu1 %v1672_v54  ;;  %v1653_v37 = vadd.f32 %v3763_v12, %v4937_v35  ;;  %v1644_v38 = vpop.f32.mrb[29].mxu0 }
 0x286   : > { %v1645_v63 = vadd.f32 %v4937_v35, %v1644_v38  ;;  %v3764_v23 = vpop.f32.mrb[30].mxu0 }
 0x287   : > { %v1656_v24 = vadd.f32 %v3764_v23, %v4937_v35  ;;  %v1647_v51 = vpop.f32.mrb[31].mxu0 }
 0x288   : > { %v1648_v39 = vadd.f32 %v4937_v35, %v1647_v51 }
 0x289   : > { %v1674_v40 = vpack.c.bf16 %v1656_v24, %v1653_v37 }
 0x28a   : > { %v1673_v50 = vpack.c.bf16 %v1648_v39, %v1645_v63 }
 0x28c   : > { %3809 = vmatprep.mubr.bf16.mxu1 %v1673_v50 }
 0x28d   : > { %3810 = vmatmul.mubr.bf16.gmra.mrb[28].mxu1 %v1674_v40 }
 0x328   : > { %v4971_v1 = vpop.f32.mrb[0].mxu1 }
 0x329   : > { %v4973_v41 = vpop.f32.mrb[1].mxu1  ;;  %v1907_v13 = vsel %vm1900_vm1, %v4971_v1, inf  ;;  %v2003_v2 = vsel %vm1900_vm1, %v4971_v1, -inf }
 0x32a   : > { %1908 = vmin.xlane.f32.xlu0 %v1907_v13  ;;  %v4977_v14 = vpop.f32.mrb[2].mxu1  ;;  %v1997_v42 = vsel %vm1900_vm1, %v4973_v41, -inf  ;;  %v1901_v43 = vsel %vm1900_vm1, %v4973_v41, inf }
 0x32b   : > { %1998 = vmax.xlane.f32.xlu1 %v1997_v42  ;;  %v4981_v35 = vpop.f32.mrb[3].mxu1  ;;  %v1910_v25 = vsel %vm1900_vm1, %v4977_v14, inf  ;;  %v2006_v0 = vsel %vm1900_vm1, %v4977_v14, -inf }
 0x32c   : > { %v1904_v15 = vsel %vm1900_vm1, %v4981_v35, inf  ;;  %v2000_v27 = vsel %vm1900_vm1, %v4981_v35, -inf }
 0x32e   : > { %2004 = vmax.xlane.f32.xlu0 %v2003_v2 }
 0x32f   : > { %1911 = vmin.xlane.f32.xlu1 %v1910_v25 }
 0x330   : > { %v4987_v26 = vpop.f32.mrb[4].mxu1 }
 0x331   : > { %v4989_v4 = vpop.f32.mrb[5].mxu1  ;;  %v1919_v16 = vsel %vm1900_vm1, %v4987_v26, inf  ;;  %v2015_v46 = vsel %vm1900_vm1, %v4987_v26, -inf }
 0x332   : > { %1902 = vmin.xlane.f32.xlu0 %v1901_v43  ;;  %v4993_v44 = vpop.f32.mrb[6].mxu1  ;;  %v1913_v6 = vsel %vm1900_vm1, %v4989_v4, inf  ;;  %v2009_v31 = vsel %vm1900_vm1, %v4989_v4, -inf }
 0x333   : > { %2007 = vmax.xlane.f32.xlu1 %v2006_v0  ;;  %v4997_v8 = vpop.f32.mrb[7].mxu1  ;;  %v1922_v45 = vsel %vm1900_vm1, %v4993_v44, inf  ;;  %v2018_v17 = vsel %vm1900_vm1, %v4993_v44, -inf }
 0x334   : > { %v1916_v18 = vsel %vm1900_vm1, %v4997_v8, inf  ;;  %v2012_v32 = vsel %vm1900_vm1, %v4997_v8, -inf }
 0x336   : > { %1905 = vmin.xlane.f32.xlu0 %v1904_v15 }
 0x337   : > { %2001 = vmax.xlane.f32.xlu1 %v2000_v27 }
 0x338   : > { %v5003_v28 = vpop.f32.mrb[8].mxu1 }
 0x339   : > { %v5007_v49 = vpop.f32.mrb[9].mxu1  ;;  %v1931_v53 = vsel %vm1900_vm1, %v5003_v28, inf  ;;  %v2027_v60 = vsel %vm1900_vm1, %v5003_v28, -inf }
 0x33a   : > { %1920 = vmin.xlane.f32.xlu0 %v1919_v16  ;;  %v5011_v29 = vpop.f32.mrb[10].mxu1  ;;  %v1925_v58 = vsel %vm1900_vm1, %v5007_v49, inf  ;;  %v2021_v10 = vsel %vm1900_vm1, %v5007_v49, -inf }
 0x33b   : > { %1923 = vmin.xlane.f32.xlu1 %v1922_v45  ;;  %v5013_v5 = vpop.f32.mrb[11].mxu1  ;;  %v1934_v48 = vsel %vm1900_vm1, %v5011_v29, inf  ;;  %v2030_v33 = vsel %vm1900_vm1, %v5011_v29, -inf }
 0x33c   : > { %v1928_v34 = vsel %vm1900_vm1, %v5013_v5, inf  ;;  %v2024_v21 = vsel %vm1900_vm1, %v5013_v5, -inf }
 0x33e   : > { %2016 = vmax.xlane.f32.xlu0 %v2015_v46 }
 0x33f   : > { %2019 = vmax.xlane.f32.xlu1 %v2018_v17 }
 0x340   : > { %v5019_v30 = vpop.f32.mrb[12].mxu1 }
 0x341   : > { %v5023_v61 = vpop.f32.mrb[13].mxu1  ;;  %v1943_v52 = vsel %vm1900_vm1, %v5019_v30, inf  ;;  %v2039_v12 = vsel %vm1900_vm1, %v5019_v30, -inf }
 0x342   : > { %1914 = vmin.xlane.f32.xlu0 %v1913_v6  ;;  %v5027_v62 = vpop.f32.mrb[14].mxu1  ;;  %v1937_v63 = vsel %vm1900_vm1, %v5023_v61, inf  ;;  %v2033_v40 = vsel %vm1900_vm1, %v5023_v61, -inf }
 0x343   : > { %1917 = vmin.xlane.f32.xlu1 %v1916_v18  ;;  %v5029_v47 = vpop.f32.mrb[15].mxu1  ;;  %v1946_v22 = vsel %vm1900_vm1, %v5027_v62, inf  ;;  %v2042_v37 = vsel %vm1900_vm1, %v5027_v62, -inf }
 0x344   : > { %v1940_v24 = vsel %vm1900_vm1, %v5029_v47, inf  ;;  %v2036_v50 = vsel %vm1900_vm1, %v5029_v47, -inf }
 0x346   : > { %2010 = vmax.xlane.f32.xlu0 %v2009_v31 }
 0x347   : > { %2013 = vmax.xlane.f32.xlu1 %v2012_v32 }
 0x348   : > { %v5035_v3 = vpop.f32.mrb[16].mxu1 }
 0x349   : > { %v5039_v7 = vpop.f32.mrb[17].mxu1  ;;  %v1955_v13 = vsel %vm1900_vm1, %v5035_v3, inf  ;;  %v2051_v2 = vsel %vm1900_vm1, %v5035_v3, -inf }
 0x34a   : > { %1932 = vmin.xlane.f32.xlu0 %v1931_v53  ;;  %v5043_v19 = vpop.f32.mrb[18].mxu1  ;;  %v1949_v43 = vsel %vm1900_vm1, %v5039_v7, inf  ;;  %v2045_v15 = vsel %vm1900_vm1, %v5039_v7, -inf }
 0x34b   : > { %1935 = vmin.xlane.f32.xlu1 %v1934_v48  ;;  %v5045_v20 = vpop.f32.mrb[19].mxu1  ;;  %v1958_v42 = vsel %vm1900_vm1, %v5043_v19, inf  ;;  %v2054_v25 = vsel %vm1900_vm1, %v5043_v19, -inf }
 0x34c   : > { %v1952_v0 = vsel %vm1900_vm1, %v5045_v20, inf  ;;  %v2048_v27 = vsel %vm1900_vm1, %v5045_v20, -inf }
 0x34e   : > { %2028 = vmax.xlane.f32.xlu0 %v2027_v60 }
 0x34f   : > { %2031 = vmax.xlane.f32.xlu1 %v2030_v33 }
 0x350   : > { %v5051_v59 = vpop.f32.mrb[20].mxu1 }
 0x351   : > { %v5055_v56 = vpop.f32.mrb[21].mxu1  ;;  %v1967_v16 = vsel %vm1900_vm1, %v5051_v59, inf  ;;  %v2063_v46 = vsel %vm1900_vm1, %v5051_v59, -inf }
 0x352   : > { %1926 = vmin.xlane.f32.xlu0 %v1925_v58  ;;  %v5059_v55 = vpop.f32.mrb[22].mxu1  ;;  %v1961_v6 = vsel %vm1900_vm1, %v5055_v56, inf  ;;  %v2057_v31 = vsel %vm1900_vm1, %v5055_v56, -inf }
 0x353   : > { %1929 = vmin.xlane.f32.xlu1 %v1928_v34  ;;  %v5061_v9 = vpop.f32.mrb[23].mxu1  ;;  %v1970_v45 = vsel %vm1900_vm1, %v5059_v55, inf  ;;  %v2066_v17 = vsel %vm1900_vm1, %v5059_v55, -inf }
 0x354   : > { %v1964_v18 = vsel %vm1900_vm1, %v5061_v9, inf  ;;  %v2060_v32 = vsel %vm1900_vm1, %v5061_v9, -inf }
 0x356   : > { %2022 = vmax.xlane.f32.xlu0 %v2021_v10 }
 0x357   : > { %2025 = vmax.xlane.f32.xlu1 %v2024_v21 }
 0x358   : > { %v5067_v36 = vpop.f32.mrb[24].mxu1 }
 0x359   : > { %v5071_v11 = vpop.f32.mrb[25].mxu1  ;;  %v1979_v53 = vsel %vm1900_vm1, %v5067_v36, inf  ;;  %v2075_v60 = vsel %vm1900_vm1, %v5067_v36, -inf }
 0x35a   : > { %1944 = vmin.xlane.f32.xlu0 %v1943_v52  ;;  %v5075_v54 = vpop.f32.mrb[26].mxu1  ;;  %v1973_v58 = vsel %vm1900_vm1, %v5071_v11, inf  ;;  %v2069_v10 = vsel %vm1900_vm1, %v5071_v11, -inf }
 0x35b   : > { %1947 = vmin.xlane.f32.xlu1 %v1946_v22  ;;  %v5077_v57 = vpop.f32.mrb[27].mxu1  ;;  %v1982_v48 = vsel %vm1900_vm1, %v5075_v54, inf  ;;  %v2078_v33 = vsel %vm1900_vm1, %v5075_v54, -inf }
 0x35c   : > { %v1976_v34 = vsel %vm1900_vm1, %v5077_v57, inf  ;;  %v2072_v21 = vsel %vm1900_vm1, %v5077_v57, -inf }
 0x35e   : > { %2040 = vmax.xlane.f32.xlu0 %v2039_v12 }
 0x35f   : > { %2043 = vmax.xlane.f32.xlu1 %v2042_v37 }
 0x360   : > { %v5083_v38 = vpop.f32.mrb[28].mxu1 }
 0x361   : > { %v5087_v23 = vpop.f32.mrb[29].mxu1  ;;  %v1991_v52 = vsel %vm1900_vm1, %v5083_v38, inf }
 0x362   : > { %1938 = vmin.xlane.f32.xlu0 %v1937_v63  ;;  %v5091_v51 = vpop.f32.mrb[30].mxu1  ;;  %v1985_v12 = vsel %vm1900_vm1, %v5087_v23, inf  ;;  %v2081_v63 = vsel %vm1900_vm1, %v5087_v23, -inf }
 0x363   : > { %1941 = vmin.xlane.f32.xlu1 %v1940_v24  ;;  %v5093_v39 = vpop.f32.mrb[31].mxu1  ;;  %v1994_v22 = vsel %vm1900_vm1, %v5091_v51, inf }
 0x364   : > { %v1988_v37 = vsel %vm1900_vm1, %v5093_v39, inf  ;;  %v2084_v24 = vsel %vm1900_vm1, %v5093_v39, -inf }
 0x366   : > { %2034 = vmax.xlane.f32.xlu0 %v2033_v40  ;;  %v2087_v40 = vsel %vm1900_vm1, %v5083_v38, -inf }
 0x367   : > { %2037 = vmax.xlane.f32.xlu1 %v2036_v50  ;;  %v2090_v50 = vsel %vm1900_vm1, %v5091_v51, -inf }
 0x36a   : > { %1956 = vmin.xlane.f32.xlu0 %v1955_v13 }
 0x36b   : > { %1959 = vmin.xlane.f32.xlu1 %v1958_v42 }
 0x36e   : > { %2052 = vmax.xlane.f32.xlu0 %v2051_v2 }
 0x36f   : > { %2055 = vmax.xlane.f32.xlu1 %v2054_v25 }
 0x372   : > { %1950 = vmin.xlane.f32.xlu0 %v1949_v43 }
 0x373   : > { %1953 = vmin.xlane.f32.xlu1 %v1952_v0 }
 0x376   : > { %2046 = vmax.xlane.f32.xlu0 %v2045_v15 }
 0x377   : > { %2049 = vmax.xlane.f32.xlu1 %v2048_v27 }
 0x37a   : > { %1968 = vmin.xlane.f32.xlu0 %v1967_v16 }
 0x37b   : > { %1971 = vmin.xlane.f32.xlu1 %v1970_v45 }
 0x37e   : > { %2064 = vmax.xlane.f32.xlu0 %v2063_v46 }
 0x37f   : > { %2067 = vmax.xlane.f32.xlu1 %v2066_v17 }
 0x382   : > { %1962 = vmin.xlane.f32.xlu0 %v1961_v6 }
 0x383   : > { %1965 = vmin.xlane.f32.xlu1 %v1964_v18 }
 0x386   : > { %2058 = vmax.xlane.f32.xlu0 %v2057_v31 }
 0x387   : > { %2061 = vmax.xlane.f32.xlu1 %v2060_v32 }
 0x38a   : > { %1980 = vmin.xlane.f32.xlu0 %v1979_v53 }
 0x38b   : > { %1983 = vmin.xlane.f32.xlu1 %v1982_v48 }
 0x38e   : > { %2076 = vmax.xlane.f32.xlu0 %v2075_v60 }
 0x38f   : > { %2079 = vmax.xlane.f32.xlu1 %v2078_v33 }
 0x392   : > { %1974 = vmin.xlane.f32.xlu0 %v1973_v58 }
 0x393   : > { %1977 = vmin.xlane.f32.xlu1 %v1976_v34 }
 0x396   : > { %2070 = vmax.xlane.f32.xlu0 %v2069_v10 }
 0x397   : > { %2073 = vmax.xlane.f32.xlu1 %v2072_v21 }
 0x39a   : > { %1992 = vmin.xlane.f32.xlu0 %v1991_v52 }
 0x39b   : > { %1995 = vmin.xlane.f32.xlu1 %v1994_v22 }
 0x39e   : > { %1986 = vmin.xlane.f32.xlu0 %v1985_v12 }
 0x39f   : > { %1989 = vmin.xlane.f32.xlu1 %v1988_v37 }
 0x3a2   : > { %2082 = vmax.xlane.f32.xlu0 %v2081_v63 }
 0x3a3   : > { %2085 = vmax.xlane.f32.xlu1 %v2084_v24 }
 0x3a6   : > { %2088 = vmax.xlane.f32.xlu0 %v2087_v40 }
 0x3a7   : > { %2091 = vmax.xlane.f32.xlu1 %v2090_v50 }
 0x3b7   : > { %v1909_v13 = vpop.xlane.xlu0 %1908 }
 0x3b8   : > { %v1999_v42 = vpop.xlane.xlu1 %1998  ;;  %v2255_v60 = vsub.f32 0.0, %v1909_v13 }
 0x3bb   : > { %v2005_v2 = vpop.xlane.xlu0 %2004 }
 0x3bc   : > { %v2095_v25 = vsub.f32 %v2005_v2, %v1909_v13  ;;  %v1912_v43 = vpop.xlane.xlu1 %1911 }
 0x3bd   : > { %v2256_v63 = vsub.f32 0.0, %v1912_v43 }
 0x3be   : > { %vm2127_vm2 = vcmp.gt.f32.partialorder %v2095_v25, 0.0 }
 0x3bf   : > { %v2159_v0 = vsel %vm2127_vm2, %v2095_v25, 1.0  ;;  %v1903_v15 = vpop.xlane.xlu0 %1902 }
 0x3c0   : > { %3956 = vrcp.f32 %v2159_v0  ;;  %v2093_v27 = vsub.f32 %v1999_v42, %v1903_v15  ;;  %v2008_v16 = vpop.xlane.xlu1 %2007  ;;  %v2253_v52 = vsub.f32 0.0, %v1903_v15 }
 0x3c1   : > { %v2096_v45 = vsub.f32 %v2008_v16, %v1912_v43  ;;  %v2415_v16 = vld [vmem:[#allocation2 + $0x10] sm:$0xff]  ;;  %v2413_v43 = vld [vmem:[#allocation2] sm:$0xff] }
 0x3c2   : > { %vm2125_vm3 = vcmp.gt.f32.partialorder %v2093_v27, 0.0 }
 0x3c3   : > { %v2157_v46 = vsel %vm2125_vm3, %v2093_v27, 1.0  ;;  %vm2128_vm4 = vcmp.gt.f32.partialorder %v2096_v45, 0.0  ;;  %v1906_v17 = vpop.xlane.xlu0 %1905 }
 0x3c4   : > { %3958 = vrcp.f32 %v2157_v46  ;;  %v2160_v6 = vsel %vm2128_vm4, %v2096_v45, 1.0  ;;  %v2002_v18 = vpop.xlane.xlu1 %2001  ;;  %v2254_v46 = vsub.f32 0.0, %v1906_v17 }
 0x3c5   : > { %3960 = vrcp.f32 %v2160_v6  ;;  %v2094_v31 = vsub.f32 %v2002_v18, %v1906_v17 }
 0x3c7   : > { %vm2126_vm5 = vcmp.gt.f32.partialorder %v2094_v31, 0.0  ;;  %v5163_v32 = vpop.xlane.xlu0 %1920 }
 0x3c8   : > { %v2158_v53 = vsel %vm2126_vm5, %v2094_v31, 1.0  ;;  %v5165_v48 = vpop.xlane.xlu1 %1923 }
 0x3c9   : > { %3962 = vrcp.f32 %v2158_v53 }
 0x3ca   : > { %v3957_v33 = vpop.eup %3956 }
 0x3cb   : > { %v2287_v58 = vmul.f32 %v3957_v33, %v2255_v60  ;;  %v2017_v34 = vpop.xlane.xlu0 %2016  ;;  %v2351_v13 = vmul.f32 %v3957_v33, %v4971_v1 }
 0x3cc   : > { %v2099_v10 = vsub.f32 %v2017_v34, %v5163_v32  ;;  %v2020_v21 = vpop.xlane.xlu1 %2019 }
 0x3cd   : > { %v2100_v22 = vsub.f32 %v2020_v21, %v5165_v48  ;;  %v3560_v37 = vadd.f32 -1.0, %v2287_v58 }
 0x3ce   : > { %v3959_v12 = vpop.eup %3958  ;;  %vm2131_vm6 = vcmp.gt.f32.partialorder %v2099_v10, 0.0 }
 0x3cf   : > { %v3961_v24 = vpop.eup %3960  ;;  %v2285_v40 = vmul.f32 %v3959_v12, %v2253_v52  ;;  %v2163_v50 = vsel %vm2131_vm6, %v2099_v10, 1.0  ;;  %vm2132_vm7 = vcmp.gt.f32.partialorder %v2100_v22, 0.0  ;;  %v5169_v42 = vpop.xlane.xlu0 %1914  ;;  %v2349_v27 = vmul.f32 %v3959_v12, %v4973_v41  ;;  %v2416_v10 = vld [vmem:[#allocation2 + $0x18] sm:$0xff] }
 0x3d0   : > { %v2288_v2 = vmul.f32 %v3961_v24, %v2256_v63  ;;  %3964 = vrcp.f32 %v2163_v50  ;;  %v2164_v25 = vsel %vm2132_vm7, %v2100_v22, 1.0  ;;  %v5172_v0 = vpop.xlane.xlu1 %1917  ;;  %v2383_v6 = vadd.f32 %v3560_v37, %v2351_v13 }
 0x3d1   : > { %v3558_v15 = vadd.f32 -1.0, %v2285_v40  ;;  %3966 = vrcp.f32 %v2164_v25  ;;  %v2352_v53 = vmul.f32 %v3961_v24, %v4977_v14  ;;  %v2414_v24 = vld [vmem:[#allocation2 + $0x8] sm:$0xff]  ;;  %v2259_v25 = vsub.f32 0.0, %v5163_v32 }
 0x3d2   : > { %v3561_v45 = vadd.f32 -1.0, %v2288_v2  ;;  %v2447_v34 = vadd.f32 %v2415_v16, %v2383_v6  ;;  %v2260_v6 = vsub.f32 0.0, %v5165_v48 }
 0x3d3   : > { %v3963_v18 = vpop.eup %3962  ;;  %v2381_v31 = vadd.f32 %v3558_v15, %v2349_v27  ;;  %v2011_v60 = vpop.xlane.xlu0 %2010 }
 0x3d4   : > { %v2286_v1 = vmul.f32 %v3963_v18, %v2254_v46  ;;  %v2097_v33 = vsub.f32 %v2011_v60, %v5169_v42  ;;  %v2014_v58 = vpop.xlane.xlu1 %2013  ;;  %v2384_v52 = vadd.f32 %v3561_v45, %v2352_v53  ;;  %v2350_v12 = vmul.f32 %v3963_v18, %v4981_v35  ;;  %v3944_v46 = vld [vmem:[%s4306_s22] sm:$0xff]  }
 0x3d5   : > { %v2445_v21 = vadd.f32 %v2413_v43, %v2381_v31  ;;  %v2098_v41 = vsub.f32 %v2014_v58, %v5172_v0  ;;  %v2481_v17 = vmul.f32 1.442695, %v2447_v34  ;;  %3813 = vmatprep.subr.bf16.mxu0 %v3944_v46 }
 0x3d6   : > { %v3559_v22 = vadd.f32 -1.0, %v2286_v1  ;;  %vm2129_vm8 = vcmp.gt.f32.partialorder %v2097_v33, 0.0  ;;  %v2448_v40 = vadd.f32 %v2416_v10, %v2384_v52  ;;  %3814 = vmatpush3.bf16.msra.mxu0 %v3944_v46 }
 0x3d7   : > { %v2477_v37 = vmul.f32 1.442695, %v2445_v21  ;;  %v2161_v63 = vsel %vm2129_vm8, %v2097_v33, 1.0  ;;  %vm2130_vm9 = vcmp.gt.f32.partialorder %v2098_v41, 0.0  ;;  %v5179_v14 = vpop.xlane.xlu0 %1932  ;;  %v2257_v21 = vsub.f32 0.0, %v5169_v42 }
 0x3d8   : > { %3968 = vrcp.f32 %v2161_v63  ;;  %v2162_v50 = vsel %vm2130_vm9, %v2098_v41, 1.0  ;;  %v5181_v13 = vpop.xlane.xlu1 %1935  ;;  %v2382_v2 = vadd.f32 %v3559_v22, %v2350_v12  ;;  %v2483_v45 = vmul.f32 1.442695, %v2448_v40 }
 0x3d9   : > { %3970 = vpow2.f32 %v2477_v37 }
 0x3da   : > { %v3965_v15 = vpop.eup %3964  ;;  %3972 = vrcp.f32 %v2162_v50  ;;  %v2446_v35 = vadd.f32 %v2414_v24, %v2382_v2  ;;  %v2419_v24 = vld [vmem:[#allocation2 + $0x30] sm:$0xff] }
 0x3db   : > { %v3967_v27 = vpop.eup %3966  ;;  %v2291_v16 = vmul.f32 %v3965_v15, %v2259_v25  ;;  %v2029_v43 = vpop.xlane.xlu0 %2028  ;;  %3974 = vpow2.f32 %v2481_v17  ;;  %v2355_v34 = vmul.f32 %v3965_v15, %v4987_v26  ;;  %v2258_v17 = vsub.f32 0.0, %v5172_v0 }
 0x3dc   : > { %v2103_v18 = vsub.f32 %v2029_v43, %v5179_v14  ;;  %v2032_v31 = vpop.xlane.xlu1 %2031  ;;  %v2479_v53 = vmul.f32 1.442695, %v2446_v35  ;;  %v2292_v32 = vmul.f32 %v3967_v27, %v2260_v6  ;;  %v2356_v26 = vmul.f32 %v3967_v27, %v4993_v44  ;;  %v2417_v43 = vld [vmem:[#allocation2 + $0x20] sm:$0xff] }
 0x3dd   : > { %v2104_v60 = vsub.f32 %v2032_v31, %v5181_v13  ;;  %v3564_v1 = vadd.f32 -1.0, %v2291_v16 }
 0x3de   : > { %vm2135_vm10 = vcmp.gt.f32.partialorder %v2103_v18, 0.0  ;;  %3976 = vpow2.f32 %v2479_v53  ;;  %v3565_v52 = vadd.f32 -1.0, %v2292_v32  ;;  %v2420_v32 = vld [vmem:[#allocation2 + $0x38] sm:$0xff] }
 0x3df   : > { %v2167_v33 = vsel %vm2135_vm10, %v2103_v18, 1.0  ;;  %vm2136_vm11 = vcmp.gt.f32.partialorder %v2104_v60, 0.0  ;;  %v5188_v58 = vpop.xlane.xlu0 %1926  ;;  %3978 = vpow2.f32 %v2483_v45  ;;  %v2387_v22 = vadd.f32 %v3564_v1, %v2355_v34 }
 0x3e0   : > { %3980 = vrcp.f32 %v2167_v33  ;;  %v2168_v48 = vsel %vm2136_vm11, %v2104_v60, 1.0  ;;  %v5191_v10 = vpop.xlane.xlu1 %1929  ;;  %v2388_v46 = vadd.f32 %v3565_v52, %v2356_v26  ;;  %v2263_v34 = vsub.f32 0.0, %v5179_v14 }
 0x3e1   : > { %3982 = vrcp.f32 %v2168_v48  ;;  %v2451_v45 = vadd.f32 %v2419_v24, %v2387_v22 }
 0x3e2   : > { %v3969_v41 = vpop.eup %3968  ;;  %v2452_v24 = vadd.f32 %v2420_v32, %v2388_v46 }
 0x3e3   : > { %v5194_v12 = vpop.eup %3970  ;;  %v2289_v37 = vmul.f32 %v3969_v41, %v2257_v21  ;;  %v2023_v63 = vpop.xlane.xlu0 %2022  ;;  %v2353_v35 = vmul.f32 %v3969_v41, %v4989_v4  ;;  %v2418_v41 = vld [vmem:[#allocation2 + $0x28] sm:$0xff] }
 0x3e4   : > { %v3973_v40 = vpop.eup %3972  ;;  %v2101_v50 = vsub.f32 %v2023_v63, %v5188_v58  ;;  %v2026_v2 = vpop.xlane.xlu1 %2025  ;;  %v2541_v42 = vsel %vm1900_vm1, %v5194_v12, 0.0  ;;  %v2489_v63 = vmul.f32 1.442695, %v2451_v45  ;;  %v2491_v45 = vmul.f32 1.442695, %v2452_v24 }
 0x3e5   : > { %v5201_v25 = vpop.eup %3974  ;;  %v3562_v15 = vadd.f32 -1.0, %v2289_v37  ;;  %v2290_v16 = vmul.f32 %v3973_v40, %v2258_v17  ;;  %v2102_v0 = vsub.f32 %v2026_v2, %v5191_v10  ;;  %2542 = vadd.xlane.f32.xlu0 %v2541_v42  ;;  %v2354_v53 = vmul.f32 %v3973_v40, %v4997_v8 }
 0x3e6   : > { %vm2133_vm12 = vcmp.gt.f32.partialorder %v2101_v50, 0.0  ;;  %v2547_v1 = vsel %vm1900_vm1, %v5201_v25, 0.0 }
 0x3e7   : > { %v3563_v44 = vadd.f32 -1.0, %v2290_v16  ;;  %v2165_v27 = vsel %vm2133_vm12, %v2101_v50, 1.0  ;;  %vm2134_vm13 = vcmp.gt.f32.partialorder %v2102_v0, 0.0  ;;  %v5205_v6 = vpop.xlane.xlu0 %1944  ;;  %v2385_v18 = vadd.f32 %v3562_v15, %v2353_v35 }
 0x3e8   : > { %v5207_v31 = vpop.eup %3976  ;;  %3984 = vrcp.f32 %v2165_v27  ;;  %v2166_v4 = vsel %vm2134_vm13, %v2102_v0, 1.0  ;;  %v5210_v60 = vpop.xlane.xlu1 %1947  ;;  %v2264_v15 = vsub.f32 0.0, %v5181_v13 }
 0x3e9   : > { %v5214_v33 = vpop.eup %3978  ;;  %3986 = vrcp.f32 %v2166_v4  ;;  %2548 = vadd.xlane.f32.xlu0 %v2547_v1  ;;  %v2544_v48 = vsel %vm1900_vm1, %v5207_v31, 0.0  ;;  %v2449_v21 = vadd.f32 %v2417_v43, %v2385_v18  ;;  %v2386_v52 = vadd.f32 %v3563_v44, %v2354_v53 }
 0x3ea   : > { %v3981_v8 = vpop.eup %3980  ;;  %2545 = vadd.xlane.f32.xlu1 %v2544_v48  ;;  %v2550_v42 = vsel %vm1900_vm1, %v5214_v33, 0.0  ;;  %v2261_v53 = vsub.f32 0.0, %v5188_v58  ;;  %v2262_v4 = vsub.f32 0.0, %v5191_v10 }
 0x3eb   : > { %v2295_v22 = vmul.f32 %v3981_v8, %v2263_v34  ;;  %v2041_v17 = vpop.xlane.xlu0 %2040  ;;  %v2485_v37 = vmul.f32 1.442695, %v2449_v21  ;;  %v2450_v50 = vadd.f32 %v2418_v41, %v2386_v52  ;;  %v3983_v14 = vpop.eup %3982  ;;  %v2359_v46 = vmul.f32 %v3981_v8, %v5003_v28  ;;  %v2423_v21 = vld [vmem:[#allocation2 + $0x50] sm:$0xff] }
 0x3ec   : > { %v2107_v40 = vsub.f32 %v2041_v17, %v5205_v6  ;;  %v2044_v26 = vpop.xlane.xlu1 %2043  ;;  %v2296_v44 = vmul.f32 %v3983_v14, %v2264_v15 }
 0x3ed   : > { %v2108_v2 = vsub.f32 %v2044_v26, %v5210_v60  ;;  %3988 = vpow2.f32 %v2485_v37  ;;  %v3568_v35 = vadd.f32 -1.0, %v2295_v22  ;;  %v2487_v16 = vmul.f32 1.442695, %v2450_v50 }
 0x3ee   : > { %vm2139_vm14 = vcmp.gt.f32.partialorder %v2107_v40, 0.0  ;;  %2551 = vadd.xlane.f32.xlu1 %v2550_v42  ;;  %3990 = vpow2.f32 %v2489_v63  ;;  %v3569_v41 = vadd.f32 -1.0, %v2296_v44  ;;  %v2360_v37 = vmul.f32 %v3983_v14, %v5011_v29  ;;  %v2421_v63 = vld [vmem:[#allocation2 + $0x40] sm:$0xff]  ;;  %v2422_v14 = vld [vmem:[#allocation2 + $0x48] sm:$0xff] }
 0x3ef   : > { %v2171_v0 = vsel %vm2139_vm14, %v2107_v40, 1.0  ;;  %vm2140_vm15 = vcmp.gt.f32.partialorder %v2108_v2, 0.0  ;;  %v5224_v43 = vpop.xlane.xlu0 %1938  ;;  %v2391_v1 = vadd.f32 %v3568_v35, %v2359_v46  ;;  %v2424_v46 = vld [vmem:[#allocation2 + $0x58] sm:$0xff] }
 0x3f0   : > { %3992 = vrcp.f32 %v2171_v0  ;;  %v2172_v27 = vsel %vm2140_vm15, %v2108_v2, 1.0  ;;  %v5227_v18 = vpop.xlane.xlu1 %1941  ;;  %v2392_v35 = vadd.f32 %v3569_v41, %v2360_v37  ;;  %v2267_v0 = vsub.f32 0.0, %v5205_v6 }
 0x3f1   : > { %3994 = vrcp.f32 %v2172_v27  ;;  %v2455_v24 = vadd.f32 %v2423_v21, %v2391_v1 }
 0x3f2   : > { %v3985_v13 = vpop.eup %3984  ;;  %3996 = vpow2.f32 %v2487_v16 }
 0x3f3   : > { %v3987_v32 = vpop.eup %3986  ;;  %v2293_v34 = vmul.f32 %v3985_v13, %v2261_v53  ;;  %v2035_v48 = vpop.xlane.xlu0 %2034  ;;  %3998 = vpow2.f32 %v2491_v45  ;;  %v2357_v17 = vmul.f32 %v3985_v13, %v5007_v49 }
 0x3f4   : > { %v2294_v52 = vmul.f32 %v3987_v32, %v2262_v4  ;;  %v2105_v28 = vsub.f32 %v2035_v48, %v5224_v43  ;;  %v2038_v8 = vpop.xlane.xlu1 %2037  ;;  %v2358_v26 = vmul.f32 %v3987_v32, %v5013_v5  ;;  %v2497_v32 = vmul.f32 1.442695, %v2455_v24 }
 0x3f5   : > { %v3566_v22 = vadd.f32 -1.0, %v2293_v34  ;;  %v2106_v58 = vsub.f32 %v2038_v8, %v5227_v18  ;;  %v2268_v48 = vsub.f32 0.0, %v5210_v60 }
 0x3f6   : > { %v3567_v10 = vadd.f32 -1.0, %v2294_v52  ;;  %vm2137_vm0 = vcmp.gt.f32.partialorder %v2105_v28, 0.0  ;;  %v2456_v52 = vadd.f32 %v2424_v46, %v2392_v35  ;;  %v2266_v35 = vsub.f32 0.0, %v5227_v18 }
 0x3f7   : > { %v5235_v40 = vpop.eup %3988  ;;  %v2169_v50 = vsel %vm2137_vm0, %v2105_v28, 1.0  ;;  %vm2138_vm2 = vcmp.gt.f32.partialorder %v2106_v58, 0.0  ;;  %v5238_v2 = vpop.xlane.xlu0 %1956  ;;  %v2389_v42 = vadd.f32 %v3566_v22, %v2357_v17 }
 0x3f8   : > { %4000 = vrcp.f32 %v2169_v50  ;;  %v2170_v15 = vsel %vm2138_vm2, %v2106_v58, 1.0  ;;  %v5240_v49 = vpop.xlane.xlu1 %1959  ;;  %v2553_v29 = vsel %vm1900_vm1, %v5235_v40, 0.0  ;;  %v5244_v16 = vpop.eup %3990  ;;  %v2390_v45 = vadd.f32 %v3567_v10, %v2358_v26 }
 0x3f9   : > { %4002 = vrcp.f32 %v2170_v15  ;;  %2554 = vadd.xlane.f32.xlu0 %v2553_v29  ;;  %v2453_v5 = vadd.f32 %v2421_v63, %v2389_v42  ;;  %v2559_v6 = vsel %vm1900_vm1, %v5244_v16, 0.0  ;;  %v2499_v50 = vmul.f32 1.442695, %v2456_v52 }
 0x3fa   : > { %v3993_v44 = vpop.eup %3992  ;;  %v2454_v1 = vadd.f32 %v2422_v14, %v2390_v45  ;;  %v2265_v42 = vsub.f32 0.0, %v5224_v43 }
 0x3fb   : > { %v3995_v27 = vpop.eup %3994  ;;  %v2299_v53 = vmul.f32 %v3993_v44, %v2267_v0  ;;  %v2053_v13 = vpop.xlane.xlu0 %2052  ;;  %v2493_v4 = vmul.f32 1.442695, %v2453_v5  ;;  %v2363_v63 = vmul.f32 %v3993_v44, %v5019_v30  ;;  %v3945_v5 = vld [vmem:[%s4306_s22 + $0x8] sm:$0xff]   ;;  %v2427_v44 = vld [vmem:[#allocation2 + $0x70] sm:$0xff] }
 0x3fc   : > { %v5247_v34 = vpop.eup %3996  ;;  %v2111_v21 = vsub.f32 %v2053_v13, %v5238_v2  ;;  %v2056_v41 = vpop.xlane.xlu1 %2055  ;;  %v2300_v58 = vmul.f32 %v3995_v27, %v2268_v48  ;;  %v2495_v60 = vmul.f32 1.442695, %v2454_v1  ;;  %3815 = vmatprep.subr.bf16.mxu0 %v3945_v5 }
 0x3fd   : > { %v2556_v28 = vsel %vm1900_vm1, %v5247_v34, 0.0  ;;  %v2112_v8 = vsub.f32 %v2056_v41, %v5240_v49  ;;  %2560 = vadd.xlane.f32.xlu0 %v2559_v6  ;;  %4004 = vpow2.f32 %v2493_v4  ;;  %v5256_v22 = vpop.eup %3998  ;;  %v3572_v17 = vadd.f32 -1.0, %v2299_v53  ;;  %3816 = vmatpush3.bf16.msra.mxu0 %v3945_v5 }
 0x3fe   : > { %2557 = vadd.xlane.f32.xlu1 %v2556_v28  ;;  %vm2143_vm3 = vcmp.gt.f32.partialorder %v2111_v21, 0.0  ;;  %4006 = vpow2.f32 %v2497_v32  ;;  %v2562_v15 = vsel %vm1900_vm1, %v5256_v22, 0.0  ;;  %v3573_v14 = vadd.f32 -1.0, %v2300_v58 }
 0x3ff   : > { %v2175_v37 = vsel %vm2143_vm3, %v2111_v21, 1.0  ;;  %vm2144_vm4 = vcmp.gt.f32.partialorder %v2112_v8, 0.0  ;;  %v5258_v10 = vpop.xlane.xlu0 %1950  ;;  %v2395_v0 = vadd.f32 %v3572_v17, %v2363_v63  ;;  %v2364_v53 = vmul.f32 %v3995_v27, %v5027_v62  ;;  %v2425_v21 = vld [vmem:[#allocation2 + $0x60] sm:$0xff]  ;;  %v3946_v17 = vld [vmem:[%s4306_s22 + $0x10] sm:$0xff]   ;;  %v2428_v63 = vld [vmem:[#allocation2 + $0x78] sm:$0xff] }
 0x400   : > { %4008 = vrcp.f32 %v2175_v37  ;;  %v2176_v24 = vsel %vm2144_vm4, %v2112_v8, 1.0  ;;  %v5261_v26 = vpop.xlane.xlu1 %1953  ;;  %v2426_v37 = vld [vmem:[#allocation2 + $0x68] sm:$0xff]  ;;  %3817 = vmatprep.subr.bf16.mxu0 %v3946_v17 }
 0x401   : > { %4010 = vpow2.f32 %v2495_v60  ;;  %v2459_v41 = vadd.f32 %v2427_v44, %v2395_v0  ;;  %v2396_v6 = vadd.f32 %v3573_v14, %v2364_v53  ;;  %3818 = vmatpush3.bf16.msra.mxu0 %v3946_v17 }
 0x402   : > { %v4001_v29 = vpop.eup %4000  ;;  %2563 = vadd.xlane.f32.xlu1 %v2562_v15  ;;  %4012 = vrcp.f32 %v2176_v24  ;;  %v3947_v15 = vld [vmem:[%s4306_s22 + $0x18] sm:$0xff]  }
 0x403   : > { %v4003_v45 = vpop.eup %4002  ;;  %v2297_v30 = vmul.f32 %v4001_v29, %v2265_v42  ;;  %v2047_v46 = vpop.xlane.xlu0 %2046  ;;  %4014 = vpow2.f32 %v2499_v50  ;;  %v2361_v18 = vmul.f32 %v4001_v29, %v5023_v61  ;;  %v2505_v14 = vmul.f32 1.442695, %v2459_v41  ;;  %3819 = vmatprep.subr.bf16.mxu0 %v3947_v15 }
 0x404   : > { %v2298_v13 = vmul.f32 %v4003_v45, %v2266_v35  ;;  %v2109_v43 = vsub.f32 %v2047_v46, %v5258_v10  ;;  %v2050_v4 = vpop.xlane.xlu1 %2049  ;;  %v2362_v62 = vmul.f32 %v4003_v45, %v5029_v47  ;;  %v2271_v47 = vsub.f32 0.0, %v5238_v2 }
 0x405   : > { %v3570_v1 = vadd.f32 -1.0, %v2297_v30  ;;  %v2110_v32 = vsub.f32 %v2050_v4, %v5261_v26  ;;  %v2460_v30 = vadd.f32 %v2428_v63, %v2396_v6  ;;  %3820 = vmatpush3.bf16.msra.mxu0 %v3947_v15 }
 0x406   : > { %v3571_v48 = vadd.f32 -1.0, %v2298_v13  ;;  %vm2141_vm5 = vcmp.gt.f32.partialorder %v2109_v43, 0.0 }
 0x407   : > { %v5272_v52 = vpop.eup %4004  ;;  %v2173_v27 = vsel %vm2141_vm5, %v2109_v43, 1.0  ;;  %vm2142_vm6 = vcmp.gt.f32.partialorder %v2110_v32, 0.0  ;;  %v5275_v28 = vpop.xlane.xlu0 %1968  ;;  %v2393_v8 = vadd.f32 %v3570_v1, %v2361_v18  ;;  %v2272_v18 = vsub.f32 0.0, %v5240_v49 }
 0x408   : > { %4016 = vrcp.f32 %v2173_v27  ;;  %v2174_v61 = vsel %vm2142_vm6, %v2110_v32, 1.0  ;;  %v5278_v58 = vpop.xlane.xlu1 %1971  ;;  %v2565_v60 = vsel %vm1900_vm1, %v5272_v52, 0.0  ;;  %v5282_v24 = vpop.eup %4006  ;;  %v2394_v42 = vadd.f32 %v3571_v48, %v2362_v62 }
 0x409   : > { %4018 = vrcp.f32 %v2174_v61  ;;  %2566 = vadd.xlane.f32.xlu0 %v2565_v60  ;;  %v2457_v50 = vadd.f32 %v2425_v21, %v2393_v8  ;;  %v2571_v53 = vsel %vm1900_vm1, %v5282_v24, 0.0  ;;  %v2507_v6 = vmul.f32 1.442695, %v2460_v30  ;;  %v2429_v30 = vld [vmem:[#allocation2 + $0x80] sm:$0xff] }
 0x40a   : > { %v4009_v29 = vpop.eup %4008  ;;  %v2458_v45 = vadd.f32 %v2426_v37, %v2394_v42  ;;  %v2269_v49 = vsub.f32 0.0, %v5258_v10  ;;  %v2270_v37 = vsub.f32 0.0, %v5261_v26  ;;  %v2431_v42 = vld [vmem:[#allocation2 + $0x90] sm:$0xff] }
 0x40b   : > { %v2303_v35 = vmul.f32 %v4009_v29, %v2271_v47  ;;  %v2065_v0 = vpop.xlane.xlu0 %2064  ;;  %v2501_v5 = vmul.f32 1.442695, %v2457_v50  ;;  %v5286_v46 = vpop.eup %4010  ;;  %v2367_v62 = vmul.f32 %v4009_v29, %v5035_v3 }
 0x40c   : > { %v2115_v44 = vsub.f32 %v2065_v0, %v5275_v28  ;;  %v2068_v2 = vpop.xlane.xlu1 %2067  ;;  %v4013_v13 = vpop.eup %4012  ;;  %v2568_v43 = vsel %vm1900_vm1, %v5286_v46, 0.0  ;;  %v2503_v48 = vmul.f32 1.442695, %v2458_v45 }
 0x40d   : > { %v2116_v4 = vsub.f32 %v2068_v2, %v5278_v58  ;;  %2572 = vadd.xlane.f32.xlu0 %v2571_v53  ;;  %4020 = vpow2.f32 %v2501_v5  ;;  %v5294_v1 = vpop.eup %4014  ;;  %v3576_v32 = vadd.f32 -1.0, %v2303_v35  ;;  %2569 = vadd.xlane.f32.xlu1 %v2568_v43  ;;  %v2304_v27 = vmul.f32 %v4013_v13, %v2272_v18 }
 0x40e   : > { %vm2147_vm7 = vcmp.gt.f32.partialorder %v2115_v44, 0.0  ;;  %4022 = vpow2.f32 %v2505_v14  ;;  %v2574_v61 = vsel %vm1900_vm1, %v5294_v1, 0.0  ;;  %v2368_v26 = vmul.f32 %v4013_v13, %v5043_v19  ;;  %v2430_v13 = vld [vmem:[#allocation2 + $0x88] sm:$0xff] }
 0x40f   : > { %v2179_v21 = vsel %vm2147_vm7, %v2115_v44, 1.0  ;;  %vm2148_vm8 = vcmp.gt.f32.partialorder %v2116_v4, 0.0  ;;  %v5297_v41 = vpop.xlane.xlu0 %1962  ;;  %v2399_v63 = vadd.f32 %v3576_v32, %v2367_v62  ;;  %v3577_v15 = vadd.f32 -1.0, %v2304_v27  ;;  %v2432_v27 = vld [vmem:[#allocation2 + $0x98] sm:$0xff] }
 0x410   : > { %4024 = vrcp.f32 %v2179_v21  ;;  %v2180_v8 = vsel %vm2148_vm8, %v2116_v4, 1.0  ;;  %v5300_v17 = vpop.xlane.xlu1 %1965 }
 0x411   : > { %4026 = vrcp.f32 %v2180_v8  ;;  %2575 = vadd.xlane.f32.xlu1 %v2574_v61  ;;  %v2463_v44 = vadd.f32 %v2431_v42, %v2399_v63 }
 0x412   : > { %v4017_v60 = vpop.eup %4016  ;;  %4028 = vpow2.f32 %v2503_v48  ;;  %v2400_v48 = vadd.f32 %v3577_v15, %v2368_v26 }
 0x413   : > { %v4019_v47 = vpop.eup %4018  ;;  %v2301_v50 = vmul.f32 %v4017_v60, %v2269_v49  ;;  %v2059_v3 = vpop.xlane.xlu0 %2058  ;;  %4030 = vpow2.f32 %v2507_v6  ;;  %v2365_v0 = vmul.f32 %v4017_v60, %v5039_v7  ;;  %v2275_v6 = vsub.f32 0.0, %v5275_v28 }
 0x414   : > { %v2302_v29 = vmul.f32 %v4019_v47, %v2270_v37  ;;  %v2113_v14 = vsub.f32 %v2059_v3, %v5297_v41  ;;  %v2062_v35 = vpop.xlane.xlu1 %2061  ;;  %v2366_v53 = vmul.f32 %v4019_v47, %v5045_v20  ;;  %v2513_v47 = vmul.f32 1.442695, %v2463_v44 }
 0x415   : > { %v3574_v10 = vadd.f32 -1.0, %v2301_v50  ;;  %v2114_v5 = vsub.f32 %v2062_v35, %v5300_v17  ;;  %v2276_v3 = vsub.f32 0.0, %v5278_v58 }
 0x416   : > { %v3575_v45 = vadd.f32 -1.0, %v2302_v29  ;;  %vm2145_vm9 = vcmp.gt.f32.partialorder %v2113_v14, 0.0  ;;  %v2464_v29 = vadd.f32 %v2432_v27, %v2400_v48  ;;  %v2274_v48 = vsub.f32 0.0, %v5300_v17  ;;  %v2435_v27 = vld [vmem:[#allocation2 + $0xb0] sm:$0xff] }
 0x417   : > { %v5310_v2 = vpop.eup %4020  ;;  %v2177_v43 = vsel %vm2145_vm9, %v2113_v14, 1.0  ;;  %vm2146_vm10 = vcmp.gt.f32.partialorder %v2114_v5, 0.0  ;;  %v5313_v4 = vpop.xlane.xlu0 %1980  ;;  %v2397_v18 = vadd.f32 %v3574_v10, %v2365_v0 }
 0x418   : > { %4032 = vrcp.f32 %v2177_v43  ;;  %v2178_v32 = vsel %vm2146_vm10, %v2114_v5, 1.0  ;;  %v5315_v7 = vpop.xlane.xlu1 %1983  ;;  %v2577_v19 = vsel %vm1900_vm1, %v5310_v2, 0.0  ;;  %v5319_v21 = vpop.eup %4022  ;;  %v2398_v62 = vadd.f32 %v3575_v45, %v2366_v53 }
 0x419   : > { %4034 = vrcp.f32 %v2178_v32  ;;  %2578 = vadd.xlane.f32.xlu0 %v2577_v19  ;;  %v2461_v20 = vadd.f32 %v2429_v30, %v2397_v18  ;;  %v2583_v28 = vsel %vm1900_vm1, %v5319_v21, 0.0  ;;  %v2515_v43 = vmul.f32 1.442695, %v2464_v29 }
 0x41a   : > { %v4025_v8 = vpop.eup %4024  ;;  %v2462_v63 = vadd.f32 %v2430_v13, %v2398_v62  ;;  %v2273_v18 = vsub.f32 0.0, %v5297_v41 }
 0x41b   : > { %v4027_v49 = vpop.eup %4026  ;;  %v2307_v61 = vmul.f32 %v4025_v8, %v2275_v6  ;;  %v2077_v60 = vpop.xlane.xlu0 %2076  ;;  %v2509_v37 = vmul.f32 1.442695, %v2461_v20  ;;  %v2371_v30 = vmul.f32 %v4025_v8, %v5051_v59 }
 0x41c   : > { %v5322_v50 = vpop.eup %4028  ;;  %v2119_v42 = vsub.f32 %v2077_v60, %v5313_v4  ;;  %v2080_v15 = vpop.xlane.xlu1 %2079  ;;  %v2308_v5 = vmul.f32 %v4027_v49, %v2276_v3  ;;  %v2511_v58 = vmul.f32 1.442695, %v2462_v63  ;;  %v2372_v8 = vmul.f32 %v4027_v49, %v5059_v55  ;;  %v2433_v3 = vld [vmem:[#allocation2 + $0xa0] sm:$0xff] }
 0x41d   : > { %v2580_v14 = vsel %vm1900_vm1, %v5322_v50, 0.0  ;;  %v2120_v35 = vsub.f32 %v2080_v15, %v5315_v7  ;;  %2584 = vadd.xlane.f32.xlu0 %v2583_v28  ;;  %4036 = vpow2.f32 %v2509_v37  ;;  %v5331_v10 = vpop.eup %4030  ;;  %v3580_v0 = vadd.f32 -1.0, %v2307_v61 }
 0x41e   : > { %2581 = vadd.xlane.f32.xlu1 %v2580_v14  ;;  %vm2151_vm11 = vcmp.gt.f32.partialorder %v2119_v42, 0.0  ;;  %4038 = vpow2.f32 %v2513_v47  ;;  %v2586_v32 = vsel %vm1900_vm1, %v5331_v10, 0.0  ;;  %v3581_v13 = vadd.f32 -1.0, %v2308_v5 }
 0x41f   : > { %v2183_v26 = vsel %vm2151_vm11, %v2119_v42, 1.0  ;;  %vm2152_vm12 = vcmp.gt.f32.partialorder %v2120_v35, 0.0  ;;  %v5333_v45 = vpop.xlane.xlu0 %1974  ;;  %v2403_v6 = vadd.f32 %v3580_v0, %v2371_v30  ;;  %v2279_v30 = vsub.f32 0.0, %v5313_v4 }
 0x420   : > { %4040 = vrcp.f32 %v2183_v26  ;;  %v2184_v44 = vsel %vm2152_vm12, %v2120_v35, 1.0  ;;  %v5336_v53 = vpop.xlane.xlu1 %1977  ;;  %v2404_v15 = vadd.f32 %v3581_v13, %v2372_v8  ;;  %v2436_v35 = vld [vmem:[#allocation2 + $0xb8] sm:$0xff] }
 0x421   : > { %4042 = vrcp.f32 %v2184_v44  ;;  %v2467_v42 = vadd.f32 %v2435_v27, %v2403_v6 }
 0x422   : > { %v4033_v19 = vpop.eup %4032  ;;  %2587 = vadd.xlane.f32.xlu1 %v2586_v32  ;;  %4044 = vpow2.f32 %v2511_v58  ;;  %v2434_v58 = vld [vmem:[#allocation2 + $0xa8] sm:$0xff]  ;;  %v2468_v32 = vadd.f32 %v2436_v35, %v2404_v15 }
 0x423   : > { %v4035_v20 = vpop.eup %4034  ;;  %v2305_v59 = vmul.f32 %v4033_v19, %v2273_v18  ;;  %v2071_v62 = vpop.xlane.xlu0 %2070  ;;  %4046 = vpow2.f32 %v2515_v43  ;;  %v2369_v63 = vmul.f32 %v4033_v19, %v5055_v56  ;;  %v2280_v18 = vsub.f32 0.0, %v5315_v7 }
 0x424   : > { %v2306_v61 = vmul.f32 %v4035_v20, %v2274_v48  ;;  %v2117_v41 = vsub.f32 %v2071_v62, %v5333_v45  ;;  %v2074_v60 = vpop.xlane.xlu1 %2073  ;;  %v2370_v29 = vmul.f32 %v4035_v20, %v5061_v9 }
 0x425   : > { %v3578_v37 = vadd.f32 -1.0, %v2305_v59  ;;  %v2118_v47 = vsub.f32 %v2074_v60, %v5336_v53  ;;  %v2521_v59 = vmul.f32 1.442695, %v2467_v42 }
 0x426   : > { %v3579_v17 = vadd.f32 -1.0, %v2306_v61  ;;  %vm2149_vm13 = vcmp.gt.f32.partialorder %v2117_v41, 0.0 }
 0x427   : > { %v5346_v28 = vpop.eup %4036  ;;  %v2181_v55 = vsel %vm2149_vm13, %v2117_v41, 1.0  ;;  %vm2150_vm14 = vcmp.gt.f32.partialorder %v2118_v47, 0.0  ;;  %v5349_v49 = vpop.xlane.xlu0 %1992  ;;  %v2401_v14 = vadd.f32 %v3578_v37, %v2369_v63  ;;  %v2523_v37 = vmul.f32 1.442695, %v2468_v32 }
 0x428   : > { %4048 = vrcp.f32 %v2181_v55  ;;  %v2182_v0 = vsel %vm2150_vm14, %v2118_v47, 1.0  ;;  %v5351_v56 = vpop.xlane.xlu1 %1995  ;;  %v2589_v5 = vsel %vm1900_vm1, %v5346_v28, 0.0  ;;  %v5355_v26 = vpop.eup %4038  ;;  %v2402_v44 = vadd.f32 %v3579_v17, %v2370_v29 }
 0x429   : > { %4050 = vrcp.f32 %v2182_v0  ;;  %2590 = vadd.xlane.f32.xlu0 %v2589_v5  ;;  %v2465_v9 = vadd.f32 %v2433_v3, %v2401_v14  ;;  %v2595_v4 = vsel %vm1900_vm1, %v5355_v26, 0.0  ;;  %v2277_v29 = vsub.f32 0.0, %v5333_v45 }
 0x42a   : > { %v4041_v43 = vpop.eup %4040  ;;  %v2466_v20 = vadd.f32 %v2434_v58, %v2402_v44  ;;  %v2278_v0 = vsub.f32 0.0, %v5336_v53 }
 0x42b   : > { %v4043_v19 = vpop.eup %4042  ;;  %v2311_v13 = vmul.f32 %v4041_v43, %v2279_v30  ;;  %v5359_v48 = vpop.xlane.xlu0 %1986  ;;  %v2517_v6 = vmul.f32 1.442695, %v2465_v9  ;;  %v2375_v17 = vmul.f32 %v4041_v43, %v5067_v36 }
 0x42c   : > { %v5361_v62 = vpop.eup %4044  ;;  %v2312_v27 = vmul.f32 %v4043_v19, %v2280_v18  ;;  %v5363_v8 = vpop.xlane.xlu1 %1989  ;;  %v2519_v60 = vmul.f32 1.442695, %v2466_v20  ;;  %v2376_v15 = vmul.f32 %v4043_v19, %v5075_v54  ;;  %v2439_v54 = vld [vmem:[#allocation2 + $0xd0] sm:$0xff]  ;;  %v2440_v19 = vld [vmem:[#allocation2 + $0xd8] sm:$0xff] }
 0x42d   : > { %v2592_v61 = vsel %vm1900_vm1, %v5361_v62, 0.0  ;;  %2596 = vadd.xlane.f32.xlu0 %v2595_v4  ;;  %4052 = vpow2.f32 %v2517_v6  ;;  %v5369_v7 = vpop.eup %4046  ;;  %v3584_v41 = vadd.f32 -1.0, %v2311_v13 }
 0x42e   : > { %2593 = vadd.xlane.f32.xlu1 %v2592_v61  ;;  %v3585_v63 = vadd.f32 -1.0, %v2312_v27  ;;  %4054 = vpow2.f32 %v2521_v59  ;;  %v2598_v55 = vsel %vm1900_vm1, %v5369_v7, 0.0  ;;  %v2437_v27 = vld [vmem:[#allocation2 + $0xc0] sm:$0xff] }
 0x42f   : > { %v2083_v47 = vpop.xlane.xlu0 %2082  ;;  %4056 = vpow2.f32 %v2519_v60  ;;  %v2407_v36 = vadd.f32 %v3584_v41, %v2375_v17  ;;  %v2438_v41 = vld [vmem:[#allocation2 + $0xc8] sm:$0xff] }
 0x430   : > { %v2121_v3 = vsub.f32 %v2083_v47, %v5359_v48  ;;  %v2086_v42 = vpop.xlane.xlu1 %2085  ;;  %4058 = vpow2.f32 %v2523_v37  ;;  %v2408_v44 = vadd.f32 %v3585_v63, %v2376_v15 }
 0x431   : > { %v2122_v14 = vsub.f32 %v2086_v42, %v5363_v8  ;;  %v2471_v4 = vadd.f32 %v2439_v54, %v2407_v36 }
 0x432   : > { %v4049_v35 = vpop.eup %4048  ;;  %2599 = vadd.xlane.f32.xlu1 %v2598_v55  ;;  %vm2153_vm15 = vcmp.gt.f32.partialorder %v2121_v3, 0.0  ;;  %v2472_v60 = vadd.f32 %v2440_v19, %v2408_v44 }
 0x433   : > { %v4051_v5 = vpop.eup %4050  ;;  %v2309_v58 = vmul.f32 %v4049_v35, %v2277_v29  ;;  %v2185_v30 = vsel %vm2153_vm15, %v2121_v3, 1.0  ;;  %vm2154_vm0 = vcmp.gt.f32.partialorder %v2122_v14, 0.0  ;;  %v2089_v9 = vpop.xlane.xlu0 %2088  ;;  %v2373_v45 = vmul.f32 %v4049_v35, %v5071_v11 }
 0x434   : > { %v2310_v43 = vmul.f32 %v4051_v5, %v2278_v0  ;;  %4060 = vrcp.f32 %v2185_v30  ;;  %v2186_v18 = vsel %vm2154_vm0, %v2122_v14, 1.0  ;;  %v2092_v32 = vpop.xlane.xlu1 %2091  ;;  %v2123_v53 = vsub.f32 %v2089_v9, %v5349_v49 }
 0x435   : > { %v3582_v13 = vadd.f32 -1.0, %v2309_v58  ;;  %4062 = vrcp.f32 %v2186_v18  ;;  %v2124_v6 = vsub.f32 %v2092_v32, %v5351_v56  ;;  %v2374_v59 = vmul.f32 %v4051_v5, %v5077_v57 }
 0x436   : > { %v3583_v20 = vadd.f32 -1.0, %v2310_v43  ;;  %vm2155_vm2 = vcmp.gt.f32.partialorder %v2123_v53, 0.0  ;;  %v2529_v14 = vmul.f32 1.442695, %v2471_v4  ;;  %v2531_v5 = vmul.f32 1.442695, %v2472_v60 }
 0x437   : > { %v5383_v61 = vpop.eup %4052  ;;  %vm2156_vm3 = vcmp.gt.f32.partialorder %v2124_v6, 0.0  ;;  %v2405_v11 = vadd.f32 %v3582_v13, %v2373_v45  ;;  %v2187_v37 = vsel %vm2155_vm2, %v2123_v53, 1.0  ;;  %v2281_v58 = vsub.f32 0.0, %v5359_v48  ;;  %v2441_v53 = vld [vmem:[#allocation2 + $0xe0] sm:$0xff] }
 0x438   : > { %v2188_v63 = vsel %vm2156_vm3, %v2124_v6, 1.0  ;;  %v2601_v47 = vsel %vm1900_vm1, %v5383_v61, 0.0  ;;  %v2406_v17 = vadd.f32 %v3583_v20, %v2374_v59  ;;  %v5387_v3 = vpop.eup %4054  ;;  %4064 = vrcp.f32 %v2187_v37  ;;  %v2442_v59 = vld [vmem:[#allocation2 + $0xe8] sm:$0xff] }
 0x439   : > { %2602 = vadd.xlane.f32.xlu0 %v2601_v47  ;;  %v2469_v57 = vadd.f32 %v2437_v27, %v2405_v11  ;;  %v5389_v42 = vpop.eup %4056  ;;  %4066 = vrcp.f32 %v2188_v63  ;;  %v2607_v0 = vsel %vm1900_vm1, %v5387_v3, 0.0  ;;  %v2282_v9 = vsub.f32 0.0, %v5363_v8 }
 0x43a   : > { %v2470_v15 = vadd.f32 %v2438_v41, %v2406_v17  ;;  %v2604_v29 = vsel %vm1900_vm1, %v5389_v42, 0.0  ;;  %v5393_v35 = vpop.eup %4058  ;;  %v2283_v48 = vsub.f32 0.0, %v5349_v49  ;;  %v2284_v6 = vsub.f32 0.0, %v5351_v56 }
 0x43b   : > { %v2525_v55 = vmul.f32 1.442695, %v2469_v57  ;;  %2605 = vadd.xlane.f32.xlu1 %v2604_v29  ;;  %v2610_v45 = vsel %vm1900_vm1, %v5393_v35, 0.0  ;;  %v2443_v57 = vld [vmem:[#allocation2 + $0xf0] sm:$0xff] }
 0x43c   : > { %v2527_v36 = vmul.f32 1.442695, %v2470_v15 }
 0x43d   : > { %2608 = vadd.xlane.f32.xlu0 %v2607_v0  ;;  %4068 = vpow2.f32 %v2525_v55 }
 0x43e   : > { %v4061_v30 = vpop.eup %4060  ;;  %4070 = vpow2.f32 %v2527_v36 }
 0x43f   : > { %v4063_v54 = vpop.eup %4062  ;;  %v2313_v44 = vmul.f32 %v4061_v30, %v2281_v58  ;;  %4072 = vpow2.f32 %v2529_v14  ;;  %2611 = vadd.xlane.f32.xlu1 %v2610_v45  ;;  %v2377_v32 = vmul.f32 %v4061_v30, %v5087_v23  ;;  %v2444_v14 = vld [vmem:[#allocation2 + $0xf8] sm:$0xff] }
 0x440   : > { %v2314_v43 = vmul.f32 %v4063_v54, %v2282_v9  ;;  %4074 = vpow2.f32 %v2531_v5  ;;  %v2378_v13 = vmul.f32 %v4063_v54, %v5093_v39 }
 0x441   : > { %v3586_v18 = vadd.f32 -1.0, %v2313_v44 }
 0x442   : > { %v3587_v19 = vadd.f32 -1.0, %v2314_v43  ;;  %v4065_v8 = vpop.eup %4064 }
 0x443   : > { %v2409_v20 = vadd.f32 %v3586_v18, %v2377_v32  ;;  %v4067_v27 = vpop.eup %4066  ;;  %v2315_v4 = vmul.f32 %v4065_v8, %v2283_v48  ;;  %v2379_v63 = vmul.f32 %v4065_v8, %v5083_v38 }
 0x444   : > { %v2410_v11 = vadd.f32 %v3587_v19, %v2378_v13  ;;  %v2316_v41 = vmul.f32 %v4067_v27, %v2284_v6  ;;  %v2380_v39 = vmul.f32 %v4067_v27, %v5091_v51  ;;  %v3949_v27 = vld [vmem:[%s5631_s10 + $0x8] sm:$0xff]  }
 0x445   : > { %v2473_v60 = vadd.f32 %v2441_v53, %v2409_v20  ;;  %v3588_v37 = vadd.f32 -1.0, %v2315_v4 }
 0x446   : > { %v2474_v23 = vadd.f32 %v2442_v59, %v2410_v11  ;;  %v3589_v49 = vadd.f32 -1.0, %v2316_v41  ;;  %v3948_v59 = vld [vmem:[%s5631_s10] sm:$0xff]   ;;  %v3950_v11 = vld [vmem:[%s5631_s10 + $0x10] sm:$0xff]  }
 0x447   : > { %v5406_v47 = vpop.eup %4068  ;;  %v2533_v17 = vmul.f32 1.442695, %v2473_v60  ;;  %v2411_v55 = vadd.f32 %v3588_v37, %v2379_v63  ;;  %3853 = vmatprep.subr.bf16.mxu1 %v3948_v59  ;;  %v3951_v60 = vld [vmem:[%s5631_s10 + $0x18] sm:$0xff]  }
 0x448   : > { %v5409_v15 = vpop.eup %4070  ;;  %v2613_v56 = vsel %vm1900_vm1, %v5406_v47, 0.0  ;;  %v2535_v29 = vmul.f32 1.442695, %v2474_v23  ;;  %v2412_v36 = vadd.f32 %v3589_v49, %v2380_v39  ;;  %3854 = vmatpush3.bf16.msra.mxu1 %v3948_v59  ;;  %v3952_v39 = vld [vmem:[%s5631_s10 + $0x20] sm:$0xff]  }
 0x449   : > { %v5413_v0 = vpop.eup %4072  ;;  %2614 = vadd.xlane.f32.xlu0 %v2613_v56  ;;  %v2616_v38 = vsel %vm1900_vm1, %v5409_v15, 0.0  ;;  %4076 = vpow2.f32 %v2533_v17  ;;  %v2475_v51 = vadd.f32 %v2443_v57, %v2411_v55  ;;  %3855 = vmatprep.subr.bf16.mxu1 %v3949_v27 }
 0x44a   : > { %v5417_v5 = vpop.eup %4074  ;;  %2617 = vadd.xlane.f32.xlu1 %v2616_v38  ;;  %4078 = vpow2.f32 %v2535_v29  ;;  %v2476_v58 = vadd.f32 %v2444_v14, %v2412_v36  ;;  %v2619_v30 = vsel %vm1900_vm1, %v5413_v0, 0.0 }
 0x44b   : > { %v2537_v9 = vmul.f32 1.442695, %v2475_v51  ;;  %v2622_v54 = vsel %vm1900_vm1, %v5417_v5, 0.0 }
 0x44c   : > { %v2539_v44 = vmul.f32 1.442695, %v2476_v58  ;;  %3856 = vmatpush3.bf16.msra.mxu1 %v3949_v27 }
 0x44d   : > { %2620 = vadd.xlane.f32.xlu0 %v2619_v30  ;;  %4080 = vpow2.f32 %v2537_v9  ;;  %3857 = vmatprep.subr.bf16.mxu1 %v3950_v11 }
 0x44e   : > { %2623 = vadd.xlane.f32.xlu1 %v2622_v54  ;;  %4082 = vpow2.f32 %v2539_v44 }
 0x450   : > { %3858 = vmatpush3.bf16.msra.mxu1 %v3950_v11 }
 0x451   : > { %3859 = vmatprep.subr.bf16.mxu1 %v3951_v60 }
 0x453   : > { %v5423_v45 = vpop.eup %4076 }
 0x454   : > { %v5425_v43 = vpop.eup %4078  ;;  %v2625_v18 = vsel %vm1900_vm1, %v5423_v45, 0.0  ;;  %3860 = vmatpush3.bf16.msra.mxu1 %v3951_v60 }
 0x455   : > { %2626 = vadd.xlane.f32.xlu0 %v2625_v18  ;;  %v2628_v32 = vsel %vm1900_vm1, %v5425_v43, 0.0  ;;  %3861 = vmatprep.subr.bf16.mxu1 %v3952_v39 }
 0x456   : > { %2629 = vadd.xlane.f32.xlu1 %v2628_v32 }
 0x457   : > { %v5431_v48 = vpop.eup %4080 }
 0x458   : > { %v5433_v19 = vpop.eup %4082  ;;  %v2631_v13 = vsel %vm1900_vm1, %v5431_v48, 0.0  ;;  %3862 = vmatpush3.bf16.msra.mxu1 %v3952_v39 }
 0x459   : > { %2632 = vadd.xlane.f32.xlu0 %v2631_v13  ;;  %v2634_v53 = vsel %vm1900_vm1, %v5433_v19, 0.0 }
 0x45a   : > { %2635 = vadd.xlane.f32.xlu1 %v2634_v53 }
 0x472   : > { %v2543_v8 = vpop.xlane.xlu0 %2542 }
 0x473   : > { %4084 = vrcp.f32 %v2543_v8 }
 0x476   : > { %v2549_v6 = vpop.xlane.xlu0 %2548 }
 0x477   : > { %v2546_v20 = vpop.xlane.xlu1 %2545 }
 0x478   : > { %4086 = vrcp.f32 %v2546_v20 }
 0x479   : > { %4088 = vrcp.f32 %v2549_v6 }
 0x47b   : > { %v2552_v4 = vpop.xlane.xlu1 %2551 }
 0x47c   : > { %4090 = vrcp.f32 %v2552_v4 }
 0x47d   : > { %v4085_v41 = vpop.eup %4084 }
 0x47e   : > { %v2701_v63 = vmul.f32 %v4085_v41, %v5194_v12  ;;  %v3953_v12 = vld [vmem:[%s5631_s10 + $0x28] sm:$0xff]  }
 0x47f   : > { %3863 = vmatprep.subr.bf16.mxu1 %v3953_v12 }
 0x480   : > { %3864 = vmatpush3.bf16.msra.mxu1 %v3953_v12 }
 0x482   : > { %v4087_v37 = vpop.eup %4086 }
 0x483   : > { %v2702_v23 = vmul.f32 %v4087_v37, %v5207_v31  ;;  %v4089_v49 = vpop.eup %4088 }
 0x484   : > { %v2703_v29 = vmul.f32 %v4089_v49, %v5201_v25  ;;  %v3954_v25 = vld [vmem:[%s5631_s10 + $0x30] sm:$0xff]  }
 0x485   : > { %v2733_v17 = vpack.c.bf16 %v2702_v23, %v2701_v63  ;;  %3865 = vmatprep.subr.bf16.mxu1 %v3954_v25 }
 0x486   : > { %v4091_v57 = vpop.eup %4090  ;;  %v2555_v56 = vpop.xlane.xlu0 %2554  ;;  %3866 = vmatpush3.bf16.msra.mxu1 %v3954_v25 }
 0x487   : > { %v2704_v55 = vmul.f32 %v4091_v57, %v5214_v33  ;;  %3821 = vmatprep.mubr.msk.bf16.mxu0 %vm1900_vm1, %v2733_v17  ;;  %4092 = vrcp.f32 %v2555_v56 }
 0x489   : > { %v2734_v31 = vpack.c.bf16 %v2704_v55, %v2703_v29 }
 0x48a   : > { %v2561_v14 = vpop.xlane.xlu0 %2560 }
 0x48b   : > { %v2558_v38 = vpop.xlane.xlu1 %2557  ;;  %4094 = vrcp.f32 %v2561_v14  ;;  %3822 = vmatmul.mubr.msk.bf16.vlgmr.msra.gmra.mrb[32].mxu0 %vm1900_vm1, %v2734_v31 }
 0x48c   : > { %4096 = vrcp.f32 %v2558_v38 }
 0x48f   : > { %v2564_v33 = vpop.xlane.xlu1 %2563 }
 0x490   : > { %4098 = vrcp.f32 %v2564_v33 }
 0x491   : > { %v4093_v36 = vpop.eup %4092 }
 0x492   : > { %v2705_v58 = vmul.f32 %v4093_v36, %v5235_v40 }
 0x495   : > { %v4095_v51 = vpop.eup %4094 }
 0x496   : > { %v4097_v30 = vpop.eup %4096  ;;  %v2567_v9 = vpop.xlane.xlu0 %2566  ;;  %v2707_v18 = vmul.f32 %v4095_v51, %v5244_v16 }
 0x497   : > { %v2706_v54 = vmul.f32 %v4097_v30, %v5247_v34  ;;  %4100 = vrcp.f32 %v2567_v9 }
 0x499   : > { %v2735_v44 = vpack.c.bf16 %v2706_v54, %v2705_v58 }
 0x49a   : > { %v4099_v32 = vpop.eup %4098  ;;  %v2573_v13 = vpop.xlane.xlu0 %2572 }
 0x49b   : > { %3825 = vmatprep.mubr.msk.bf16.mxu0 %vm1900_vm1, %v2735_v44  ;;  %v2570_v53 = vpop.xlane.xlu1 %2569  ;;  %4102 = vrcp.f32 %v2573_v13  ;;  %v2708_v8 = vmul.f32 %v4099_v32, %v5256_v22 }
 0x49c   : > { %4104 = vrcp.f32 %v2570_v53 }
 0x49d   : > { %v2736_v6 = vpack.c.bf16 %v2708_v8, %v2707_v18 }
 0x49f   : > { %3826 = vmatmul.mubr.msk.bf16.gmra.mrb[36].mxu0 %vm1900_vm1, %v2736_v6  ;;  %v2576_v40 = vpop.xlane.xlu1 %2575 }
 0x4a0   : > { %4106 = vrcp.f32 %v2576_v40 }
 0x4a1   : > { %v4101_v20 = vpop.eup %4100 }
 0x4a2   : > { %v2709_v59 = vmul.f32 %v4101_v20, %v5272_v52 }
 0x4a5   : > { %v4103_v34 = vpop.eup %4102 }
 0x4a6   : > { %v4105_v27 = vpop.eup %4104  ;;  %v2579_v16 = vpop.xlane.xlu0 %2578  ;;  %v2711_v41 = vmul.f32 %v4103_v34, %v5282_v24 }
 0x4a7   : > { %v2710_v4 = vmul.f32 %v4105_v27, %v5286_v46  ;;  %4108 = vrcp.f32 %v2579_v16 }
 0x4a9   : > { %v2737_v11 = vpack.c.bf16 %v2710_v4, %v2709_v59 }
 0x4aa   : > { %v4107_v60 = vpop.eup %4106  ;;  %v2585_v22 = vpop.xlane.xlu0 %2584 }
 0x4ab   : > { %3829 = vmatprep.mubr.msk.bf16.mxu0 %vm1900_vm1, %v2737_v11  ;;  %v2582_v37 = vpop.xlane.xlu1 %2581  ;;  %4110 = vrcp.f32 %v2585_v22  ;;  %v2712_v63 = vmul.f32 %v4107_v60, %v5294_v1 }
 0x4ac   : > { %4112 = vrcp.f32 %v2582_v37 }
 0x4ad   : > { %v2738_v23 = vpack.c.bf16 %v2712_v63, %v2711_v41 }
 0x4af   : > { %3830 = vmatmul.mubr.msk.bf16.gmra.mrb[40].mxu0 %vm1900_vm1, %v2738_v23  ;;  %v2588_v52 = vpop.xlane.xlu1 %2587 }
 0x4b0   : > { %4114 = vrcp.f32 %v2588_v52 }
 0x4b1   : > { %v4109_v49 = vpop.eup %4108 }
 0x4b2   : > { %v2713_v39 = vmul.f32 %v4109_v49, %v5310_v2 }
 0x4b5   : > { %v4111_v46 = vpop.eup %4110 }
 0x4b6   : > { %v4113_v17 = vpop.eup %4112  ;;  %v2591_v24 = vpop.xlane.xlu0 %2590  ;;  %v2715_v29 = vmul.f32 %v4111_v46, %v5319_v21 }
 0x4b7   : > { %v2714_v57 = vmul.f32 %v4113_v17, %v5322_v50  ;;  %4116 = vrcp.f32 %v2591_v24 }
 0x4b9   : > { %v2739_v56 = vpack.c.bf16 %v2714_v57, %v2713_v39 }
 0x4ba   : > { %v4115_v55 = vpop.eup %4114  ;;  %v2597_v1 = vpop.xlane.xlu0 %2596 }
 0x4bb   : > { %3833 = vmatprep.mubr.msk.bf16.mxu0 %vm1900_vm1, %v2739_v56  ;;  %v2594_v12 = vpop.xlane.xlu1 %2593  ;;  %4118 = vrcp.f32 %v2597_v1  ;;  %v2716_v31 = vmul.f32 %v4115_v55, %v5331_v10 }
 0x4bc   : > { %4120 = vrcp.f32 %v2594_v12 }
 0x4bd   : > { %v2740_v14 = vpack.c.bf16 %v2716_v31, %v2715_v29 }
 0x4bf   : > { %3834 = vmatmul.mubr.msk.bf16.gmra.mrb[44].mxu0 %vm1900_vm1, %v2740_v14  ;;  %v2600_v2 = vpop.xlane.xlu1 %2599 }
 0x4c0   : > { %4122 = vrcp.f32 %v2600_v2 }
 0x4c1   : > { %v4117_v38 = vpop.eup %4116 }
 0x4c2   : > { %v2717_v25 = vmul.f32 %v4117_v38, %v5346_v28 }
 0x4c5   : > { %v4119_v50 = vpop.eup %4118 }
 0x4c6   : > { %v4121_v33 = vpop.eup %4120  ;;  %v2603_v21 = vpop.xlane.xlu0 %2602  ;;  %v2719_v30 = vmul.f32 %v4119_v50, %v5355_v26 }
 0x4c7   : > { %4124 = vrcp.f32 %v2603_v21  ;;  %v2718_v36 = vmul.f32 %v4121_v33, %v5361_v62 }
 0x4c8   : > { %v2606_v58 = vpop.xlane.xlu1 %2605 }
 0x4c9   : > { %v2741_v51 = vpack.c.bf16 %v2718_v36, %v2717_v25  ;;  %4126 = vrcp.f32 %v2606_v58 }
 0x4ca   : > { %v4123_v10 = vpop.eup %4122  ;;  %v2609_v9 = vpop.xlane.xlu0 %2608 }
 0x4cb   : > { %3837 = vmatprep.mubr.msk.bf16.mxu0 %vm1900_vm1, %v2741_v51  ;;  %4128 = vrcp.f32 %v2609_v9  ;;  %v2720_v54 = vmul.f32 %v4123_v10, %v5369_v7 }
 0x4cc   : > { %v2612_v18 = vpop.xlane.xlu1 %2611 }
 0x4cd   : > { %v2742_v44 = vpack.c.bf16 %v2720_v54, %v2719_v30  ;;  %4130 = vrcp.f32 %v2612_v18 }
 0x4cf   : > { %3838 = vmatmul.mubr.msk.bf16.gmra.mrb[48].mxu0 %vm1900_vm1, %v2742_v44 }
 0x4d1   : > { %v4125_v28 = vpop.eup %4124 }
 0x4d2   : > { %v2721_v62 = vmul.f32 %v4125_v28, %v5383_v61 }
 0x4d3   : > { %v4127_v32 = vpop.eup %4126 }
 0x4d4   : > { %v2722_v26 = vmul.f32 %v4127_v32, %v5389_v42 }
 0x4d5   : > { %v4129_v13 = vpop.eup %4128 }
 0x4d6   : > { %v2615_v53 = vpop.xlane.xlu0 %2614  ;;  %v2743_v8 = vpack.c.bf16 %v2722_v26, %v2721_v62  ;;  %v2723_v40 = vmul.f32 %v4129_v13, %v5387_v3  ;;  %v3955_v3 = vld [vmem:[%s5631_s10 + $0x38] sm:$0xff]  }
 0x4d7   : > { %4132 = vrcp.f32 %v2615_v53  ;;  %v2618_v6 = vpop.xlane.xlu1 %2617  ;;  %v4131_v20 = vpop.eup %4130  ;;  %3867 = vmatprep.subr.bf16.mxu1 %v3955_v3 }
 0x4d8   : > { %4134 = vrcp.f32 %v2618_v6  ;;  %3841 = vmatprep.mubr.msk.bf16.mxu0 %vm1900_vm1, %v2743_v8  ;;  %v2724_v7 = vmul.f32 %v4131_v20, %v5393_v35  ;;  %3868 = vmatpush3.bf16.msra.mxu1 %v3955_v3 }
 0x4da   : > { %v2621_v34 = vpop.xlane.xlu0 %2620  ;;  %v2744_v59 = vpack.c.bf16 %v2724_v7, %v2723_v40 }
 0x4db   : > { %4136 = vrcp.f32 %v2621_v34  ;;  %v2624_v61 = vpop.xlane.xlu1 %2623 }
 0x4dc   : > { %4138 = vrcp.f32 %v2624_v61  ;;  %3842 = vmatmul.mubr.msk.bf16.gmra.mrb[52].mxu0 %vm1900_vm1, %v2744_v59 }
 0x4e1   : > { %v4133_v42 = vpop.eup %4132 }
 0x4e2   : > { %v4135_v27 = vpop.eup %4134  ;;  %v2627_v16 = vpop.xlane.xlu0 %2626  ;;  %v2725_v4 = vmul.f32 %v4133_v42, %v5406_v47 }
 0x4e3   : > { %4140 = vrcp.f32 %v2627_v16  ;;  %v2630_v11 = vpop.xlane.xlu1 %2629  ;;  %v2726_v35 = vmul.f32 %v4135_v27, %v5409_v15 }
 0x4e4   : > { %4142 = vrcp.f32 %v2630_v11 }
 0x4e5   : > { %v4137_v41 = vpop.eup %4136  ;;  %v2745_v60 = vpack.c.bf16 %v2726_v35, %v2725_v4 }
 0x4e6   : > { %v4139_v22 = vpop.eup %4138  ;;  %v2727_v37 = vmul.f32 %v4137_v41, %v5413_v0  ;;  %v2633_v63 = vpop.xlane.xlu0 %2632 }
 0x4e7   : > { %3845 = vmatprep.mubr.msk.bf16.mxu0 %vm1900_vm1, %v2745_v60  ;;  %v2728_v47 = vmul.f32 %v4139_v22, %v5417_v5  ;;  %4144 = vrcp.f32 %v2633_v63  ;;  %v2636_v23 = vpop.xlane.xlu1 %2635  ;;  %v5514_v22 = vld [vmem:[%s5632_s11] ss:$0 sm:$0xff] }
 0x4e8   : > { %4146 = vrcp.f32 %v2636_v23 }
 0x4e9   : > { %v2746_v52 = vpack.c.bf16 %v2728_v47, %v2727_v37 }
 0x4eb   : > { %3846 = vmatmul.mubr.msk.bf16.gmra.mrb[56].mxu0 %vm1900_vm1, %v2746_v52 }
 0x4ed   : > { %v4141_v15 = vpop.eup %4140 }
 0x4ee   : > { %v4143_v49 = vpop.eup %4142  ;;  %v2729_v46 = vmul.f32 %v4141_v15, %v5423_v45  ;;  %v4148_v15 = vld [vmem:[%s4291_s30] sm:$0xff] }
 0x4ef   : > { %v2730_v39 = vmul.f32 %v4143_v49, %v5425_v43 }
 0x4f1   : > { %v2747_v17 = vpack.c.bf16 %v2730_v39, %v2729_v46  ;;  %v4145_v24 = vpop.eup %4144 }
 0x4f2   : > { %v4147_v0 = vpop.eup %4146  ;;  %v2731_v57 = vmul.f32 %v4145_v24, %v5431_v48 }
 0x4f3   : > { %3849 = vmatprep.mubr.msk.bf16.mxu0 %vm1900_vm1, %v2747_v17  ;;  %v2732_v5 = vmul.f32 %v4147_v0, %v5433_v19  ;;  %v4149_v17 = vld [vmem:[%s4291_s30 + $0x8] sm:$0xff]  ;;  %v4150_v0 = vld [vmem:[%s4291_s30 + $0x10] sm:$0xff] }
 0x4f5   : > { %v2748_v56 = vpack.c.bf16 %v2732_v5, %v2731_v57 }
 0x4f7   : > { %3850 = vmatmul.mubr.msk.bf16.gmra.mrb[60].mxu0 %vm1900_vm1, %v2748_v56  ;;  %v4151_v56 = vld [vmem:[%s4291_s30 + $0x18] sm:$0xff] }
 0x55e   : > { %v3823_v29 = vpop.f32.mrb[32].mxu0 }
 0x55f   : > { %v2863_v55 = vpop.f32.mrb[33].mxu0 }
 0x560   : > { %v3824_v1 = vpop.f32.mrb[34].mxu0 }
 0x561   : > { %v2991_v12 = vpack.c.bf16 %v3824_v1, %v3823_v29  ;;  %v2866_v31 = vpop.f32.mrb[35].mxu0 }
 0x562   : > { %v2990_v45 = vpack.c.bf16 %v2866_v31, %v2863_v55 }
 0x564   : > { %3869 = vmatprep.mubr.bf16.mxu1 %v2990_v45 }
 0x565   : > { %3870 = vmatmul.mubr.bf16.vlgmr.msra.gmra.mrb[32].mxu1 %v2991_v12 }
 0x572   : > { %v3827_v43 = vpop.f32.mrb[36].mxu0 }
 0x573   : > { %v2879_v14 = vpop.f32.mrb[37].mxu0 }
 0x574   : > { %v3828_v2 = vpop.f32.mrb[38].mxu0 }
 0x575   : > { %v2993_v38 = vpack.c.bf16 %v3828_v2, %v3827_v43  ;;  %v2882_v50 = vpop.f32.mrb[39].mxu0  ;;  %v4152_v43 = vld [vmem:[%s4291_s30 + $0x20] sm:$0xff] }
 0x576   : > { %v2992_v25 = vpack.c.bf16 %v2882_v50, %v2879_v14  ;;  %v4153_v50 = vld [vmem:[%s4291_s30 + $0x28] sm:$0xff] }
 0x578   : > { %3873 = vmatprep.mubr.bf16.mxu1 %v2992_v25 }
 0x579   : > { %3874 = vmatmul.mubr.bf16.gmra.mrb[36].mxu1 %v2993_v38 }
 0x582   : > { %v3831_v48 = vpop.f32.mrb[40].mxu0 }
 0x583   : > { %v2895_v19 = vpop.f32.mrb[41].mxu0 }
 0x584   : > { %v3832_v33 = vpop.f32.mrb[42].mxu0 }
 0x585   : > { %v2995_v21 = vpack.c.bf16 %v3832_v33, %v3831_v48  ;;  %v2898_v36 = vpop.f32.mrb[43].mxu0  ;;  %v4154_v48 = vld [vmem:[%s4291_s30 + $0x30] sm:$0xff] }
 0x586   : > { %v2994_v51 = vpack.c.bf16 %v2898_v36, %v2895_v19 }
 0x588   : > { %3877 = vmatprep.mubr.bf16.mxu1 %v2994_v51 }
 0x589   : > { %3878 = vmatmul.mubr.bf16.gmra.mrb[40].mxu1 %v2995_v21  ;;  %v4155_v21 = vld [vmem:[%s4291_s30 + $0x38] sm:$0xff] }
 0x592   : > { %v3835_v58 = vpop.f32.mrb[44].mxu0 }
 0x593   : > { %v2911_v30 = vpop.f32.mrb[45].mxu0 }
 0x594   : > { %v3836_v10 = vpop.f32.mrb[46].mxu0 }
 0x595   : > { %v2997_v9 = vpack.c.bf16 %v3836_v10, %v3835_v58  ;;  %v2914_v54 = vpop.f32.mrb[47].mxu0 }
 0x596   : > { %v2996_v44 = vpack.c.bf16 %v2914_v54, %v2911_v30  ;;  %v4156_v54 = vld [vmem:[%s4291_s30 + $0x40] sm:$0xff] }
 0x598   : > { %3881 = vmatprep.mubr.bf16.mxu1 %v2996_v44 }
 0x599   : > { %3882 = vmatmul.mubr.bf16.gmra.mrb[44].mxu1 %v2997_v9 }
 0x5a2   : > { %v3839_v18 = vpop.f32.mrb[48].mxu0 }
 0x5a3   : > { %v2927_v28 = vpop.f32.mrb[49].mxu0 }
 0x5a4   : > { %v3840_v62 = vpop.f32.mrb[50].mxu0 }
 0x5a5   : > { %v2999_v32 = vpack.c.bf16 %v3840_v62, %v3839_v18  ;;  %v2930_v13 = vpop.f32.mrb[51].mxu0  ;;  %v4157_v62 = vld [vmem:[%s4291_s30 + $0x48] sm:$0xff] }
 0x5a6   : > { %v2998_v26 = vpack.c.bf16 %v2930_v13, %v2927_v28  ;;  %v4158_v13 = vld [vmem:[%s4291_s30 + $0x50] sm:$0xff] }
 0x5a8   : > { %3885 = vmatprep.mubr.bf16.mxu1 %v2998_v26 }
 0x5a9   : > { %3886 = vmatmul.mubr.bf16.gmra.mrb[48].mxu1 %v2999_v32 }
 0x5af   : > { %v3843_v53 = vpop.f32.mrb[52].mxu0 }
 0x5b0   : > { %v2943_v8 = vpop.f32.mrb[53].mxu0 }
 0x5b1   : > { %v3844_v6 = vpop.f32.mrb[54].mxu0 }
 0x5b2   : > { %v3001_v40 = vpack.c.bf16 %v3844_v6, %v3843_v53  ;;  %v2946_v20 = vpop.f32.mrb[55].mxu0 }
 0x5b3   : > { %v3000_v7 = vpack.c.bf16 %v2946_v20, %v2943_v8  ;;  %v4159_v8 = vld [vmem:[%s4291_s30 + $0x58] sm:$0xff] }
 0x5b5   : > { %3889 = vmatprep.mubr.bf16.mxu1 %v3000_v7 }
 0x5b6   : > { %3890 = vmatmul.mubr.bf16.gmra.mrb[52].mxu1 %v3001_v40 }
 0x5be   : > { %v3847_v34 = vpop.f32.mrb[56].mxu0 }
 0x5bf   : > { %v2959_v59 = vpop.f32.mrb[57].mxu0 }
 0x5c0   : > { %v3848_v61 = vpop.f32.mrb[58].mxu0 }
 0x5c1   : > { %v3003_v42 = vpack.c.bf16 %v3848_v61, %v3847_v34  ;;  %v2962_v27 = vpop.f32.mrb[59].mxu0  ;;  %v4160_v61 = vld [vmem:[%s4291_s30 + $0x60] sm:$0xff] }
 0x5c2   : > { %v3002_v16 = vpack.c.bf16 %v2962_v27, %v2959_v59 }
 0x5c4   : > { %3893 = vmatprep.mubr.bf16.mxu1 %v3002_v16 }
 0x5c5   : > { %3894 = vmatmul.mubr.bf16.gmra.mrb[56].mxu1 %v3003_v42 }
 0x5ca   : > { %v3851_v4 = vpop.f32.mrb[60].mxu0 }
 0x5cb   : > { %v2975_v3 = vpop.f32.mrb[61].mxu0 }
 0x5cc   : > { %v3852_v11 = vpop.f32.mrb[62].mxu0 }
 0x5cd   : > { %v3005_v35 = vpack.c.bf16 %v3852_v11, %v3851_v4  ;;  %v2978_v41 = vpop.f32.mrb[63].mxu0  ;;  %v4161_v4 = vld [vmem:[%s4291_s30 + $0x68] sm:$0xff]  ;;  %v4162_v11 = vld [vmem:[%s4291_s30 + $0x70] sm:$0xff] }
 0x5ce   : > { %v3004_v60 = vpack.c.bf16 %v2978_v41, %v2975_v3 }
 0x5d0   : > { %3897 = vmatprep.mubr.bf16.mxu1 %v3004_v60  ;;  %v4163_v60 = vld [vmem:[%s4291_s30 + $0x78] sm:$0xff] }
 0x5d1   : > { %3898 = vmatmul.mubr.bf16.gmra.mrb[60].mxu1 %v3005_v35 }
 0x638   : > { %v3871_v37 = vpop.f32.mrb[32].mxu1 }
 0x639   : > { %v3111_v63 = vpop.f32.mrb[33].mxu1  ;;  %v3120_v39 = vadd.f32 %v3871_v37, %v5514_v22 }
 0x63a   : > { %v3112_v47 = vadd.f32 %v5514_v22, %v3111_v63  ;;  %v3872_v23 = vpop.f32.mrb[34].mxu1 }
 0x63b   : > { %v3114_v52 = vpop.f32.mrb[35].mxu1  ;;  %v3240_v57 = vadd.f32 %v4150_v0, %v3120_v39  ;;  %v3123_v5 = vadd.f32 %v3872_v23, %v5514_v22 }
 0x63c   : > { %v3238_v49 = vadd.f32 %v4148_v15, %v3112_v47  ;;  %v3115_v46 = vadd.f32 %v5514_v22, %v3114_v52 }
 0x63d   : > { %v3241_v29 = vadd.f32 %v4151_v56, %v3123_v5 }
 0x63e   : > { %3270 = vxpose.xlu0.b32.start [1/16] %v3238_v49, 128  ;;  %v3239_v24 = vadd.f32 %v4149_v17, %v3115_v46  ;;  %v4164_v49 = vld [vmem:[%s4291_s30 + $0x80] sm:$0xff] }
 0x642   : > { %3271 = vxpose.xlu0.b32.cont [2/16] %v3239_v24, 128  ;;  %v4165_v24 = vld [vmem:[%s4291_s30 + $0x88] sm:$0xff] }
 0x646   : > { %3272 = vxpose.xlu0.b32.cont [3/16] %v3240_v57, 128  ;;  %v4166_v57 = vld [vmem:[%s4291_s30 + $0x90] sm:$0xff] }
 0x64a   : > { %3273 = vxpose.xlu0.b32.cont [4/16] %v3241_v29, 128 }
 0x64c   : > { %v3875_v55 = vpop.f32.mrb[36].mxu1 }
 0x64d   : > { %v3127_v1 = vpop.f32.mrb[37].mxu1  ;;  %v3136_v38 = vadd.f32 %v3875_v55, %v5514_v22 }
 0x64e   : > { %v3128_v12 = vadd.f32 %v5514_v22, %v3127_v1  ;;  %v3876_v31 = vpop.f32.mrb[38].mxu1  ;;  %v4167_v1 = vld [vmem:[%s4291_s30 + $0x98] sm:$0xff] }
 0x64f   : > { %v3130_v45 = vpop.f32.mrb[39].mxu1  ;;  %v3244_v19 = vadd.f32 %v4154_v48, %v3136_v38  ;;  %v3139_v33 = vadd.f32 %v3876_v31, %v5514_v22 }
 0x650   : > { %v3242_v14 = vadd.f32 %v4152_v43, %v3128_v12  ;;  %v3131_v2 = vadd.f32 %v5514_v22, %v3130_v45 }
 0x651   : > { %v3245_v36 = vadd.f32 %v4155_v21, %v3139_v33 }
 0x652   : > { %3274 = vxpose.xlu0.b32.cont [5/16] %v3242_v14, 128  ;;  %v3243_v25 = vadd.f32 %v4153_v50, %v3131_v2  ;;  %v4168_v14 = vld [vmem:[%s4291_s30 + $0xa0] sm:$0xff] }
 0x656   : > { %3275 = vxpose.xlu0.b32.cont [6/16] %v3243_v25, 128  ;;  %v4169_v25 = vld [vmem:[%s4291_s30 + $0xa8] sm:$0xff] }
 0x65a   : > { %3276 = vxpose.xlu0.b32.cont [7/16] %v3244_v19, 128  ;;  %v4170_v19 = vld [vmem:[%s4291_s30 + $0xb0] sm:$0xff] }
 0x65c   : > { %v3879_v51 = vpop.f32.mrb[40].mxu1 }
 0x65d   : > { %v3143_v58 = vpop.f32.mrb[41].mxu1  ;;  %v3152_v28 = vadd.f32 %v3879_v51, %v5514_v22 }
 0x65e   : > { %v3144_v30 = vadd.f32 %v5514_v22, %v3143_v58  ;;  %3277 = vxpose.xlu0.b32.cont [8/16] %v3245_v36, 128  ;;  %v3880_v10 = vpop.f32.mrb[42].mxu1 }
 0x65f   : > { %v3146_v9 = vpop.f32.mrb[43].mxu1  ;;  %v3248_v26 = vadd.f32 %v4158_v13, %v3152_v28  ;;  %v3155_v53 = vadd.f32 %v3880_v10, %v5514_v22 }
 0x660   : > { %v3246_v44 = vadd.f32 %v4156_v54, %v3144_v30  ;;  %v3147_v18 = vadd.f32 %v5514_v22, %v3146_v9  ;;  %v4171_v9 = vld [vmem:[%s4291_s30 + $0xb8] sm:$0xff] }
 0x661   : > { %v3249_v6 = vadd.f32 %v4159_v8, %v3155_v53 }
 0x662   : > { %3278 = vxpose.xlu0.b32.cont [9/16] %v3246_v44, 128  ;;  %v3247_v32 = vadd.f32 %v4157_v62, %v3147_v18  ;;  %v4172_v44 = vld [vmem:[%s4291_s30 + $0xc0] sm:$0xff] }
 0x666   : > { %3279 = vxpose.xlu0.b32.cont [10/16] %v3247_v32, 128  ;;  %v4173_v32 = vld [vmem:[%s4291_s30 + $0xc8] sm:$0xff] }
 0x66a   : > { %3280 = vxpose.xlu0.b32.cont [11/16] %v3248_v26, 128 }
 0x66c   : > { %v3883_v40 = vpop.f32.mrb[44].mxu1 }
 0x66d   : > { %v3159_v20 = vpop.f32.mrb[45].mxu1  ;;  %v3168_v16 = vadd.f32 %v3883_v40, %v5514_v22 }
 0x66e   : > { %v3160_v7 = vadd.f32 %v5514_v22, %v3159_v20  ;;  %3281 = vxpose.xlu0.b32.cont [12/16] %v3249_v6, 128  ;;  %v3884_v34 = vpop.f32.mrb[46].mxu1  ;;  %v4174_v6 = vld [vmem:[%s4291_s30 + $0xd0] sm:$0xff] }
 0x66f   : > { %v3162_v59 = vpop.f32.mrb[47].mxu1  ;;  %v3252_v35 = vadd.f32 %v4162_v11, %v3168_v16  ;;  %v3171_v41 = vadd.f32 %v3884_v34, %v5514_v22  ;;  %v4175_v34 = vld [vmem:[%s4291_s30 + $0xd8] sm:$0xff] }
 0x670   : > { %v3250_v42 = vadd.f32 %v4160_v61, %v3160_v7  ;;  %v3163_v27 = vadd.f32 %v5514_v22, %v3162_v59 }
 0x671   : > { %v3253_v37 = vadd.f32 %v4163_v60, %v3171_v41 }
 0x672   : > { %3282 = vxpose.xlu0.b32.cont [13/16] %v3250_v42, 128  ;;  %v3251_v3 = vadd.f32 %v4161_v4, %v3163_v27  ;;  %v4176_v42 = vld [vmem:[%s4291_s30 + $0xe0] sm:$0xff] }
 0x676   : > { %3283 = vxpose.xlu0.b32.cont [14/16] %v3251_v3, 128  ;;  %v4177_v3 = vld [vmem:[%s4291_s30 + $0xe8] sm:$0xff] }
 0x67a   : > { %3284 = vxpose.xlu0.b32.cont [15/16] %v3252_v35, 128  ;;  %v4178_v35 = vld [vmem:[%s4291_s30 + $0xf0] sm:$0xff] }
 0x67c   : > { %v3887_v63 = vpop.f32.mrb[48].mxu1 }
 0x67d   : > { %v3175_v47 = vpop.f32.mrb[49].mxu1  ;;  %v3184_v17 = vadd.f32 %v3887_v63, %v5514_v22 }
 0x67e   : > { %v3176_v23 = vadd.f32 %v5514_v22, %v3175_v47  ;;  %3285 = vxpose.xlu0.b32.end [16/16] %v3253_v37, 128  ;;  %v3888_v52 = vpop.f32.mrb[50].mxu1  ;;  %v4179_v37 = vld [vmem:[%s4291_s30 + $0xf8] sm:$0xff] }
 0x67f   : > { %v3178_v15 = vpop.f32.mrb[51].mxu1  ;;  %v3256_v5 = vadd.f32 %v4166_v57, %v3184_v17  ;;  %v3187_v56 = vadd.f32 %v3888_v52, %v5514_v22 }
 0x680   : > { %v3254_v46 = vadd.f32 %v4164_v49, %v3176_v23  ;;  %v3179_v39 = vadd.f32 %v5514_v22, %v3178_v15 }
 0x681   : > { %v3257_v12 = vadd.f32 %v4167_v1, %v3187_v56 }
 0x682   : > { %3302 = vxpose.xlu1.b32.start [1/16] %v3254_v46, 128  ;;  %v3255_v0 = vadd.f32 %v4165_v24, %v3179_v39 }
 0x686   : > { %3303 = vxpose.xlu1.b32.cont [2/16] %v3255_v0, 128 }
 0x689   : > { %v3891_v29 = vpop.f32.mrb[52].mxu1 }
 0x68a   : > { %3304 = vxpose.xlu1.b32.cont [3/16] %v3256_v5, 128  ;;  %v3191_v55 = vpop.f32.mrb[53].mxu1  ;;  %v3200_v50 = vadd.f32 %v3891_v29, %v5514_v22 }
 0x68b   : > { %v3192_v31 = vadd.f32 %v5514_v22, %v3191_v55  ;;  %v3892_v45 = vpop.f32.mrb[54].mxu1 }
 0x68c   : > { %v3194_v43 = vpop.f32.mrb[55].mxu1  ;;  %v3260_v33 = vadd.f32 %v4170_v19, %v3200_v50  ;;  %v3203_v21 = vadd.f32 %v3892_v45, %v5514_v22 }
 0x68d   : > { %v3258_v2 = vadd.f32 %v4168_v14, %v3192_v31  ;;  %v3195_v38 = vadd.f32 %v5514_v22, %v3194_v43 }
 0x68e   : > { %3305 = vxpose.xlu1.b32.cont [4/16] %v3257_v12, 128  ;;  %v3261_v54 = vadd.f32 %v4171_v9, %v3203_v21 }
 0x68f   : > { %v3259_v48 = vadd.f32 %v4169_v25, %v3195_v38 }
 0x692   : > { %3306 = vxpose.xlu1.b32.cont [5/16] %v3258_v2, 128 }
 0x696   : > { %3307 = vxpose.xlu1.b32.cont [6/16] %v3259_v48, 128 }
 0x698   : > { %v3895_v36 = vpop.f32.mrb[56].mxu1 }
 0x699   : > { %v3207_v51 = vpop.f32.mrb[57].mxu1  ;;  %v3216_v62 = vadd.f32 %v3895_v36, %v5514_v22 }
 0x69a   : > { %3308 = vxpose.xlu1.b32.cont [7/16] %v3260_v33, 128  ;;  %v3208_v58 = vadd.f32 %v5514_v22, %v3207_v51  ;;  %v3896_v30 = vpop.f32.mrb[58].mxu1 }
 0x69b   : > { %v3210_v10 = vpop.f32.mrb[59].mxu1  ;;  %v3264_v40 = vadd.f32 %v4174_v6, %v3216_v62  ;;  %v3219_v20 = vadd.f32 %v3896_v30, %v5514_v22 }
 0x69c   : > { %v3262_v18 = vadd.f32 %v4172_v44, %v3208_v58  ;;  %v3211_v28 = vadd.f32 %v5514_v22, %v3210_v10 }
 0x69d   : > { %v3265_v59 = vadd.f32 %v4175_v34, %v3219_v20 }
 0x69e   : > { %3309 = vxpose.xlu1.b32.cont [8/16] %v3261_v54, 128  ;;  %v3263_v13 = vadd.f32 %v4173_v32, %v3211_v28 }
 0x6a2   : > { %3310 = vxpose.xlu1.b32.cont [9/16] %v3262_v18, 128 }
 0x6a4   : > { %v3899_v26 = vpop.f32.mrb[60].mxu1 }
 0x6a5   : > { %v3223_v53 = vpop.f32.mrb[61].mxu1  ;;  %v3232_v4 = vadd.f32 %v3899_v26, %v5514_v22 }
 0x6a6   : > { %3311 = vxpose.xlu1.b32.cont [10/16] %v3263_v13, 128  ;;  %v3900_v8 = vpop.f32.mrb[62].mxu1  ;;  %v3224_v61 = vadd.f32 %v5514_v22, %v3223_v53 }
 0x6a7   : > { %v3226_v7 = vpop.f32.mrb[63].mxu1  ;;  %v3268_v41 = vadd.f32 %v4178_v35, %v3232_v4  ;;  %v3235_v60 = vadd.f32 %v3900_v8, %v5514_v22 }
 0x6a8   : > { %v3266_v27 = vadd.f32 %v4176_v42, %v3224_v61  ;;  %v3227_v16 = vadd.f32 %v5514_v22, %v3226_v7 }
 0x6a9   : > { %v3269_v63 = vadd.f32 %v4179_v37, %v3235_v60 }
 0x6aa   : > { %3312 = vxpose.xlu1.b32.cont [11/16] %v3264_v40, 128  ;;  %v3267_v11 = vadd.f32 %v4177_v3, %v3227_v16 }
 0x6ae   : > { %3313 = vxpose.xlu1.b32.cont [12/16] %v3265_v59, 128 }
 0x6b2   : > { %3314 = vxpose.xlu1.b32.cont [13/16] %v3266_v27, 128 }
 0x6b6   : > { %3315 = vxpose.xlu1.b32.cont [14/16] %v3267_v11, 128 }
 0x6ba   : > { %3316 = vxpose.xlu1.b32.cont [15/16] %v3268_v41, 128 }
 0x6be   : > { %3317 = vxpose.xlu1.b32.end [16/16] %v3269_v63, 128 }
 0x6c2   : > { %v3286_v47 = vpop.trf.xlu0 }
 0x6c3   : > { %3334 = vst [vmem:[%s4301_s19] sm:$0xff] %v3286_v47 }
 0x6c6   : > { %v3287_v23 = vpop.trf.xlu0 }
 0x6c7   : > { %3336 = vst [vmem:[%s4301_s19 + $0x10] sm:$0xff] %v3287_v23 }
 0x6ca   : > { %v3288_v52 = vpop.trf.xlu0 }
 0x6cb   : > { %3338 = vst [vmem:[%s4301_s19 + $0x20] sm:$0xff] %v3288_v52 }
 0x6ce   : > { %v3289_v15 = vpop.trf.xlu0 }
 0x6cf   : > { %3340 = vst [vmem:[%s4301_s19 + $0x30] sm:$0xff] %v3289_v15 }
 0x6d2   : > { %v3290_v22 = vpop.trf.xlu0 }
 0x6d3   : > { %3342 = vst [vmem:[%s4301_s19 + $0x40] sm:$0xff] %v3290_v22 }
 0x6d6   : > { %v3291_v49 = vpop.trf.xlu0 }
 0x6d7   : > { %3344 = vst [vmem:[%s4301_s19 + $0x50] sm:$0xff] %v3291_v49 }
 0x6da   : > { %v3292_v46 = vpop.trf.xlu0 }
 0x6db   : > { %3346 = vst [vmem:[%s4301_s19 + $0x60] sm:$0xff] %v3292_v46 }
 0x6de   : > { %v3293_v39 = vpop.trf.xlu0 }
 0x6df   : > { %3348 = vst [vmem:[%s4301_s19 + $0x70] sm:$0xff] %v3293_v39 }
 0x6e2   : > { %v3294_v17 = vpop.trf.xlu0 }
 0x6e3   : > { %3350 = vst [vmem:[%s4301_s19 + $0x80] sm:$0xff] %v3294_v17 }
 0x6e6   : > { %v3295_v24 = vpop.trf.xlu0 }
 0x6e7   : > { %3352 = vst [vmem:[%s4301_s19 + $0x90] sm:$0xff] %v3295_v24 }
 0x6ea   : > { %v3296_v0 = vpop.trf.xlu0 }
 0x6eb   : > { %3354 = vst [vmem:[%s4301_s19 + $0xa0] sm:$0xff] %v3296_v0 }
 0x6ee   : > { %v3297_v57 = vpop.trf.xlu0 }
 0x6ef   : > { %3356 = vst [vmem:[%s4301_s19 + $0xb0] sm:$0xff] %v3297_v57 }
 0x6f2   : > { %v3298_v5 = vpop.trf.xlu0 }
 0x6f3   : > { %3358 = vst [vmem:[%s4301_s19 + $0xc0] sm:$0xff] %v3298_v5 }
 0x6f6   : > { %v3299_v56 = vpop.trf.xlu0 }
 0x6f7   : > { %3360 = vst [vmem:[%s4301_s19 + $0xd0] sm:$0xff] %v3299_v56 }
 0x6fa   : > { %v3300_v29 = vpop.trf.xlu0 }
 0x6fb   : > { %3362 = vst [vmem:[%s4301_s19 + $0xe0] sm:$0xff] %v3300_v29 }
 0x6fe   : > { %v3301_v55 = vpop.trf.xlu0 }
 0x6ff   : > { %3364 = vst [vmem:[%s4301_s19 + $0xf0] sm:$0xff] %v3301_v55 }
 0x702   : > { %v3318_v1 = vpop.trf.xlu1 }
 0x703   : > { %3335 = vst [vmem:[%s4301_s19 + $0x8] sm:$0xff] %v3318_v1 }
 0x706   : > { %v3319_v12 = vpop.trf.xlu1 }
 0x707   : > { %3337 = vst [vmem:[%s4301_s19 + $0x18] sm:$0xff] %v3319_v12 }
 0x70a   : > { %v3320_v31 = vpop.trf.xlu1 }
 0x70b   : > { %3339 = vst [vmem:[%s4301_s19 + $0x28] sm:$0xff] %v3320_v31 }
 0x70e   : > { %v3321_v45 = vpop.trf.xlu1 }
 0x70f   : > { %3341 = vst [vmem:[%s4301_s19 + $0x38] sm:$0xff] %v3321_v45 }
 0x712   : > { %v3322_v43 = vpop.trf.xlu1 }
 0x713   : > { %3343 = vst [vmem:[%s4301_s19 + $0x48] sm:$0xff] %v3322_v43 }
 0x716   : > { %v3323_v14 = vpop.trf.xlu1 }
 0x717   : > { %3345 = vst [vmem:[%s4301_s19 + $0x58] sm:$0xff] %v3323_v14 }
 0x71a   : > { %v3324_v2 = vpop.trf.xlu1 }
 0x71b   : > { %3347 = vst [vmem:[%s4301_s19 + $0x68] sm:$0xff] %v3324_v2 }
 0x71e   : > { %v3325_v38 = vpop.trf.xlu1 }
 0x71f   : > { %3349 = vst [vmem:[%s4301_s19 + $0x78] sm:$0xff] %v3325_v38 }
 0x722   : > { %v3326_v50 = vpop.trf.xlu1 }
 0x723   : > { %3351 = vst [vmem:[%s4301_s19 + $0x88] sm:$0xff] %v3326_v50 }
 0x726   : > { %v3327_v25 = vpop.trf.xlu1 }
 0x727   : > { %3353 = vst [vmem:[%s4301_s19 + $0x98] sm:$0xff] %v3327_v25 }
 0x72a   : > { %v3328_v48 = vpop.trf.xlu1 }
 0x72b   : > { %3355 = vst [vmem:[%s4301_s19 + $0xa8] sm:$0xff] %v3328_v48 }
 0x72e   : > { %v3329_v19 = vpop.trf.xlu1 }
 0x72f   : > { %3357 = vst [vmem:[%s4301_s19 + $0xb8] sm:$0xff] %v3329_v19 }
 0x732   : > { %v3330_v33 = vpop.trf.xlu1 }
 0x733   : > { %3359 = vst [vmem:[%s4301_s19 + $0xc8] sm:$0xff] %v3330_v33 }
 0x736   : > { %v3331_v21 = vpop.trf.xlu1 }
 0x737   : > { %3361 = vst [vmem:[%s4301_s19 + $0xd8] sm:$0xff] %v3331_v21 }
 0x73a   : > { %v3332_v36 = vpop.trf.xlu1 }
 0x73b   : > { %3363 = vst [vmem:[%s4301_s19 + $0xe8] sm:$0xff] %v3332_v36 }
 0x73e   : > { %v3333_v51 = vpop.trf.xlu1 }
 0x73f   : > { %3365 = vst [vmem:[%s4301_s19 + $0xf8] sm:$0xff] %v3333_v51 }
 0x740 PF: > { %s22_s23 = sadd.s32 1, %s4202_s23   ;;  %s5671_s21 = sld [smem:[#allocation3_spill]] }
 0x741   : > { %p19_p6 = scmp.ge.s32.totalorder %s22_s23, 4   ;;  %s5672_s22 = sld [smem:[#allocation4_spill]] }
 0x743   :  { %21 = sbr.rel (!%p19_p6) target bundleno = 2 (0x2), region = 117 }

</bundles_post_ra>
